<compile_context>
chip_gen: v5e
topology: v5e:2x2
jax: 0.10.0
libtpu: 0.0.40
codegen_flags: <defaults>
</compile_context>

<pallas_src>
import functools

import jax
import jax.numpy as jnp
from jax import lax
from jax.experimental import pallas as pl
from jax.experimental.pallas import tpu as pltpu

# ----------------------------------------------------------------------------
# Model / tiling config
# ----------------------------------------------------------------------------
NUM_CLASSES = 20
REFINE_TIMES = 3
HIDDEN = 64
CONV_CH = 16
ROI_RES = 7
SPATIAL_SCALE = 0.25           # two maxpool-2 stages

# Tile sizes sized to stay well under v7x's 64 MiB physical / 32 MiB scoped VMEM
# even with double-buffered bf16 input tiles.
TILE_M, TILE_N, TILE_K = 256, 256, 512
VMEM_LIMIT = 32 * 1024 * 1024


def _round_up(x, m):
    return ((x + m - 1) // m) * m


def _full_spec(shape):
    # whole-array block (block dims equal full dims -> always legal on TPU)
    return pl.BlockSpec(shape, lambda i: (0,) * len(shape))


# ----------------------------------------------------------------------------
# Tiled bf16 matmul kernel:  y = act(x @ w + b)
# ----------------------------------------------------------------------------
def _matmul_kernel(x_ref, w_ref, b_ref, o_ref, acc_ref, *, activation):
    @pl.when(pl.program_id(2) == 0)
    def _init():
        acc_ref[...] = jnp.zeros_like(acc_ref)

    acc_ref[...] += jnp.dot(x_ref[...], w_ref[...],
                            preferred_element_type=jnp.float32)

    @pl.when(pl.program_id(2) == pl.num_programs(2) - 1)
    def _finalize():
        y = acc_ref[...] + b_ref[...]          # bias added once, after K loop
        if activation == "relu":
            y = jnp.maximum(y, 0.0)
        o_ref[...] = y.astype(o_ref.dtype)


def pad_linear_params(w, b):
    """One-time packing of a (K, N) weight / (N,) bias: bf16 cast + (8,128) padding."""
    K, N = w.shape
    Kp0, Np0 = _round_up(K, 128), _round_up(N, 128)
    tk, tn = min(TILE_K, Kp0), min(TILE_N, Np0)
    Kp, Np = _round_up(Kp0, tk), _round_up(Np0, tn)
    wp = jnp.zeros((Kp, Np), jnp.bfloat16).at[:K, :N].set(w.astype(jnp.bfloat16))
    bp = jnp.zeros((1, Np), jnp.float32).at[0, :N].set(b.astype(jnp.float32))
    return wp, bp


def pallas_matmul(x, w_pad, b_pad, n_out, activation="none", out_dtype=jnp.float32):
    """act(x @ w + b): M/N/K-tiled bf16 MXU matmul with f32 VMEM accumulator."""
    M, K = x.shape
    Kp, Np = w_pad.shape
    Mp0 = _round_up(M, 8)
    tm = min(TILE_M, Mp0)
    Mp = _round_up(Mp0, tm)
    tk = min(TILE_K, Kp)
    tn = min(TILE_N, Np)
    xp = jnp.zeros((Mp, Kp), jnp.bfloat16).at[:M, :K].set(x.astype(jnp.bfloat16))
    grid = (Mp // tm, Np // tn, Kp // tk)
    out = pl.pallas_call(
        functools.partial(_matmul_kernel, activation=activation),
        out_shape=jax.ShapeDtypeStruct((Mp, Np), out_dtype),
        grid_spec=pltpu.PrefetchScalarGridSpec(
            num_scalar_prefetch=0,
            grid=grid,
            in_specs=[
                pl.BlockSpec((tm, tk), lambda i, j, k: (i, k)),
                pl.BlockSpec((tk, tn), lambda i, j, k: (k, j)),
                pl.BlockSpec((1, tn), lambda i, j, k: (0, j)),
            ],
            out_specs=pl.BlockSpec((tm, tn), lambda i, j, k: (i, j)),
            scratch_shapes=[pltpu.VMEM((tm, tn), jnp.float32)],
        ),
        compiler_params=pltpu.CompilerParams(
            dimension_semantics=("parallel", "parallel", "arbitrary"),
            vmem_limit_bytes=VMEM_LIMIT,
        ),
    )(xp, w_pad, b_pad)
    return out[:M, :n_out]


# ----------------------------------------------------------------------------
# Fused output heads: MIL (WSDDN), 3x refine, FRCNN cls + bbox — ONE kernel
# ----------------------------------------------------------------------------
def _softmax_lastdim(s):
    m = jnp.max(s, axis=-1, keepdims=True)
    e = jnp.exp(s - m)
    return e * pl.reciprocal(jnp.sum(e, axis=-1, keepdims=True), approx=True)


def _heads_kernel(x_ref, w_ref, b_ref, rmask_ref, o_ref):
    NC, NC1 = NUM_CLASSES, NUM_CLASSES + 1
    neg = jnp.float32(-1e30)
    logits = jnp.dot(x_ref[...], w_ref[...],
                     preferred_element_type=jnp.float32) + b_ref[...]
    rmask = rmask_ref[...]                                  # (Mp, 1): 1.0 = real RoI

    # WSDDN MIL head: softmax over classes (rows) * softmax over proposals (cols).
    s_cls = logits[:, 0:NC]
    s_det = logits[:, NC:2 * NC]
    p_cls = _softmax_lastdim(s_cls)
    s_det = jnp.where(rmask > 0.0, s_det, neg)              # padded RoIs must not feed
    m_det = jnp.max(s_det, axis=0, keepdims=True)           # the proposal-softmax
    e_det = jnp.exp(s_det - m_det) * rmask                  # denominator
    p_det = e_det * pl.reciprocal(jnp.sum(e_det, axis=0, keepdims=True), approx=True)

    pieces = [p_cls * p_det]                                # mil_score
    off = 2 * NC
    for _ in range(REFINE_TIMES + 1):                       # 3 refine heads + FRCNN cls
        pieces.append(_softmax_lastdim(logits[:, off:off + NC1]))
        off += NC1
    pieces.append(logits[:, off:off + 4 * NC1])             # bbox_pred (raw linear)
    off += 4 * NC1

    out = jnp.concatenate(pieces, axis=-1)
    pad = o_ref.shape[-1] - out.shape[-1]
    if pad > 0:                                             # lane-dense 256-wide store
        out = jnp.concatenate(
            [out, jnp.zeros((out.shape[0], pad), jnp.float32)], axis=-1)
    o_ref[...] = out


def pallas_fused_heads(box_feat, w_pad, b_pad):
    R, K = box_feat.shape
    Kp, Np = w_pad.shape
    Mp = _round_up(max(R, 8), 8)
    xp = jnp.zeros((Mp, Kp), jnp.bfloat16).at[:R, :K].set(
        box_feat.astype(jnp.bfloat16))
    rmask = (jnp.arange(Mp) < R).astype(jnp.float32).reshape(Mp, 1)
    out = pl.pallas_call(
        _heads_kernel,
        grid=(1,),
        in_specs=[_full_spec((Mp, Kp)), _full_spec((Kp, Np)),
                  _full_spec((1, Np)), _full_spec((Mp, 1))],
        out_specs=_full_spec((Mp, Np)),
        out_shape=jax.ShapeDtypeStruct((Mp, Np), jnp.float32),
        compiler_params=pltpu.CompilerParams(vmem_limit_bytes=VMEM_LIMIT),
    )(xp, w_pad, b_pad, rmask)
    return out[:R]


# ----------------------------------------------------------------------------
# RoIPool (Caffe RoIPoolF) as a Pallas kernel with scalar-prefetched bins
# ----------------------------------------------------------------------------
def _roi_pool_kernel(hs_ref, he_ref, ws_ref, we_ref, fm_ref, o_ref, *, res):
    r = pl.program_id(0)
    Hf, Wf, C = fm_ref.shape
    fm = fm_ref[...]
    neg = jnp.float32(-1e30)
    hh = lax.broadcasted_iota(jnp.int32, (Hf, Wf, C), 0)
    ww = lax.broadcasted_iota(jnp.int32, (Wf, C), 0)
    bins = []
    for ph in range(res):
        h0 = hs_ref[r, ph]
        h1 = he_ref[r, ph]
        # separable max: reduce rows of this h-bin once, reuse for all 7 w-bins
        row = jnp.max(jnp.where((hh >= h0) & (hh < h1), fm, neg), axis=0)    # (Wf, C)
        for pw in range(res):
            w0 = ws_ref[r, pw]
            w1 = we_ref[r, pw]
            v = jnp.max(jnp.where((ww >= w0) & (ww < w1), row, neg),
                        axis=0, keepdims=True)                               # (1, C)
            empty = jnp.logical_or(h1 <= h0, w1 <= w0)
            bins.append(jnp.where(empty, jnp.zeros_like(v), v))
    o_ref[...] = jnp.concatenate(bins, axis=0)[None]


def roi_pool(fm_hwc, rois, resolution=ROI_RES, spatial_scale=SPATIAL_SCALE):
    """RoIPoolF. fm: (Hf,Wf,C); rois: (R,5)=[batch_idx,x1,y1,x2,y2].
    Returns channel-major flattened (R, C*res*res) matching torch's
    (R, C, res, res).view(R, -1)."""
    Hf, Wf, C = fm_hwc.shape
    res = resolution
    R = rois.shape[0]
    x1 = jnp.round(rois[:, 1] * spatial_scale)
    y1 = jnp.round(rois[:, 2] * spatial_scale)
    x2 = jnp.round(rois[:, 3] * spatial_scale)
    y2 = jnp.round(rois[:, 4] * spatial_scale)
    bin_w = jnp.maximum(x2 - x1 + 1.0, 1.0) / res
    bin_h = jnp.maximum(y2 - y1 + 1.0, 1.0) / res
    pb = jnp.arange(res, dtype=jnp.float32)[None, :]
    hs = jnp.clip(jnp.floor(pb * bin_h[:, None]) + y1[:, None], 0.0, float(Hf))
    he = jnp.clip(jnp.ceil((pb + 1.0) * bin_h[:, None]) + y1[:, None], 0.0, float(Hf))
    ws = jnp.clip(jnp.floor(pb * bin_w[:, None]) + x1[:, None], 0.0, float(Wf))
    we = jnp.clip(jnp.ceil((pb + 1.0) * bin_w[:, None]) + x1[:, None], 0.0, float(Wf))
    pooled = pl.pallas_call(
        functools.partial(_roi_pool_kernel, res=res),
        out_shape=jax.ShapeDtypeStruct((R, res * res, C), jnp.float32),
        grid_spec=pltpu.PrefetchScalarGridSpec(
            num_scalar_prefetch=4,
            grid=(R,),
            in_specs=[pl.BlockSpec((Hf, Wf, C), lambda r, *_: (0, 0, 0))],
            out_specs=pl.BlockSpec((1, res * res, C), lambda r, *_: (r, 0, 0)),
        ),
        compiler_params=pltpu.CompilerParams(dimension_semantics=("parallel",)),
    )(hs.astype(jnp.int32), he.astype(jnp.int32),
      ws.astype(jnp.int32), we.astype(jnp.int32),
      fm_hwc.astype(jnp.float32))
    return jnp.transpose(pooled, (0, 2, 1)).reshape(R, C * res * res)


# ----------------------------------------------------------------------------
# Conv body glue: im2col (XLA) + tiled bf16 Pallas matmul, maxpool (XLA)
# ----------------------------------------------------------------------------
def conv3x3_relu(x_hwc, w_pad, b_pad, cout):
    """Same-padded 3x3 conv + ReLU; matmul/bias/ReLU in the tiled Pallas kernel."""
    H, W, Cin = x_hwc.shape
    xp = jnp.pad(x_hwc, ((1, 1), (1, 1), (0, 0)))
    patches = jnp.stack(
        [xp[i:i + H, j:j + W, :] for i in range(3) for j in range(3)], axis=-2
    ).reshape(H * W, 9 * Cin)
    y = pallas_matmul(patches, w_pad, b_pad, n_out=cout, activation="relu",
                      out_dtype=jnp.float32)
    return y.reshape(H, W, cout)


def maxpool2x2(x_hwc):
    H, W, C = x_hwc.shape
    return x_hwc.reshape(H // 2, 2, W // 2, 2, C).max(axis=(1, 3))


# ----------------------------------------------------------------------------
# Parameters
# ----------------------------------------------------------------------------
def init_params(key):
    ks = jax.random.split(key, 16)
    p = {}
    p["conv1_w"] = 0.1 * jax.random.normal(ks[0], (3, 3, 3, CONV_CH), jnp.float32)
    p["conv1_b"] = jnp.zeros((CONV_CH,), jnp.float32)
    p["conv2_w"] = 0.1 * jax.random.normal(ks[1], (3, 3, CONV_CH, CONV_CH), jnp.float32)
    p["conv2_b"] = jnp.zeros((CONV_CH,), jnp.float32)
    d_in = CONV_CH * ROI_RES * ROI_RES
    p["fc6_w"] = 0.05 * jax.random.normal(ks[2], (d_in, HIDDEN), jnp.float32)
    p["fc6_b"] = jnp.zeros((HIDDEN,), jnp.float32)
    p["fc7_w"] = 0.05 * jax.random.normal(ks[3], (HIDDEN, HIDDEN), jnp.float32)
    p["fc7_b"] = jnp.zeros((HIDDEN,), jnp.float32)
    p["mil0_w"] = 0.05 * jax.random.normal(ks[4], (HIDDEN, NUM_CLASSES), jnp.float32)
    p["mil0_b"] = jnp.zeros((NUM_CLASSES,), jnp.float32)
    p["mil1_w"] = 0.05 * jax.random.normal(ks[5], (HIDDEN, NUM_CLASSES), jnp.float32)
    p["mil1_b"] = jnp.zeros((NUM_CLASSES,), jnp.float32)
    for i in range(REFINE_TIMES):
        p[f"refine{i}_w"] = 0.05 * jax.random.normal(
            ks[6 + i], (HIDDEN, NUM_CLASSES + 1), jnp.float32)
        p[f"refine{i}_b"] = jnp.zeros((NUM_CLASSES + 1,), jnp.float32)
    p["cls_w"] = 0.05 * jax.random.normal(ks[10], (HIDDEN, NUM_CLASSES + 1), jnp.float32)
    p["cls_b"] = jnp.zeros((NUM_CLASSES + 1,), jnp.float32)
    p["bbox_w"] = 0.01 * jax.random.normal(ks[11], (HIDDEN, 4 * (NUM_CLASSES + 1)), jnp.float32)
    p["bbox_b"] = jnp.zeros((4 * (NUM_CLASSES + 1),), jnp.float32)
    return p


def prepare_params(p):
    """One-time packing: bf16 casts, (8,128) padding, and fusion of the six head
    projections into a single lane-dense (128, 256) matrix."""
    q = {}
    q["conv1_w"], q["conv1_b"] = pad_linear_params(
        p["conv1_w"].reshape(9 * 3, CONV_CH), p["conv1_b"])
    q["conv2_w"], q["conv2_b"] = pad_linear_params(
        p["conv2_w"].reshape(9 * CONV_CH, CONV_CH), p["conv2_b"])
    q["fc6_w"], q["fc6_b"] = pad_linear_params(p["fc6_w"], p["fc6_b"])
    q["fc7_w"], q["fc7_b"] = pad_linear_params(p["fc7_w"], p["fc7_b"])

    hw = jnp.concatenate(
        [p["mil0_w"], p["mil1_w"]]
        + [p[f"refine{i}_w"] for i in range(REFINE_TIMES)]
        + [p["cls_w"], p["bbox_w"]], axis=1)                         # (64, 208)
    hb = jnp.concatenate(
        [p["mil0_b"], p["mil1_b"]]
        + [p[f"refine{i}_b"] for i in range(REFINE_TIMES)]
        + [p["cls_b"], p["bbox_b"]], axis=0)                         # (208,)
    Kh, Nh = hw.shape
    Kp, Np = _round_up(Kh, 128), _round_up(Nh, 128)                  # (128, 256)
    q["heads_w"] = jnp.zeros((Kp, Np), jnp.bfloat16).at[:Kh, :Nh].set(
        hw.astype(jnp.bfloat16))
    q["heads_b"] = jnp.zeros((1, Np), jnp.float32).at[0, :Nh].set(hb)
    return q


# ----------------------------------------------------------------------------
# Forward (inference path of Generalized_RCNN._forward, training=False)
# ----------------------------------------------------------------------------
def generalized_rcnn_forward(kp, data_nchw, rois, labels):
    del labels  # labels only feed training-time losses
    NC, NC1 = NUM_CLASSES, NUM_CLASSES + 1

    # ---- Conv_Body ------------------------------------------------------
    x = jnp.transpose(data_nchw[0], (1, 2, 0))                       # NCHW -> HWC
    x = conv3x3_relu(x, kp["conv1_w"], kp["conv1_b"], CONV_CH)
    x = maxpool2x2(x)
    x = conv3x3_relu(x, kp["conv2_w"], kp["conv2_b"], CONV_CH)
    x = maxpool2x2(x)                                                # (Hf, Wf, C)
    blob_conv = jnp.transpose(x, (2, 0, 1))[None]                    # back to NCHW

    # ---- Box_Head: RoIPool + fc6/fc7 ------------------------------------
    pooled = roi_pool(x, rois, ROI_RES, SPATIAL_SCALE)               # (R, C*49)
    h = pallas_matmul(pooled, kp["fc6_w"], kp["fc6_b"], HIDDEN, "relu", jnp.bfloat16)
    box_feat = pallas_matmul(h, kp["fc7_w"], kp["fc7_b"], HIDDEN, "relu", jnp.bfloat16)

    # ---- All six output heads in ONE fused lane-dense Pallas kernel -----
    heads = pallas_fused_heads(box_feat, kp["heads_w"], kp["heads_b"])
    mil_score = heads[:, 0:NC]
    off = NC
    refine_score = []
    for _ in range(REFINE_TIMES):
        refine_score.append(heads[:, off:off + NC1])
        off += NC1
    cls_score = heads[:, off:off + NC1]
    off += NC1
    bbox_pred = heads[:, off:off + 4 * NC1]

    return {
        "blob_conv": blob_conv,
        "rois": rois,
        "mil_score": mil_score,
        "refine_score": refine_score,
        "cls_score": cls_score,
        "bbox_pred": bbox_pred,
    }


# ----------------------------------------------------------------------------
if __name__ == "__main__":
    key = jax.random.PRNGKey(0)
    k_data, k_roi, k_lab, k_par = jax.random.split(key, 4)

    B, C, H, W = 1, 3, 32, 32
    R = 8

    data = jax.random.normal(k_data, (B, C, H, W), jnp.float32)

    # rois: [batch_idx, x1, y1, x2, y2] in image coordinates
    xy1 = jax.random.uniform(k_roi, (R, 2), minval=0.0, maxval=12.0)
    wh = jax.random.uniform(jax.random.fold_in(k_roi, 1), (R, 2), minval=6.0, maxval=18.0)
    xy2 = jnp.minimum(xy1 + wh, float(W - 1))
    rois = jnp.concatenate(
        [jnp.zeros((R, 1), jnp.float32), xy1[:, :1], xy1[:, 1:], xy2[:, :1], xy2[:, 1:]],
        axis=1).astype(jnp.float32)

    labels = (jax.random.uniform(k_lab, (1, NUM_CLASSES)) > 0.7).astype(jnp.float32)

    params = init_params(k_par)
    kparams = prepare_params(params)     # bf16 cast / pad / head fusion done ONCE

    fwd = jax.jit(generalized_rcnn_forward)
    out = fwd(kparams, data, rois, labels)
    jax.block_until_ready(out)

    # light sanity checks
    assert out["mil_score"].shape == (R, NUM_CLASSES)
    assert len(out["refine_score"]) == REFINE_TIMES
    assert out["refine_score"][0].shape == (R, NUM_CLASSES + 1)
    assert out["cls_score"].shape == (R, NUM_CLASSES + 1)
    assert out["bbox_pred"].shape == (R, 4 * (NUM_CLASSES + 1))
    assert out["blob_conv"].shape == (1, CONV_CH, H // 4, W // 4)

    print("KERNEL_OK")
</pallas_src>

<mosaic_0001>
module attributes {stable_mosaic.version = 11 : i64} {
  func.func @_matmul_kernel(%arg0: i32, %arg1: i32, %arg2: i32, %arg3: memref<256x128xbf16, #tpu.memory_space<vmem>>, %arg4: memref<128x128xbf16, #tpu.memory_space<vmem>>, %arg5: memref<1x128xf32, #tpu.memory_space<vmem>>, %arg6: memref<256x128xf32, #tpu.memory_space<vmem>>, %arg7: memref<256x128xf32, #tpu.memory_space<vmem>>) attributes {dimension_semantics = [#tpu.dimension_semantics<parallel>, #tpu.dimension_semantics<parallel>, #tpu.dimension_semantics<arbitrary>], iteration_bounds = array<i64: 4, 1, 1>, scalar_prefetch = 0 : i64, scratch_operands = 1 : i64, tpu.core_type = #tpu.core_type<tc>, window_params = [{transform_indices = @transform_0, window_bounds = array<i64: 256, 128>}, {transform_indices = @transform_1, window_bounds = array<i64: 128, 128>}, {transform_indices = @transform_2, window_bounds = array<i64: 1, 128>}, {transform_indices = @transform_3, window_bounds = array<i64: 256, 128>}]} {
    %c0_i32 = arith.constant 0 : i32
    %0 = arith.cmpi eq, %arg2, %c0_i32 : i32
    %1 = arith.extui %0 : i1 to i32
    %c0_i32_0 = arith.constant 0 : i32
    %2 = arith.cmpi ne, %1, %c0_i32_0 : i32
    scf.if %2 {
      %cst_10 = arith.constant 0.000000e+00 : f32
      %12 = vector.broadcast %cst_10 : f32 to vector<256x128xf32>
      %c0_11 = arith.constant 0 : index
      %c0_12 = arith.constant 0 : index
      %13 = vector.load %arg7[%c0_11, %c0_12] : memref<256x128xf32, #tpu.memory_space<vmem>>, vector<256x128xf32>
      tpu.vector_store %arg7[%c0_11, %c0_12], %12 {strides = array<i32>} : memref<256x128xf32, #tpu.memory_space<vmem>>, vector<256x128xf32>,
    } else {
    }
    %c0 = arith.constant 0 : index
    %c0_1 = arith.constant 0 : index
    %3 = vector.load %arg7[%c0, %c0_1] : memref<256x128xf32, #tpu.memory_space<vmem>>, vector<256x128xf32>
    %c0_2 = arith.constant 0 : index
    %c0_3 = arith.constant 0 : index
    %4 = vector.load %arg3[%c0_2, %c0_3] : memref<256x128xbf16, #tpu.memory_space<vmem>>, vector<256x128xbf16>
    %c0_4 = arith.constant 0 : index
    %c0_5 = arith.constant 0 : index
    %5 = vector.load %arg4[%c0_4, %c0_5] : memref<128x128xbf16, #tpu.memory_space<vmem>>, vector<128x128xbf16>
    %cst = arith.constant dense<0.000000e+00> : vector<256x128xf32>
    %6 = tpu.matmul %4, %5, %cst {dimension_numbers = #tpu.dot_dimension_numbers<[1], [0], [0], [1], [0, 0, 1, 1], [], []>} : vector<256x128xbf16>, vector<128x128xbf16>, vector<256x128xf32> -> vector<256x128xf32>
    %7 = arith.addf %3, %6 : vector<256x128xf32>
    %c0_6 = arith.constant 0 : index
    %c0_7 = arith.constant 0 : index
    %8 = vector.load %arg7[%c0_6, %c0_7] : memref<256x128xf32, #tpu.memory_space<vmem>>, vector<256x128xf32>
    tpu.vector_store %arg7[%c0_6, %c0_7], %7 {strides = array<i32>} : memref<256x128xf32, #tpu.memory_space<vmem>>, vector<256x128xf32>,
    %c0_i32_8 = arith.constant 0 : i32
    %9 = arith.cmpi eq, %arg2, %c0_i32_8 : i32
    %10 = arith.extui %9 : i1 to i32
    %c0_i32_9 = arith.constant 0 : i32
    %11 = arith.cmpi ne, %10, %c0_i32_9 : i32
    scf.if %11 {
      %c0_10 = arith.constant 0 : index
      %c0_11 = arith.constant 0 : index
      %12 = vector.load %arg7[%c0_10, %c0_11] : memref<256x128xf32, #tpu.memory_space<vmem>>, vector<256x128xf32>
      %c0_12 = arith.constant 0 : index
      %c0_13 = arith.constant 0 : index
      %13 = vector.load %arg5[%c0_12, %c0_13] : memref<1x128xf32, #tpu.memory_space<vmem>>, vector<1x128xf32>
      %14 = vector.broadcast %13 : vector<1x128xf32> to vector<256x128xf32>
      %15 = arith.addf %12, %14 : vector<256x128xf32>
      %cst_14 = arith.constant 0.000000e+00 : f32
      %16 = vector.broadcast %cst_14 : f32 to vector<256x128xf32>
      %17 = arith.maximumf %15, %16 : vector<256x128xf32>
      %c0_15 = arith.constant 0 : index
      %c0_16 = arith.constant 0 : index
      %18 = vector.load %arg6[%c0_15, %c0_16] : memref<256x128xf32, #tpu.memory_space<vmem>>, vector<256x128xf32>
      tpu.vector_store %arg6[%c0_15, %c0_16], %17 {strides = array<i32>} : memref<256x128xf32, #tpu.memory_space<vmem>>, vector<256x128xf32>,
    } else {
    }
    return
  }
  func.func @transform_0(%arg0: i32, %arg1: i32, %arg2: i32) -> (i32, i32) {
    %c0_i32 = arith.constant 0 : i32
    return %arg0, %arg2 : i32, i32
  }
  func.func @transform_1(%arg0: i32, %arg1: i32, %arg2: i32) -> (i32, i32) {
    %c0_i32 = arith.constant 0 : i32
    return %arg2, %arg1 : i32, i32
  }
  func.func @transform_2(%arg0: i32, %arg1: i32, %arg2: i32) -> (i32, i32) {
    %c0_i32 = arith.constant 0 : i32
    %c0_i32_0 = arith.constant 0 : i32
    return %c0_i32, %arg1 : i32, i32
  }
  func.func @transform_3(%arg0: i32, %arg1: i32, %arg2: i32) -> (i32, i32) {
    %c0_i32 = arith.constant 0 : i32
    return %arg0, %arg1 : i32, i32
  }
}

module attributes {stable_mosaic.version = 11 : i64} {
  func.func @_matmul_kernel(%arg0: i32, %arg1: i32, %arg2: i32, %arg3: memref<256x256xbf16, #tpu.memory_space<vmem>>, %arg4: memref<256x128xbf16, #tpu.memory_space<vmem>>, %arg5: memref<1x128xf32, #tpu.memory_space<vmem>>, %arg6: memref<256x128xf32, #tpu.memory_space<vmem>>, %arg7: memref<256x128xf32, #tpu.memory_space<vmem>>) attributes {dimension_semantics = [#tpu.dimension_semantics<parallel>, #tpu.dimension_semantics<parallel>, #tpu.dimension_semantics<arbitrary>], iteration_bounds = array<i64: 1, 1, 1>, scalar_prefetch = 0 : i64, scratch_operands = 1 : i64, tpu.core_type = #tpu.core_type<tc>, window_params = [{transform_indices = @transform_0, window_bounds = array<i64: 256, 256>}, {transform_indices = @transform_1, window_bounds = array<i64: 256, 128>}, {transform_indices = @transform_2, window_bounds = array<i64: 1, 128>}, {transform_indices = @transform_3, window_bounds = array<i64: 256, 128>}]} {
    %c0_i32 = arith.constant 0 : i32
    %0 = arith.cmpi eq, %arg2, %c0_i32 : i32
    %1 = arith.extui %0 : i1 to i32
    %c0_i32_0 = arith.constant 0 : i32
    %2 = arith.cmpi ne, %1, %c0_i32_0 : i32
    scf.if %2 {
      %cst_10 = arith.constant 0.000000e+00 : f32
      %12 = vector.broadcast %cst_10 : f32 to vector<256x128xf32>
      %c0_11 = arith.constant 0 : index
      %c0_12 = arith.constant 0 : index
      %13 = vector.load %arg7[%c0_11, %c0_12] : memref<256x128xf32, #tpu.memory_space<vmem>>, vector<256x128xf32>
      tpu.vector_store %arg7[%c0_11, %c0_12], %12 {strides = array<i32>} : memref<256x128xf32, #tpu.memory_space<vmem>>, vector<256x128xf32>,
    } else {
    }
    %c0 = arith.constant 0 : index
    %c0_1 = arith.constant 0 : index
    %3 = vector.load %arg7[%c0, %c0_1] : memref<256x128xf32, #tpu.memory_space<vmem>>, vector<256x128xf32>
    %c0_2 = arith.constant 0 : index
    %c0_3 = arith.constant 0 : index
    %4 = vector.load %arg3[%c0_2, %c0_3] : memref<256x256xbf16, #tpu.memory_space<vmem>>, vector<256x256xbf16>
    %c0_4 = arith.constant 0 : index
    %c0_5 = arith.constant 0 : index
    %5 = vector.load %arg4[%c0_4, %c0_5] : memref<256x128xbf16, #tpu.memory_space<vmem>>, vector<256x128xbf16>
    %cst = arith.constant dense<0.000000e+00> : vector<256x128xf32>
    %6 = tpu.matmul %4, %5, %cst {dimension_numbers = #tpu.dot_dimension_numbers<[1], [0], [0], [1], [0, 0, 1, 1], [], []>} : vector<256x256xbf16>, vector<256x128xbf16>, vector<256x128xf32> -> vector<256x128xf32>
    %7 = arith.addf %3, %6 : vector<256x128xf32>
    %c0_6 = arith.constant 0 : index
    %c0_7 = arith.constant 0 : index
    %8 = vector.load %arg7[%c0_6, %c0_7] : memref<256x128xf32, #tpu.memory_space<vmem>>, vector<256x128xf32>
    tpu.vector_store %arg7[%c0_6, %c0_7], %7 {strides = array<i32>} : memref<256x128xf32, #tpu.memory_space<vmem>>, vector<256x128xf32>,
    %c0_i32_8 = arith.constant 0 : i32
    %9 = arith.cmpi eq, %arg2, %c0_i32_8 : i32
    %10 = arith.extui %9 : i1 to i32
    %c0_i32_9 = arith.constant 0 : i32
    %11 = arith.cmpi ne, %10, %c0_i32_9 : i32
    scf.if %11 {
      %c0_10 = arith.constant 0 : index
      %c0_11 = arith.constant 0 : index
      %12 = vector.load %arg7[%c0_10, %c0_11] : memref<256x128xf32, #tpu.memory_space<vmem>>, vector<256x128xf32>
      %c0_12 = arith.constant 0 : index
      %c0_13 = arith.constant 0 : index
      %13 = vector.load %arg5[%c0_12, %c0_13] : memref<1x128xf32, #tpu.memory_space<vmem>>, vector<1x128xf32>
      %14 = vector.broadcast %13 : vector<1x128xf32> to vector<256x128xf32>
      %15 = arith.addf %12, %14 : vector<256x128xf32>
      %cst_14 = arith.constant 0.000000e+00 : f32
      %16 = vector.broadcast %cst_14 : f32 to vector<256x128xf32>
      %17 = arith.maximumf %15, %16 : vector<256x128xf32>
      %c0_15 = arith.constant 0 : index
      %c0_16 = arith.constant 0 : index
      %18 = vector.load %arg6[%c0_15, %c0_16] : memref<256x128xf32, #tpu.memory_space<vmem>>, vector<256x128xf32>
      tpu.vector_store %arg6[%c0_15, %c0_16], %17 {strides = array<i32>} : memref<256x128xf32, #tpu.memory_space<vmem>>, vector<256x128xf32>,
    } else {
    }
    return
  }
  func.func @transform_0(%arg0: i32, %arg1: i32, %arg2: i32) -> (i32, i32) {
    %c0_i32 = arith.constant 0 : i32
    return %arg0, %arg2 : i32, i32
  }
  func.func @transform_1(%arg0: i32, %arg1: i32, %arg2: i32) -> (i32, i32) {
    %c0_i32 = arith.constant 0 : i32
    return %arg2, %arg1 : i32, i32
  }
  func.func @transform_2(%arg0: i32, %arg1: i32, %arg2: i32) -> (i32, i32) {
    %c0_i32 = arith.constant 0 : i32
    %c0_i32_0 = arith.constant 0 : i32
    return %c0_i32, %arg1 : i32, i32
  }
  func.func @transform_3(%arg0: i32, %arg1: i32, %arg2: i32) -> (i32, i32) {
    %c0_i32 = arith.constant 0 : i32
    return %arg0, %arg1 : i32, i32
  }
}

module attributes {stable_mosaic.version = 11 : i64} {
  func.func @_roi_pool_kernel(%arg0: i32, %arg1: memref<8x7xi32, #tpu.memory_space<smem>>, %arg2: memref<8x7xi32, #tpu.memory_space<smem>>, %arg3: memref<8x7xi32, #tpu.memory_space<smem>>, %arg4: memref<8x7xi32, #tpu.memory_space<smem>>, %arg5: memref<8x8x16xf32, #tpu.memory_space<vmem>>, %arg6: memref<1x49x16xf32, #tpu.memory_space<vmem>>) attributes {dimension_semantics = [#tpu.dimension_semantics<parallel>], iteration_bounds = array<i64: 8>, scalar_prefetch = 4 : i64, scratch_operands = 0 : i64, tpu.core_type = #tpu.core_type<tc>, window_params = [{pipeline_mode = #tpu.pipeline_mode<synchronous>, transform_indices = @transform_0, window_bounds = array<i64: 8, 8, 16>}, {transform_indices = @transform_1, window_bounds = array<i64: 1, 49, 16>}]} {
    %c0 = arith.constant 0 : index
    %c0_0 = arith.constant 0 : index
    %c0_1 = arith.constant 0 : index
    %0 = vector.load %arg5[%c0, %c0_0, %c0_1] : memref<8x8x16xf32, #tpu.memory_space<vmem>>, vector<8x8x16xf32>
    %1 = tpu.iota {dimensions = array<i32: 0>} : vector<8x8x16xi32>
    %2 = tpu.iota {dimensions = array<i32: 0>} : vector<8x16xi32>
    %3 = arith.index_cast %arg0 : i32 to index
    %c0_2 = arith.constant 0 : index
    %4 = memref.load %arg1[%3, %c0_2] : memref<8x7xi32, #tpu.memory_space<smem>>
    %5 = arith.index_cast %arg0 : i32 to index
    %c0_3 = arith.constant 0 : index
    %6 = memref.load %arg2[%5, %c0_3] : memref<8x7xi32, #tpu.memory_space<smem>>
    %7 = vector.broadcast %4 : i32 to vector<8x8x16xi32>
    %8 = arith.cmpi sge, %1, %7 : vector<8x8x16xi32>
    %9 = vector.broadcast %6 : i32 to vector<8x8x16xi32>
    %10 = arith.cmpi slt, %1, %9 : vector<8x8x16xi32>
    %11 = arith.andi %8, %10 : vector<8x8x16xi1>
    %cst = arith.constant -1.000000e+30 : f32
    %12 = vector.broadcast %cst : f32 to vector<8x8x16xf32>
    %13 = arith.select %11, %0, %12 : vector<8x8x16xi1>, vector<8x8x16xf32>
    %cst_4 = arith.constant dense<0xFF800000> : vector<8x16xf32>
    %14 = vector.multi_reduction <maximumf>, %13, %cst_4 [0] : vector<8x8x16xf32> to vector<8x16xf32>
    %15 = arith.index_cast %arg0 : i32 to index
    %c0_5 = arith.constant 0 : index
    %16 = memref.load %arg3[%15, %c0_5] : memref<8x7xi32, #tpu.memory_space<smem>>
    %17 = arith.index_cast %arg0 : i32 to index
    %c0_6 = arith.constant 0 : index
    %18 = memref.load %arg4[%17, %c0_6] : memref<8x7xi32, #tpu.memory_space<smem>>
    %19 = vector.broadcast %16 : i32 to vector<8x16xi32>
    %20 = arith.cmpi sge, %2, %19 : vector<8x16xi32>
    %21 = vector.broadcast %18 : i32 to vector<8x16xi32>
    %22 = arith.cmpi slt, %2, %21 : vector<8x16xi32>
    %23 = arith.andi %20, %22 : vector<8x16xi1>
    %cst_7 = arith.constant -1.000000e+30 : f32
    %24 = vector.broadcast %cst_7 : f32 to vector<8x16xf32>
    %25 = arith.select %23, %14, %24 : vector<8x16xi1>, vector<8x16xf32>
    %cst_8 = arith.constant dense<0xFF800000> : vector<16xf32>
    %26 = vector.multi_reduction <maximumf>, %25, %cst_8 [0] : vector<8x16xf32> to vector<16xf32>
    %27 = vector.shape_cast %26 : vector<16xf32> to vector<1x16xf32>
    %28 = arith.cmpi sle, %6, %4 : i32
    %29 = arith.cmpi sle, %18, %16 : i32
    %30 = arith.ori %28, %29 : i1
    %cst_9 = arith.constant 0.000000e+00 : f32
    %31 = vector.broadcast %cst_9 : f32 to vector<1x16xf32>
    %32 = arith.select %30, %31, %27 : vector<1x16xf32>
    %33 = arith.index_cast %arg0 : i32 to index
    %c1 = arith.constant 1 : index
    %34 = memref.load %arg3[%33, %c1] : memref<8x7xi32, #tpu.memory_space<smem>>
    %35 = arith.index_cast %arg0 : i32 to index
    %c1_10 = arith.constant 1 : index
    %36 = memref.load %arg4[%35, %c1_10] : memref<8x7xi32, #tpu.memory_space<smem>>
    %37 = vector.broadcast %34 : i32 to vector<8x16xi32>
    %38 = arith.cmpi sge, %2, %37 : vector<8x16xi32>
    %39 = vector.broadcast %36 : i32 to vector<8x16xi32>
    %40 = arith.cmpi slt, %2, %39 : vector<8x16xi32>
    %41 = arith.andi %38, %40 : vector<8x16xi1>
    %cst_11 = arith.constant -1.000000e+30 : f32
    %42 = vector.broadcast %cst_11 : f32 to vector<8x16xf32>
    %43 = arith.select %41, %14, %42 : vector<8x16xi1>, vector<8x16xf32>
    %cst_12 = arith.constant dense<0xFF800000> : vector<16xf32>
    %44 = vector.multi_reduction <maximumf>, %43, %cst_12 [0] : vector<8x16xf32> to vector<16xf32>
    %45 = vector.shape_cast %44 : vector<16xf32> to vector<1x16xf32>
    %46 = arith.cmpi sle, %6, %4 : i32
    %47 = arith.cmpi sle, %36, %34 : i32
    %48 = arith.ori %46, %47 : i1
    %cst_13 = arith.constant 0.000000e+00 : f32
    %49 = vector.broadcast %cst_13 : f32 to vector<1x16xf32>
    %50 = arith.select %48, %49, %45 : vector<1x16xf32>
    %51 = arith.index_cast %arg0 : i32 to index
    %c2 = arith.constant 2 : index
    %52 = memref.load %arg3[%51, %c2] : memref<8x7xi32, #tpu.memory_space<smem>>
    %53 = arith.index_cast %arg0 : i32 to index
    %c2_14 = arith.constant 2 : index
    %54 = memref.load %arg4[%53, %c2_14] : memref<8x7xi32, #tpu.memory_space<smem>>
    %55 = vector.broadcast %52 : i32 to vector<8x16xi32>
    %56 = arith.cmpi sge, %2, %55 : vector<8x16xi32>
    %57 = vector.broadcast %54 : i32 to vector<8x16xi32>
    %58 = arith.cmpi slt, %2, %57 : vector<8x16xi32>
    %59 = arith.andi %56, %58 : vector<8x16xi1>
    %cst_15 = arith.constant -1.000000e+30 : f32
    %60 = vector.broadcast %cst_15 : f32 to vector<8x16xf32>
    %61 = arith.select %59, %14, %60 : vector<8x16xi1>, vector<8x16xf32>
    %cst_16 = arith.constant dense<0xFF800000> : vector<16xf32>
    %62 = vector.multi_reduction <maximumf>, %61, %cst_16 [0] : vector<8x16xf32> to vector<16xf32>
    %63 = vector.shape_cast %62 : vector<16xf32> to vector<1x16xf32>
    %64 = arith.cmpi sle, %6, %4 : i32
    %65 = arith.cmpi sle, %54, %52 : i32
    %66 = arith.ori %64, %65 : i1
    %cst_17 = arith.constant 0.000000e+00 : f32
    %67 = vector.broadcast %cst_17 : f32 to vector<1x16xf32>
    %68 = arith.select %66, %67, %63 : vector<1x16xf32>
    %69 = arith.index_cast %arg0 : i32 to index
    %c3 = arith.constant 3 : index
    %70 = memref.load %arg3[%69, %c3] : memref<8x7xi32, #tpu.memory_space<smem>>
    %71 = arith.index_cast %arg0 : i32 to index
    %c3_18 = arith.constant 3 : index
    %72 = memref.load %arg4[%71, %c3_18] : memref<8x7xi32, #tpu.memory_space<smem>>
    %73 = vector.broadcast %70 : i32 to vector<8x16xi32>
    %74 = arith.cmpi sge, %2, %73 : vector<8x16xi32>
    %75 = vector.broadcast %72 : i32 to vector<8x16xi32>
    %76 = arith.cmpi slt, %2, %75 : vector<8x16xi32>
    %77 = arith.andi %74, %76 : vector<8x16xi1>
    %cst_19 = arith.constant -1.000000e+30 : f32
    %78 = vector.broadcast %cst_19 : f32 to vector<8x16xf32>
    %79 = arith.select %77, %14, %78 : vector<8x16xi1>, vector<8x16xf32>
    %cst_20 = arith.constant dense<0xFF800000> : vector<16xf32>
    %80 = vector.multi_reduction <maximumf>, %79, %cst_20 [0] : vector<8x16xf32> to vector<16xf32>
    %81 = vector.shape_cast %80 : vector<16xf32> to vector<1x16xf32>
    %82 = arith.cmpi sle, %6, %4 : i32
    %83 = arith.cmpi sle, %72, %70 : i32
    %84 = arith.ori %82, %83 : i1
    %cst_21 = arith.constant 0.000000e+00 : f32
    %85 = vector.broadcast %cst_21 : f32 to vector<1x16xf32>
    %86 = arith.select %84, %85, %81 : vector<1x16xf32>
    %87 = arith.index_cast %arg0 : i32 to index
    %c4 = arith.constant 4 : index
    %88 = memref.load %arg3[%87, %c4] : memref<8x7xi32, #tpu.memory_space<smem>>
    %89 = arith.index_cast %arg0 : i32 to index
    %c4_22 = arith.constant 4 : index
    %90 = memref.load %arg4[%89, %c4_22] : memref<8x7xi32, #tpu.memory_space<smem>>
    %91 = vector.broadcast %88 : i32 to vector<8x16xi32>
    %92 = arith.cmpi sge, %2, %91 : vector<8x16xi32>
    %93 = vector.broadcast %90 : i32 to vector<8x16xi32>
    %94 = arith.cmpi slt, %2, %93 : vector<8x16xi32>
    %95 = arith.andi %92, %94 : vector<8x16xi1>
    %cst_23 = arith.constant -1.000000e+30 : f32
    %96 = vector.broadcast %cst_23 : f32 to vector<8x16xf32>
    %97 = arith.select %95, %14, %96 : vector<8x16xi1>, vector<8x16xf32>
    %cst_24 = arith.constant dense<0xFF800000> : vector<16xf32>
    %98 = vector.multi_reduction <maximumf>, %97, %cst_24 [0] : vector<8x16xf32> to vector<16xf32>
    %99 = vector.shape_cast %98 : vector<16xf32> to vector<1x16xf32>
    %100 = arith.cmpi sle, %6, %4 : i32
    %101 = arith.cmpi sle, %90, %88 : i32
    %102 = arith.ori %100, %101 : i1
    %cst_25 = arith.constant 0.000000e+00 : f32
    %103 = vector.broadcast %cst_25 : f32 to vector<1x16xf32>
    %104 = arith.select %102, %103, %99 : vector<1x16xf32>
    %105 = arith.index_cast %arg0 : i32 to index
    %c5 = arith.constant 5 : index
    %106 = memref.load %arg3[%105, %c5] : memref<8x7xi32, #tpu.memory_space<smem>>
    %107 = arith.index_cast %arg0 : i32 to index
    %c5_26 = arith.constant 5 : index
    %108 = memref.load %arg4[%107, %c5_26] : memref<8x7xi32, #tpu.memory_space<smem>>
    %109 = vector.broadcast %106 : i32 to vector<8x16xi32>
    %110 = arith.cmpi sge, %2, %109 : vector<8x16xi32>
    %111 = vector.broadcast %108 : i32 to vector<8x16xi32>
    %112 = arith.cmpi slt, %2, %111 : vector<8x16xi32>
    %113 = arith.andi %110, %112 : vector<8x16xi1>
    %cst_27 = arith.constant -1.000000e+30 : f32
    %114 = vector.broadcast %cst_27 : f32 to vector<8x16xf32>
    %115 = arith.select %113, %14, %114 : vector<8x16xi1>, vector<8x16xf32>
    %cst_28 = arith.constant dense<0xFF800000> : vector<16xf32>
    %116 = vector.multi_reduction <maximumf>, %115, %cst_28 [0] : vector<8x16xf32> to vector<16xf32>
    %117 = vector.shape_cast %116 : vector<16xf32> to vector<1x16xf32>
    %118 = arith.cmpi sle, %6, %4 : i32
    %119 = arith.cmpi sle, %108, %106 : i32
    %120 = arith.ori %118, %119 : i1
    %cst_29 = arith.constant 0.000000e+00 : f32
    %121 = vector.broadcast %cst_29 : f32 to vector<1x16xf32>
    %122 = arith.select %120, %121, %117 : vector<1x16xf32>
    %123 = arith.index_cast %arg0 : i32 to index
    %c6 = arith.constant 6 : index
    %124 = memref.load %arg3[%123, %c6] : memref<8x7xi32, #tpu.memory_space<smem>>
    %125 = arith.index_cast %arg0 : i32 to index
    %c6_30 = arith.constant 6 : index
    %126 = memref.load %arg4[%125, %c6_30] : memref<8x7xi32, #tpu.memory_space<smem>>
    %127 = vector.broadcast %124 : i32 to vector<8x16xi32>
    %128 = arith.cmpi sge, %2, %127 : vector<8x16xi32>
    %129 = vector.broadcast %126 : i32 to vector<8x16xi32>
    %130 = arith.cmpi slt, %2, %129 : vector<8x16xi32>
    %131 = arith.andi %128, %130 : vector<8x16xi1>
    %cst_31 = arith.constant -1.000000e+30 : f32
    %132 = vector.broadcast %cst_31 : f32 to vector<8x16xf32>
    %133 = arith.select %131, %14, %132 : vector<8x16xi1>, vector<8x16xf32>
    %cst_32 = arith.constant dense<0xFF800000> : vector<16xf32>
    %134 = vector.multi_reduction <maximumf>, %133, %cst_32 [0] : vector<8x16xf32> to vector<16xf32>
    %135 = vector.shape_cast %134 : vector<16xf32> to vector<1x16xf32>
    %136 = arith.cmpi sle, %6, %4 : i32
    %137 = arith.cmpi sle, %126, %124 : i32
    %138 = arith.ori %136, %137 : i1
    %cst_33 = arith.constant 0.000000e+00 : f32
    %139 = vector.broadcast %cst_33 : f32 to vector<1x16xf32>
    %140 = arith.select %138, %139, %135 : vector<1x16xf32>
    %141 = arith.index_cast %arg0 : i32 to index
    %c1_34 = arith.constant 1 : index
    %142 = memref.load %arg1[%141, %c1_34] : memref<8x7xi32, #tpu.memory_space<smem>>
    %143 = arith.index_cast %arg0 : i32 to index
    %c1_35 = arith.constant 1 : index
    %144 = memref.load %arg2[%143, %c1_35] : memref<8x7xi32, #tpu.memory_space<smem>>
    %145 = vector.broadcast %142 : i32 to vector<8x8x16xi32>
    %146 = arith.cmpi sge, %1, %145 : vector<8x8x16xi32>
    %147 = vector.broadcast %144 : i32 to vector<8x8x16xi32>
    %148 = arith.cmpi slt, %1, %147 : vector<8x8x16xi32>
    %149 = arith.andi %146, %148 : vector<8x8x16xi1>
    %cst_36 = arith.constant -1.000000e+30 : f32
    %150 = vector.broadcast %cst_36 : f32 to vector<8x8x16xf32>
    %151 = arith.select %149, %0, %150 : vector<8x8x16xi1>, vector<8x8x16xf32>
    %cst_37 = arith.constant dense<0xFF800000> : vector<8x16xf32>
    %152 = vector.multi_reduction <maximumf>, %151, %cst_37 [0] : vector<8x8x16xf32> to vector<8x16xf32>
    %153 = arith.index_cast %arg0 : i32 to index
    %c0_38 = arith.constant 0 : index
    %154 = memref.load %arg3[%153, %c0_38] : memref<8x7xi32, #tpu.memory_space<smem>>
    %155 = arith.index_cast %arg0 : i32 to index
    %c0_39 = arith.constant 0 : index
    %156 = memref.load %arg4[%155, %c0_39] : memref<8x7xi32, #tpu.memory_space<smem>>
    %157 = vector.broadcast %154 : i32 to vector<8x16xi32>
    %158 = arith.cmpi sge, %2, %157 : vector<8x16xi32>
    %159 = vector.broadcast %156 : i32 to vector<8x16xi32>
    %160 = arith.cmpi slt, %2, %159 : vector<8x16xi32>
    %161 = arith.andi %158, %160 : vector<8x16xi1>
    %cst_40 = arith.constant -1.000000e+30 : f32
    %162 = vector.broadcast %cst_40 : f32 to vector<8x16xf32>
    %163 = arith.select %161, %152, %162 : vector<8x16xi1>, vector<8x16xf32>
    %cst_41 = arith.constant dense<0xFF800000> : vector<16xf32>
    %164 = vector.multi_reduction <maximumf>, %163, %cst_41 [0] : vector<8x16xf32> to vector<16xf32>
    %165 = vector.shape_cast %164 : vector<16xf32> to vector<1x16xf32>
    %166 = arith.cmpi sle, %144, %142 : i32
    %167 = arith.cmpi sle, %156, %154 : i32
    %168 = arith.ori %166, %167 : i1
    %cst_42 = arith.constant 0.000000e+00 : f32
    %169 = vector.broadcast %cst_42 : f32 to vector<1x16xf32>
    %170 = arith.select %168, %169, %165 : vector<1x16xf32>
    %171 = arith.index_cast %arg0 : i32 to index
    %c1_43 = arith.constant 1 : index
    %172 = memref.load %arg3[%171, %c1_43] : memref<8x7xi32, #tpu.memory_space<smem>>
    %173 = arith.index_cast %arg0 : i32 to index
    %c1_44 = arith.constant 1 : index
    %174 = memref.load %arg4[%173, %c1_44] : memref<8x7xi32, #tpu.memory_space<smem>>
    %175 = vector.broadcast %172 : i32 to vector<8x16xi32>
    %176 = arith.cmpi sge, %2, %175 : vector<8x16xi32>
    %177 = vector.broadcast %174 : i32 to vector<8x16xi32>
    %178 = arith.cmpi slt, %2, %177 : vector<8x16xi32>
    %179 = arith.andi %176, %178 : vector<8x16xi1>
    %cst_45 = arith.constant -1.000000e+30 : f32
    %180 = vector.broadcast %cst_45 : f32 to vector<8x16xf32>
    %181 = arith.select %179, %152, %180 : vector<8x16xi1>, vector<8x16xf32>
    %cst_46 = arith.constant dense<0xFF800000> : vector<16xf32>
    %182 = vector.multi_reduction <maximumf>, %181, %cst_46 [0] : vector<8x16xf32> to vector<16xf32>
    %183 = vector.shape_cast %182 : vector<16xf32> to vector<1x16xf32>
    %184 = arith.cmpi sle, %144, %142 : i32
    %185 = arith.cmpi sle, %174, %172 : i32
    %186 = arith.ori %184, %185 : i1
    %cst_47 = arith.constant 0.000000e+00 : f32
    %187 = vector.broadcast %cst_47 : f32 to vector<1x16xf32>
    %188 = arith.select %186, %187, %183 : vector<1x16xf32>
    %189 = arith.index_cast %arg0 : i32 to index
    %c2_48 = arith.constant 2 : index
    %190 = memref.load %arg3[%189, %c2_48] : memref<8x7xi32, #tpu.memory_space<smem>>
    %191 = arith.index_cast %arg0 : i32 to index
    %c2_49 = arith.constant 2 : index
    %192 = memref.load %arg4[%191, %c2_49] : memref<8x7xi32, #tpu.memory_space<smem>>
    %193 = vector.broadcast %190 : i32 to vector<8x16xi32>
    %194 = arith.cmpi sge, %2, %193 : vector<8x16xi32>
    %195 = vector.broadcast %192 : i32 to vector<8x16xi32>
    %196 = arith.cmpi slt, %2, %195 : vector<8x16xi32>
    %197 = arith.andi %194, %196 : vector<8x16xi1>
    %cst_50 = arith.constant -1.000000e+30 : f32
    %198 = vector.broadcast %cst_50 : f32 to vector<8x16xf32>
    %199 = arith.select %197, %152, %198 : vector<8x16xi1>, vector<8x16xf32>
    %cst_51 = arith.constant dense<0xFF800000> : vector<16xf32>
    %200 = vector.multi_reduction <maximumf>, %199, %cst_51 [0] : vector<8x16xf32> to vector<16xf32>
    %201 = vector.shape_cast %200 : vector<16xf32> to vector<1x16xf32>
    %202 = arith.cmpi sle, %144, %142 : i32
    %203 = arith.cmpi sle, %192, %190 : i32
    %204 = arith.ori %202, %203 : i1
    %cst_52 = arith.constant 0.000000e+00 : f32
    %205 = vector.broadcast %cst_52 : f32 to vector<1x16xf32>
    %206 = arith.select %204, %205, %201 : vector<1x16xf32>
    %207 = arith.index_cast %arg0 : i32 to index
    %c3_53 = arith.constant 3 : index
    %208 = memref.load %arg3[%207, %c3_53] : memref<8x7xi32, #tpu.memory_space<smem>>
    %209 = arith.index_cast %arg0 : i32 to index
    %c3_54 = arith.constant 3 : index
    %210 = memref.load %arg4[%209, %c3_54] : memref<8x7xi32, #tpu.memory_space<smem>>
    %211 = vector.broadcast %208 : i32 to vector<8x16xi32>
    %212 = arith.cmpi sge, %2, %211 : vector<8x16xi32>
    %213 = vector.broadcast %210 : i32 to vector<8x16xi32>
    %214 = arith.cmpi slt, %2, %213 : vector<8x16xi32>
    %215 = arith.andi %212, %214 : vector<8x16xi1>
    %cst_55 = arith.constant -1.000000e+30 : f32
    %216 = vector.broadcast %cst_55 : f32 to vector<8x16xf32>
    %217 = arith.select %215, %152, %216 : vector<8x16xi1>, vector<8x16xf32>
    %cst_56 = arith.constant dense<0xFF800000> : vector<16xf32>
    %218 = vector.multi_reduction <maximumf>, %217, %cst_56 [0] : vector<8x16xf32> to vector<16xf32>
    %219 = vector.shape_cast %218 : vector<16xf32> to vector<1x16xf32>
    %220 = arith.cmpi sle, %144, %142 : i32
    %221 = arith.cmpi sle, %210, %208 : i32
    %222 = arith.ori %220, %221 : i1
    %cst_57 = arith.constant 0.000000e+00 : f32
    %223 = vector.broadcast %cst_57 : f32 to vector<1x16xf32>
    %224 = arith.select %222, %223, %219 : vector<1x16xf32>
    %225 = arith.index_cast %arg0 : i32 to index
    %c4_58 = arith.constant 4 : index
    %226 = memref.load %arg3[%225, %c4_58] : memref<8x7xi32, #tpu.memory_space<smem>>
    %227 = arith.index_cast %arg0 : i32 to index
    %c4_59 = arith.constant 4 : index
    %228 = memref.load %arg4[%227, %c4_59] : memref<8x7xi32, #tpu.memory_space<smem>>
    %229 = vector.broadcast %226 : i32 to vector<8x16xi32>
    %230 = arith.cmpi sge, %2, %229 : vector<8x16xi32>
    %231 = vector.broadcast %228 : i32 to vector<8x16xi32>
    %232 = arith.cmpi slt, %2, %231 : vector<8x16xi32>
    %233 = arith.andi %230, %232 : vector<8x16xi1>
    %cst_60 = arith.constant -1.000000e+30 : f32
    %234 = vector.broadcast %cst_60 : f32 to vector<8x16xf32>
    %235 = arith.select %233, %152, %234 : vector<8x16xi1>, vector<8x16xf32>
    %cst_61 = arith.constant dense<0xFF800000> : vector<16xf32>
    %236 = vector.multi_reduction <maximumf>, %235, %cst_61 [0] : vector<8x16xf32> to vector<16xf32>
    %237 = vector.shape_cast %236 : vector<16xf32> to vector<1x16xf32>
    %238 = arith.cmpi sle, %144, %142 : i32
    %239 = arith.cmpi sle, %228, %226 : i32
    %240 = arith.ori %238, %239 : i1
    %cst_62 = arith.constant 0.000000e+00 : f32
    %241 = vector.broadcast %cst_62 : f32 to vector<1x16xf32>
    %242 = arith.select %240, %241, %237 : vector<1x16xf32>
    %243 = arith.index_cast %arg0 : i32 to index
    %c5_63 = arith.constant 5 : index
    %244 = memref.load %arg3[%243, %c5_63] : memref<8x7xi32, #tpu.memory_space<smem>>
    %245 = arith.index_cast %arg0 : i32 to index
    %c5_64 = arith.constant 5 : index
    %246 = memref.load %arg4[%245, %c5_64] : memref<8x7xi32, #tpu.memory_space<smem>>
    %247 = vector.broadcast %244 : i32 to vector<8x16xi32>
    %248 = arith.cmpi sge, %2, %247 : vector<8x16xi32>
    %249 = vector.broadcast %246 : i32 to vector<8x16xi32>
    %250 = arith.cmpi slt, %2, %249 : vector<8x16xi32>
    %251 = arith.andi %248, %250 : vector<8x16xi1>
    %cst_65 = arith.constant -1.000000e+30 : f32
    %252 = vector.broadcast %cst_65 : f32 to vector<8x16xf32>
    %253 = arith.select %251, %152, %252 : vector<8x16xi1>, vector<8x16xf32>
    %cst_66 = arith.constant dense<0xFF800000> : vector<16xf32>
    %254 = vector.multi_reduction <maximumf>, %253, %cst_66 [0] : vector<8x16xf32> to vector<16xf32>
    %255 = vector.shape_cast %254 : vector<16xf32> to vector<1x16xf32>
    %256 = arith.cmpi sle, %144, %142 : i32
    %257 = arith.cmpi sle, %246, %244 : i32
    %258 = arith.ori %256, %257 : i1
    %cst_67 = arith.constant 0.000000e+00 : f32
    %259 = vector.broadcast %cst_67 : f32 to vector<1x16xf32>
    %260 = arith.select %258, %259, %255 : vector<1x16xf32>
    %261 = arith.index_cast %arg0 : i32 to index
    %c6_68 = arith.constant 6 : index
    %262 = memref.load %arg3[%261, %c6_68] : memref<8x7xi32, #tpu.memory_space<smem>>
    %263 = arith.index_cast %arg0 : i32 to index
    %c6_69 = arith.constant 6 : index
    %264 = memref.load %arg4[%263, %c6_69] : memref<8x7xi32, #tpu.memory_space<smem>>
    %265 = vector.broadcast %262 : i32 to vector<8x16xi32>
    %266 = arith.cmpi sge, %2, %265 : vector<8x16xi32>
    %267 = vector.broadcast %264 : i32 to vector<8x16xi32>
    %268 = arith.cmpi slt, %2, %267 : vector<8x16xi32>
    %269 = arith.andi %266, %268 : vector<8x16xi1>
    %cst_70 = arith.constant -1.000000e+30 : f32
    %270 = vector.broadcast %cst_70 : f32 to vector<8x16xf32>
    %271 = arith.select %269, %152, %270 : vector<8x16xi1>, vector<8x16xf32>
    %cst_71 = arith.constant dense<0xFF800000> : vector<16xf32>
    %272 = vector.multi_reduction <maximumf>, %271, %cst_71 [0] : vector<8x16xf32> to vector<16xf32>
    %273 = vector.shape_cast %272 : vector<16xf32> to vector<1x16xf32>
    %274 = arith.cmpi sle, %144, %142 : i32
    %275 = arith.cmpi sle, %264, %262 : i32
    %276 = arith.ori %274, %275 : i1
    %cst_72 = arith.constant 0.000000e+00 : f32
    %277 = vector.broadcast %cst_72 : f32 to vector<1x16xf32>
    %278 = arith.select %276, %277, %273 : vector<1x16xf32>
    %279 = arith.index_cast %arg0 : i32 to index
    %c2_73 = arith.constant 2 : index
    %280 = memref.load %arg1[%279, %c2_73] : memref<8x7xi32, #tpu.memory_space<smem>>
    %281 = arith.index_cast %arg0 : i32 to index
    %c2_74 = arith.constant 2 : index
    %282 = memref.load %arg2[%281, %c2_74] : memref<8x7xi32, #tpu.memory_space<smem>>
    %283 = vector.broadcast %280 : i32 to vector<8x8x16xi32>
    %284 = arith.cmpi sge, %1, %283 : vector<8x8x16xi32>
    %285 = vector.broadcast %282 : i32 to vector<8x8x16xi32>
    %286 = arith.cmpi slt, %1, %285 : vector<8x8x16xi32>
    %287 = arith.andi %284, %286 : vector<8x8x16xi1>
    %cst_75 = arith.constant -1.000000e+30 : f32
    %288 = vector.broadcast %cst_75 : f32 to vector<8x8x16xf32>
    %289 = arith.select %287, %0, %288 : vector<8x8x16xi1>, vector<8x8x16xf32>
    %cst_76 = arith.constant dense<0xFF800000> : vector<8x16xf32>
    %290 = vector.multi_reduction <maximumf>, %289, %cst_76 [0] : vector<8x8x16xf32> to vector<8x16xf32>
    %291 = arith.index_cast %arg0 : i32 to index
    %c0_77 = arith.constant 0 : index
    %292 = memref.load %arg3[%291, %c0_77] : memref<8x7xi32, #tpu.memory_space<smem>>
    %293 = arith.index_cast %arg0 : i32 to index
    %c0_78 = arith.constant 0 : index
    %294 = memref.load %arg4[%293, %c0_78] : memref<8x7xi32, #tpu.memory_space<smem>>
    %295 = vector.broadcast %292 : i32 to vector<8x16xi32>
    %296 = arith.cmpi sge, %2, %295 : vector<8x16xi32>
    %297 = vector.broadcast %294 : i32 to vector<8x16xi32>
    %298 = arith.cmpi slt, %2, %297 : vector<8x16xi32>
    %299 = arith.andi %296, %298 : vector<8x16xi1>
    %cst_79 = arith.constant -1.000000e+30 : f32
    %300 = vector.broadcast %cst_79 : f32 to vector<8x16xf32>
    %301 = arith.select %299, %290, %300 : vector<8x16xi1>, vector<8x16xf32>
    %cst_80 = arith.constant dense<0xFF800000> : vector<16xf32>
    %302 = vector.multi_reduction <maximumf>, %301, %cst_80 [0] : vector<8x16xf32> to vector<16xf32>
    %303 = vector.shape_cast %302 : vector<16xf32> to vector<1x16xf32>
    %304 = arith.cmpi sle, %282, %280 : i32
    %305 = arith.cmpi sle, %294, %292 : i32
    %306 = arith.ori %304, %305 : i1
    %cst_81 = arith.constant 0.000000e+00 : f32
    %307 = vector.broadcast %cst_81 : f32 to vector<1x16xf32>
    %308 = arith.select %306, %307, %303 : vector<1x16xf32>
    %309 = arith.index_cast %arg0 : i32 to index
    %c1_82 = arith.constant 1 : index
    %310 = memref.load %arg3[%309, %c1_82] : memref<8x7xi32, #tpu.memory_space<smem>>
    %311 = arith.index_cast %arg0 : i32 to index
    %c1_83 = arith.constant 1 : index
    %312 = memref.load %arg4[%311, %c1_83] : memref<8x7xi32, #tpu.memory_space<smem>>
    %313 = vector.broadcast %310 : i32 to vector<8x16xi32>
    %314 = arith.cmpi sge, %2, %313 : vector<8x16xi32>
    %315 = vector.broadcast %312 : i32 to vector<8x16xi32>
    %316 = arith.cmpi slt, %2, %315 : vector<8x16xi32>
    %317 = arith.andi %314, %316 : vector<8x16xi1>
    %cst_84 = arith.constant -1.000000e+30 : f32
    %318 = vector.broadcast %cst_84 : f32 to vector<8x16xf32>
    %319 = arith.select %317, %290, %318 : vector<8x16xi1>, vector<8x16xf32>
    %cst_85 = arith.constant dense<0xFF800000> : vector<16xf32>
    %320 = vector.multi_reduction <maximumf>, %319, %cst_85 [0] : vector<8x16xf32> to vector<16xf32>
    %321 = vector.shape_cast %320 : vector<16xf32> to vector<1x16xf32>
    %322 = arith.cmpi sle, %282, %280 : i32
    %323 = arith.cmpi sle, %312, %310 : i32
    %324 = arith.ori %322, %323 : i1
    %cst_86 = arith.constant 0.000000e+00 : f32
    %325 = vector.broadcast %cst_86 : f32 to vector<1x16xf32>
    %326 = arith.select %324, %325, %321 : vector<1x16xf32>
    %327 = arith.index_cast %arg0 : i32 to index
    %c2_87 = arith.constant 2 : index
    %328 = memref.load %arg3[%327, %c2_87] : memref<8x7xi32, #tpu.memory_space<smem>>
    %329 = arith.index_cast %arg0 : i32 to index
    %c2_88 = arith.constant 2 : index
    %330 = memref.load %arg4[%329, %c2_88] : memref<8x7xi32, #tpu.memory_space<smem>>
    %331 = vector.broadcast %328 : i32 to vector<8x16xi32>
    %332 = arith.cmpi sge, %2, %331 : vector<8x16xi32>
    %333 = vector.broadcast %330 : i32 to vector<8x16xi32>
    %334 = arith.cmpi slt, %2, %333 : vector<8x16xi32>
    %335 = arith.andi %332, %334 : vector<8x16xi1>
    %cst_89 = arith.constant -1.000000e+30 : f32
    %336 = vector.broadcast %cst_89 : f32 to vector<8x16xf32>
    %337 = arith.select %335, %290, %336 : vector<8x16xi1>, vector<8x16xf32>
    %cst_90 = arith.constant dense<0xFF800000> : vector<16xf32>
    %338 = vector.multi_reduction <maximumf>, %337, %cst_90 [0] : vector<8x16xf32> to vector<16xf32>
    %339 = vector.shape_cast %338 : vector<16xf32> to vector<1x16xf32>
    %340 = arith.cmpi sle, %282, %280 : i32
    %341 = arith.cmpi sle, %330, %328 : i32
    %342 = arith.ori %340, %341 : i1
    %cst_91 = arith.constant 0.000000e+00 : f32
    %343 = vector.broadcast %cst_91 : f32 to vector<1x16xf32>
    %344 = arith.select %342, %343, %339 : vector<1x16xf32>
    %345 = arith.index_cast %arg0 : i32 to index
    %c3_92 = arith.constant 3 : index
    %346 = memref.load %arg3[%345, %c3_92] : memref<8x7xi32, #tpu.memory_space<smem>>
    %347 = arith.index_cast %arg0 : i32 to index
    %c3_93 = arith.constant 3 : index
    %348 = memref.load %arg4[%347, %c3_93] : memref<8x7xi32, #tpu.memory_space<smem>>
    %349 = vector.broadcast %346 : i32 to vector<8x16xi32>
    %350 = arith.cmpi sge, %2, %349 : vector<8x16xi32>
    %351 = vector.broadcast %348 : i32 to vector<8x16xi32>
    %352 = arith.cmpi slt, %2, %351 : vector<8x16xi32>
    %353 = arith.andi %350, %352 : vector<8x16xi1>
    %cst_94 = arith.constant -1.000000e+30 : f32
    %354 = vector.broadcast %cst_94 : f32 to vector<8x16xf32>
    %355 = arith.select %353, %290, %354 : vector<8x16xi1>, vector<8x16xf32>
    %cst_95 = arith.constant dense<0xFF800000> : vector<16xf32>
    %356 = vector.multi_reduction <maximumf>, %355, %cst_95 [0] : vector<8x16xf32> to vector<16xf32>
    %357 = vector.shape_cast %356 : vector<16xf32> to vector<1x16xf32>
    %358 = arith.cmpi sle, %282, %280 : i32
    %359 = arith.cmpi sle, %348, %346 : i32
    %360 = arith.ori %358, %359 : i1
    %cst_96 = arith.constant 0.000000e+00 : f32
    %361 = vector.broadcast %cst_96 : f32 to vector<1x16xf32>
    %362 = arith.select %360, %361, %357 : vector<1x16xf32>
    %363 = arith.index_cast %arg0 : i32 to index
    %c4_97 = arith.constant 4 : index
    %364 = memref.load %arg3[%363, %c4_97] : memref<8x7xi32, #tpu.memory_space<smem>>
    %365 = arith.index_cast %arg0 : i32 to index
    %c4_98 = arith.constant 4 : index
    %366 = memref.load %arg4[%365, %c4_98] : memref<8x7xi32, #tpu.memory_space<smem>>
    %367 = vector.broadcast %364 : i32 to vector<8x16xi32>
    %368 = arith.cmpi sge, %2, %367 : vector<8x16xi32>
    %369 = vector.broadcast %366 : i32 to vector<8x16xi32>
    %370 = arith.cmpi slt, %2, %369 : vector<8x16xi32>
    %371 = arith.andi %368, %370 : vector<8x16xi1>
    %cst_99 = arith.constant -1.000000e+30 : f32
    %372 = vector.broadcast %cst_99 : f32 to vector<8x16xf32>
    %373 = arith.select %371, %290, %372 : vector<8x16xi1>, vector<8x16xf32>
    %cst_100 = arith.constant dense<0xFF800000> : vector<16xf32>
    %374 = vector.multi_reduction <maximumf>, %373, %cst_100 [0] : vector<8x16xf32> to vector<16xf32>
    %375 = vector.shape_cast %374 : vector<16xf32> to vector<1x16xf32>
    %376 = arith.cmpi sle, %282, %280 : i32
    %377 = arith.cmpi sle, %366, %364 : i32
    %378 = arith.ori %376, %377 : i1
    %cst_101 = arith.constant 0.000000e+00 : f32
    %379 = vector.broadcast %cst_101 : f32 to vector<1x16xf32>
    %380 = arith.select %378, %379, %375 : vector<1x16xf32>
    %381 = arith.index_cast %arg0 : i32 to index
    %c5_102 = arith.constant 5 : index
    %382 = memref.load %arg3[%381, %c5_102] : memref<8x7xi32, #tpu.memory_space<smem>>
    %383 = arith.index_cast %arg0 : i32 to index
    %c5_103 = arith.constant 5 : index
    %384 = memref.load %arg4[%383, %c5_103] : memref<8x7xi32, #tpu.memory_space<smem>>
    %385 = vector.broadcast %382 : i32 to vector<8x16xi32>
    %386 = arith.cmpi sge, %2, %385 : vector<8x16xi32>
    %387 = vector.broadcast %384 : i32 to vector<8x16xi32>
    %388 = arith.cmpi slt, %2, %387 : vector<8x16xi32>
    %389 = arith.andi %386, %388 : vector<8x16xi1>
    %cst_104 = arith.constant -1.000000e+30 : f32
    %390 = vector.broadcast %cst_104 : f32 to vector<8x16xf32>
    %391 = arith.select %389, %290, %390 : vector<8x16xi1>, vector<8x16xf32>
    %cst_105 = arith.constant dense<0xFF800000> : vector<16xf32>
    %392 = vector.multi_reduction <maximumf>, %391, %cst_105 [0] : vector<8x16xf32> to vector<16xf32>
    %393 = vector.shape_cast %392 : vector<16xf32> to vector<1x16xf32>
    %394 = arith.cmpi sle, %282, %280 : i32
    %395 = arith.cmpi sle, %384, %382 : i32
    %396 = arith.ori %394, %395 : i1
    %cst_106 = arith.constant 0.000000e+00 : f32
    %397 = vector.broadcast %cst_106 : f32 to vector<1x16xf32>
    %398 = arith.select %396, %397, %393 : vector<1x16xf32>
    %399 = arith.index_cast %arg0 : i32 to index
    %c6_107 = arith.constant 6 : index
    %400 = memref.load %arg3[%399, %c6_107] : memref<8x7xi32, #tpu.memory_space<smem>>
    %401 = arith.index_cast %arg0 : i32 to index
    %c6_108 = arith.constant 6 : index
    %402 = memref.load %arg4[%401, %c6_108] : memref<8x7xi32, #tpu.memory_space<smem>>
    %403 = vector.broadcast %400 : i32 to vector<8x16xi32>
    %404 = arith.cmpi sge, %2, %403 : vector<8x16xi32>
    %405 = vector.broadcast %402 : i32 to vector<8x16xi32>
    %406 = arith.cmpi slt, %2, %405 : vector<8x16xi32>
    %407 = arith.andi %404, %406 : vector<8x16xi1>
    %cst_109 = arith.constant -1.000000e+30 : f32
    %408 = vector.broadcast %cst_109 : f32 to vector<8x16xf32>
    %409 = arith.select %407, %290, %408 : vector<8x16xi1>, vector<8x16xf32>
    %cst_110 = arith.constant dense<0xFF800000> : vector<16xf32>
    %410 = vector.multi_reduction <maximumf>, %409, %cst_110 [0] : vector<8x16xf32> to vector<16xf32>
    %411 = vector.shape_cast %410 : vector<16xf32> to vector<1x16xf32>
    %412 = arith.cmpi sle, %282, %280 : i32
    %413 = arith.cmpi sle, %402, %400 : i32
    %414 = arith.ori %412, %413 : i1
    %cst_111 = arith.constant 0.000000e+00 : f32
    %415 = vector.broadcast %cst_111 : f32 to vector<1x16xf32>
    %416 = arith.select %414, %415, %411 : vector<1x16xf32>
    %417 = arith.index_cast %arg0 : i32 to index
    %c3_112 = arith.constant 3 : index
    %418 = memref.load %arg1[%417, %c3_112] : memref<8x7xi32, #tpu.memory_space<smem>>
    %419 = arith.index_cast %arg0 : i32 to index
    %c3_113 = arith.constant 3 : index
    %420 = memref.load %arg2[%419, %c3_113] : memref<8x7xi32, #tpu.memory_space<smem>>
    %421 = vector.broadcast %418 : i32 to vector<8x8x16xi32>
    %422 = arith.cmpi sge, %1, %421 : vector<8x8x16xi32>
    %423 = vector.broadcast %420 : i32 to vector<8x8x16xi32>
    %424 = arith.cmpi slt, %1, %423 : vector<8x8x16xi32>
    %425 = arith.andi %422, %424 : vector<8x8x16xi1>
    %cst_114 = arith.constant -1.000000e+30 : f32
    %426 = vector.broadcast %cst_114 : f32 to vector<8x8x16xf32>
    %427 = arith.select %425, %0, %426 : vector<8x8x16xi1>, vector<8x8x16xf32>
    %cst_115 = arith.constant dense<0xFF800000> : vector<8x16xf32>
    %428 = vector.multi_reduction <maximumf>, %427, %cst_115 [0] : vector<8x8x16xf32> to vector<8x16xf32>
    %429 = arith.index_cast %arg0 : i32 to index
    %c0_116 = arith.constant 0 : index
    %430 = memref.load %arg3[%429, %c0_116] : memref<8x7xi32, #tpu.memory_space<smem>>
    %431 = arith.index_cast %arg0 : i32 to index
    %c0_117 = arith.constant 0 : index
    %432 = memref.load %arg4[%431, %c0_117] : memref<8x7xi32, #tpu.memory_space<smem>>
    %433 = vector.broadcast %430 : i32 to vector<8x16xi32>
    %434 = arith.cmpi sge, %2, %433 : vector<8x16xi32>
    %435 = vector.broadcast %432 : i32 to vector<8x16xi32>
    %436 = arith.cmpi slt, %2, %435 : vector<8x16xi32>
    %437 = arith.andi %434, %436 : vector<8x16xi1>
    %cst_118 = arith.constant -1.000000e+30 : f32
    %438 = vector.broadcast %cst_118 : f32 to vector<8x16xf32>
    %439 = arith.select %437, %428, %438 : vector<8x16xi1>, vector<8x16xf32>
    %cst_119 = arith.constant dense<0xFF800000> : vector<16xf32>
    %440 = vector.multi_reduction <maximumf>, %439, %cst_119 [0] : vector<8x16xf32> to vector<16xf32>
    %441 = vector.shape_cast %440 : vector<16xf32> to vector<1x16xf32>
    %442 = arith.cmpi sle, %420, %418 : i32
    %443 = arith.cmpi sle, %432, %430 : i32
    %444 = arith.ori %442, %443 : i1
    %cst_120 = arith.constant 0.000000e+00 : f32
    %445 = vector.broadcast %cst_120 : f32 to vector<1x16xf32>
    %446 = arith.select %444, %445, %441 : vector<1x16xf32>
    %447 = arith.index_cast %arg0 : i32 to index
    %c1_121 = arith.constant 1 : index
    %448 = memref.load %arg3[%447, %c1_121] : memref<8x7xi32, #tpu.memory_space<smem>>
    %449 = arith.index_cast %arg0 : i32 to index
    %c1_122 = arith.constant 1 : index
    %450 = memref.load %arg4[%449, %c1_122] : memref<8x7xi32, #tpu.memory_space<smem>>
    %451 = vector.broadcast %448 : i32 to vector<8x16xi32>
    %452 = arith.cmpi sge, %2, %451 : vector<8x16xi32>
    %453 = vector.broadcast %450 : i32 to vector<8x16xi32>
    %454 = arith.cmpi slt, %2, %453 : vector<8x16xi32>
    %455 = arith.andi %452, %454 : vector<8x16xi1>
    %cst_123 = arith.constant -1.000000e+30 : f32
    %456 = vector.broadcast %cst_123 : f32 to vector<8x16xf32>
    %457 = arith.select %455, %428, %456 : vector<8x16xi1>, vector<8x16xf32>
    %cst_124 = arith.constant dense<0xFF800000> : vector<16xf32>
    %458 = vector.multi_reduction <maximumf>, %457, %cst_124 [0] : vector<8x16xf32> to vector<16xf32>
    %459 = vector.shape_cast %458 : vector<16xf32> to vector<1x16xf32>
    %460 = arith.cmpi sle, %420, %418 : i32
    %461 = arith.cmpi sle, %450, %448 : i32
    %462 = arith.ori %460, %461 : i1
    %cst_125 = arith.constant 0.000000e+00 : f32
    %463 = vector.broadcast %cst_125 : f32 to vector<1x16xf32>
    %464 = arith.select %462, %463, %459 : vector<1x16xf32>
    %465 = arith.index_cast %arg0 : i32 to index
    %c2_126 = arith.constant 2 : index
    %466 = memref.load %arg3[%465, %c2_126] : memref<8x7xi32, #tpu.memory_space<smem>>
    %467 = arith.index_cast %arg0 : i32 to index
    %c2_127 = arith.constant 2 : index
    %468 = memref.load %arg4[%467, %c2_127] : memref<8x7xi32, #tpu.memory_space<smem>>
    %469 = vector.broadcast %466 : i32 to vector<8x16xi32>
    %470 = arith.cmpi sge, %2, %469 : vector<8x16xi32>
    %471 = vector.broadcast %468 : i32 to vector<8x16xi32>
    %472 = arith.cmpi slt, %2, %471 : vector<8x16xi32>
    %473 = arith.andi %470, %472 : vector<8x16xi1>
    %cst_128 = arith.constant -1.000000e+30 : f32
    %474 = vector.broadcast %cst_128 : f32 to vector<8x16xf32>
    %475 = arith.select %473, %428, %474 : vector<8x16xi1>, vector<8x16xf32>
    %cst_129 = arith.constant dense<0xFF800000> : vector<16xf32>
    %476 = vector.multi_reduction <maximumf>, %475, %cst_129 [0] : vector<8x16xf32> to vector<16xf32>
    %477 = vector.shape_cast %476 : vector<16xf32> to vector<1x16xf32>
    %478 = arith.cmpi sle, %420, %418 : i32
    %479 = arith.cmpi sle, %468, %466 : i32
    %480 = arith.ori %478, %479 : i1
    %cst_130 = arith.constant 0.000000e+00 : f32
    %481 = vector.broadcast %cst_130 : f32 to vector<1x16xf32>
    %482 = arith.select %480, %481, %477 : vector<1x16xf32>
    %483 = arith.index_cast %arg0 : i32 to index
    %c3_131 = arith.constant 3 : index
    %484 = memref.load %arg3[%483, %c3_131] : memref<8x7xi32, #tpu.memory_space<smem>>
    %485 = arith.index_cast %arg0 : i32 to index
    %c3_132 = arith.constant 3 : index
    %486 = memref.load %arg4[%485, %c3_132] : memref<8x7xi32, #tpu.memory_space<smem>>
    %487 = vector.broadcast %484 : i32 to vector<8x16xi32>
    %488 = arith.cmpi sge, %2, %487 : vector<8x16xi32>
    %489 = vector.broadcast %486 : i32 to vector<8x16xi32>
    %490 = arith.cmpi slt, %2, %489 : vector<8x16xi32>
    %491 = arith.andi %488, %490 : vector<8x16xi1>
    %cst_133 = arith.constant -1.000000e+30 : f32
    %492 = vector.broadcast %cst_133 : f32 to vector<8x16xf32>
    %493 = arith.select %491, %428, %492 : vector<8x16xi1>, vector<8x16xf32>
    %cst_134 = arith.constant dense<0xFF800000> : vector<16xf32>
    %494 = vector.multi_reduction <maximumf>, %493, %cst_134 [0] : vector<8x16xf32> to vector<16xf32>
    %495 = vector.shape_cast %494 : vector<16xf32> to vector<1x16xf32>
    %496 = arith.cmpi sle, %420, %418 : i32
    %497 = arith.cmpi sle, %486, %484 : i32
    %498 = arith.ori %496, %497 : i1
    %cst_135 = arith.constant 0.000000e+00 : f32
    %499 = vector.broadcast %cst_135 : f32 to vector<1x16xf32>
    %500 = arith.select %498, %499, %495 : vector<1x16xf32>
    %501 = arith.index_cast %arg0 : i32 to index
    %c4_136 = arith.constant 4 : index
    %502 = memref.load %arg3[%501, %c4_136] : memref<8x7xi32, #tpu.memory_space<smem>>
    %503 = arith.index_cast %arg0 : i32 to index
    %c4_137 = arith.constant 4 : index
    %504 = memref.load %arg4[%503, %c4_137] : memref<8x7xi32, #tpu.memory_space<smem>>
    %505 = vector.broadcast %502 : i32 to vector<8x16xi32>
    %506 = arith.cmpi sge, %2, %505 : vector<8x16xi32>
    %507 = vector.broadcast %504 : i32 to vector<8x16xi32>
    %508 = arith.cmpi slt, %2, %507 : vector<8x16xi32>
    %509 = arith.andi %506, %508 : vector<8x16xi1>
    %cst_138 = arith.constant -1.000000e+30 : f32
    %510 = vector.broadcast %cst_138 : f32 to vector<8x16xf32>
    %511 = arith.select %509, %428, %510 : vector<8x16xi1>, vector<8x16xf32>
    %cst_139 = arith.constant dense<0xFF800000> : vector<16xf32>
    %512 = vector.multi_reduction <maximumf>, %511, %cst_139 [0] : vector<8x16xf32> to vector<16xf32>
    %513 = vector.shape_cast %512 : vector<16xf32> to vector<1x16xf32>
    %514 = arith.cmpi sle, %420, %418 : i32
    %515 = arith.cmpi sle, %504, %502 : i32
    %516 = arith.ori %514, %515 : i1
    %cst_140 = arith.constant 0.000000e+00 : f32
    %517 = vector.broadcast %cst_140 : f32 to vector<1x16xf32>
    %518 = arith.select %516, %517, %513 : vector<1x16xf32>
    %519 = arith.index_cast %arg0 : i32 to index
    %c5_141 = arith.constant 5 : index
    %520 = memref.load %arg3[%519, %c5_141] : memref<8x7xi32, #tpu.memory_space<smem>>
    %521 = arith.index_cast %arg0 : i32 to index
    %c5_142 = arith.constant 5 : index
    %522 = memref.load %arg4[%521, %c5_142] : memref<8x7xi32, #tpu.memory_space<smem>>
    %523 = vector.broadcast %520 : i32 to vector<8x16xi32>
    %524 = arith.cmpi sge, %2, %523 : vector<8x16xi32>
    %525 = vector.broadcast %522 : i32 to vector<8x16xi32>
    %526 = arith.cmpi slt, %2, %525 : vector<8x16xi32>
    %527 = arith.andi %524, %526 : vector<8x16xi1>
    %cst_143 = arith.constant -1.000000e+30 : f32
    %528 = vector.broadcast %cst_143 : f32 to vector<8x16xf32>
    %529 = arith.select %527, %428, %528 : vector<8x16xi1>, vector<8x16xf32>
    %cst_144 = arith.constant dense<0xFF800000> : vector<16xf32>
    %530 = vector.multi_reduction <maximumf>, %529, %cst_144 [0] : vector<8x16xf32> to vector<16xf32>
    %531 = vector.shape_cast %530 : vector<16xf32> to vector<1x16xf32>
    %532 = arith.cmpi sle, %420, %418 : i32
    %533 = arith.cmpi sle, %522, %520 : i32
    %534 = arith.ori %532, %533 : i1
    %cst_145 = arith.constant 0.000000e+00 : f32
    %535 = vector.broadcast %cst_145 : f32 to vector<1x16xf32>
    %536 = arith.select %534, %535, %531 : vector<1x16xf32>
    %537 = arith.index_cast %arg0 : i32 to index
    %c6_146 = arith.constant 6 : index
    %538 = memref.load %arg3[%537, %c6_146] : memref<8x7xi32, #tpu.memory_space<smem>>
    %539 = arith.index_cast %arg0 : i32 to index
    %c6_147 = arith.constant 6 : index
    %540 = memref.load %arg4[%539, %c6_147] : memref<8x7xi32, #tpu.memory_space<smem>>
    %541 = vector.broadcast %538 : i32 to vector<8x16xi32>
    %542 = arith.cmpi sge, %2, %541 : vector<8x16xi32>
    %543 = vector.broadcast %540 : i32 to vector<8x16xi32>
    %544 = arith.cmpi slt, %2, %543 : vector<8x16xi32>
    %545 = arith.andi %542, %544 : vector<8x16xi1>
    %cst_148 = arith.constant -1.000000e+30 : f32
    %546 = vector.broadcast %cst_148 : f32 to vector<8x16xf32>
    %547 = arith.select %545, %428, %546 : vector<8x16xi1>, vector<8x16xf32>
    %cst_149 = arith.constant dense<0xFF800000> : vector<16xf32>
    %548 = vector.multi_reduction <maximumf>, %547, %cst_149 [0] : vector<8x16xf32> to vector<16xf32>
    %549 = vector.shape_cast %548 : vector<16xf32> to vector<1x16xf32>
    %550 = arith.cmpi sle, %420, %418 : i32
    %551 = arith.cmpi sle, %540, %538 : i32
    %552 = arith.ori %550, %551 : i1
    %cst_150 = arith.constant 0.000000e+00 : f32
    %553 = vector.broadcast %cst_150 : f32 to vector<1x16xf32>
    %554 = arith.select %552, %553, %549 : vector<1x16xf32>
    %555 = arith.index_cast %arg0 : i32 to index
    %c4_151 = arith.constant 4 : index
    %556 = memref.load %arg1[%555, %c4_151] : memref<8x7xi32, #tpu.memory_space<smem>>
    %557 = arith.index_cast %arg0 : i32 to index
    %c4_152 = arith.constant 4 : index
    %558 = memref.load %arg2[%557, %c4_152] : memref<8x7xi32, #tpu.memory_space<smem>>
    %559 = vector.broadcast %556 : i32 to vector<8x8x16xi32>
    %560 = arith.cmpi sge, %1, %559 : vector<8x8x16xi32>
    %561 = vector.broadcast %558 : i32 to vector<8x8x16xi32>
    %562 = arith.cmpi slt, %1, %561 : vector<8x8x16xi32>
    %563 = arith.andi %560, %562 : vector<8x8x16xi1>
    %cst_153 = arith.constant -1.000000e+30 : f32
    %564 = vector.broadcast %cst_153 : f32 to vector<8x8x16xf32>
    %565 = arith.select %563, %0, %564 : vector<8x8x16xi1>, vector<8x8x16xf32>
    %cst_154 = arith.constant dense<0xFF800000> : vector<8x16xf32>
    %566 = vector.multi_reduction <maximumf>, %565, %cst_154 [0] : vector<8x8x16xf32> to vector<8x16xf32>
    %567 = arith.index_cast %arg0 : i32 to index
    %c0_155 = arith.constant 0 : index
    %568 = memref.load %arg3[%567, %c0_155] : memref<8x7xi32, #tpu.memory_space<smem>>
    %569 = arith.index_cast %arg0 : i32 to index
    %c0_156 = arith.constant 0 : index
    %570 = memref.load %arg4[%569, %c0_156] : memref<8x7xi32, #tpu.memory_space<smem>>
    %571 = vector.broadcast %568 : i32 to vector<8x16xi32>
    %572 = arith.cmpi sge, %2, %571 : vector<8x16xi32>
    %573 = vector.broadcast %570 : i32 to vector<8x16xi32>
    %574 = arith.cmpi slt, %2, %573 : vector<8x16xi32>
    %575 = arith.andi %572, %574 : vector<8x16xi1>
    %cst_157 = arith.constant -1.000000e+30 : f32
    %576 = vector.broadcast %cst_157 : f32 to vector<8x16xf32>
    %577 = arith.select %575, %566, %576 : vector<8x16xi1>, vector<8x16xf32>
    %cst_158 = arith.constant dense<0xFF800000> : vector<16xf32>
    %578 = vector.multi_reduction <maximumf>, %577, %cst_158 [0] : vector<8x16xf32> to vector<16xf32>
    %579 = vector.shape_cast %578 : vector<16xf32> to vector<1x16xf32>
    %580 = arith.cmpi sle, %558, %556 : i32
    %581 = arith.cmpi sle, %570, %568 : i32
    %582 = arith.ori %580, %581 : i1
    %cst_159 = arith.constant 0.000000e+00 : f32
    %583 = vector.broadcast %cst_159 : f32 to vector<1x16xf32>
    %584 = arith.select %582, %583, %579 : vector<1x16xf32>
    %585 = arith.index_cast %arg0 : i32 to index
    %c1_160 = arith.constant 1 : index
    %586 = memref.load %arg3[%585, %c1_160] : memref<8x7xi32, #tpu.memory_space<smem>>
    %587 = arith.index_cast %arg0 : i32 to index
    %c1_161 = arith.constant 1 : index
    %588 = memref.load %arg4[%587, %c1_161] : memref<8x7xi32, #tpu.memory_space<smem>>
    %589 = vector.broadcast %586 : i32 to vector<8x16xi32>
    %590 = arith.cmpi sge, %2, %589 : vector<8x16xi32>
    %591 = vector.broadcast %588 : i32 to vector<8x16xi32>
    %592 = arith.cmpi slt, %2, %591 : vector<8x16xi32>
    %593 = arith.andi %590, %592 : vector<8x16xi1>
    %cst_162 = arith.constant -1.000000e+30 : f32
    %594 = vector.broadcast %cst_162 : f32 to vector<8x16xf32>
    %595 = arith.select %593, %566, %594 : vector<8x16xi1>, vector<8x16xf32>
    %cst_163 = arith.constant dense<0xFF800000> : vector<16xf32>
    %596 = vector.multi_reduction <maximumf>, %595, %cst_163 [0] : vector<8x16xf32> to vector<16xf32>
    %597 = vector.shape_cast %596 : vector<16xf32> to vector<1x16xf32>
    %598 = arith.cmpi sle, %558, %556 : i32
    %599 = arith.cmpi sle, %588, %586 : i32
    %600 = arith.ori %598, %599 : i1
    %cst_164 = arith.constant 0.000000e+00 : f32
    %601 = vector.broadcast %cst_164 : f32 to vector<1x16xf32>
    %602 = arith.select %600, %601, %597 : vector<1x16xf32>
    %603 = arith.index_cast %arg0 : i32 to index
    %c2_165 = arith.constant 2 : index
    %604 = memref.load %arg3[%603, %c2_165] : memref<8x7xi32, #tpu.memory_space<smem>>
    %605 = arith.index_cast %arg0 : i32 to index
    %c2_166 = arith.constant 2 : index
    %606 = memref.load %arg4[%605, %c2_166] : memref<8x7xi32, #tpu.memory_space<smem>>
    %607 = vector.broadcast %604 : i32 to vector<8x16xi32>
    %608 = arith.cmpi sge, %2, %607 : vector<8x16xi32>
    %609 = vector.broadcast %606 : i32 to vector<8x16xi32>
    %610 = arith.cmpi slt, %2, %609 : vector<8x16xi32>
    %611 = arith.andi %608, %610 : vector<8x16xi1>
    %cst_167 = arith.constant -1.000000e+30 : f32
    %612 = vector.broadcast %cst_167 : f32 to vector<8x16xf32>
    %613 = arith.select %611, %566, %612 : vector<8x16xi1>, vector<8x16xf32>
    %cst_168 = arith.constant dense<0xFF800000> : vector<16xf32>
    %614 = vector.multi_reduction <maximumf>, %613, %cst_168 [0] : vector<8x16xf32> to vector<16xf32>
    %615 = vector.shape_cast %614 : vector<16xf32> to vector<1x16xf32>
    %616 = arith.cmpi sle, %558, %556 : i32
    %617 = arith.cmpi sle, %606, %604 : i32
    %618 = arith.ori %616, %617 : i1
    %cst_169 = arith.constant 0.000000e+00 : f32
    %619 = vector.broadcast %cst_169 : f32 to vector<1x16xf32>
    %620 = arith.select %618, %619, %615 : vector<1x16xf32>
    %621 = arith.index_cast %arg0 : i32 to index
    %c3_170 = arith.constant 3 : index
    %622 = memref.load %arg3[%621, %c3_170] : memref<8x7xi32, #tpu.memory_space<smem>>
    %623 = arith.index_cast %arg0 : i32 to index
    %c3_171 = arith.constant 3 : index
    %624 = memref.load %arg4[%623, %c3_171] : memref<8x7xi32, #tpu.memory_space<smem>>
    %625 = vector.broadcast %622 : i32 to vector<8x16xi32>
    %626 = arith.cmpi sge, %2, %625 : vector<8x16xi32>
    %627 = vector.broadcast %624 : i32 to vector<8x16xi32>
    %628 = arith.cmpi slt, %2, %627 : vector<8x16xi32>
    %629 = arith.andi %626, %628 : vector<8x16xi1>
    %cst_172 = arith.constant -1.000000e+30 : f32
    %630 = vector.broadcast %cst_172 : f32 to vector<8x16xf32>
    %631 = arith.select %629, %566, %630 : vector<8x16xi1>, vector<8x16xf32>
    %cst_173 = arith.constant dense<0xFF800000> : vector<16xf32>
    %632 = vector.multi_reduction <maximumf>, %631, %cst_173 [0] : vector<8x16xf32> to vector<16xf32>
    %633 = vector.shape_cast %632 : vector<16xf32> to vector<1x16xf32>
    %634 = arith.cmpi sle, %558, %556 : i32
    %635 = arith.cmpi sle, %624, %622 : i32
    %636 = arith.ori %634, %635 : i1
    %cst_174 = arith.constant 0.000000e+00 : f32
    %637 = vector.broadcast %cst_174 : f32 to vector<1x16xf32>
    %638 = arith.select %636, %637, %633 : vector<1x16xf32>
    %639 = arith.index_cast %arg0 : i32 to index
    %c4_175 = arith.constant 4 : index
    %640 = memref.load %arg3[%639, %c4_175] : memref<8x7xi32, #tpu.memory_space<smem>>
    %641 = arith.index_cast %arg0 : i32 to index
    %c4_176 = arith.constant 4 : index
    %642 = memref.load %arg4[%641, %c4_176] : memref<8x7xi32, #tpu.memory_space<smem>>
    %643 = vector.broadcast %640 : i32 to vector<8x16xi32>
    %644 = arith.cmpi sge, %2, %643 : vector<8x16xi32>
    %645 = vector.broadcast %642 : i32 to vector<8x16xi32>
    %646 = arith.cmpi slt, %2, %645 : vector<8x16xi32>
    %647 = arith.andi %644, %646 : vector<8x16xi1>
    %cst_177 = arith.constant -1.000000e+30 : f32
    %648 = vector.broadcast %cst_177 : f32 to vector<8x16xf32>
    %649 = arith.select %647, %566, %648 : vector<8x16xi1>, vector<8x16xf32>
    %cst_178 = arith.constant dense<0xFF800000> : vector<16xf32>
    %650 = vector.multi_reduction <maximumf>, %649, %cst_178 [0] : vector<8x16xf32> to vector<16xf32>
    %651 = vector.shape_cast %650 : vector<16xf32> to vector<1x16xf32>
    %652 = arith.cmpi sle, %558, %556 : i32
    %653 = arith.cmpi sle, %642, %640 : i32
    %654 = arith.ori %652, %653 : i1
    %cst_179 = arith.constant 0.000000e+00 : f32
    %655 = vector.broadcast %cst_179 : f32 to vector<1x16xf32>
    %656 = arith.select %654, %655, %651 : vector<1x16xf32>
    %657 = arith.index_cast %arg0 : i32 to index
    %c5_180 = arith.constant 5 : index
    %658 = memref.load %arg3[%657, %c5_180] : memref<8x7xi32, #tpu.memory_space<smem>>
    %659 = arith.index_cast %arg0 : i32 to index
    %c5_181 = arith.constant 5 : index
    %660 = memref.load %arg4[%659, %c5_181] : memref<8x7xi32, #tpu.memory_space<smem>>
    %661 = vector.broadcast %658 : i32 to vector<8x16xi32>
    %662 = arith.cmpi sge, %2, %661 : vector<8x16xi32>
    %663 = vector.broadcast %660 : i32 to vector<8x16xi32>
    %664 = arith.cmpi slt, %2, %663 : vector<8x16xi32>
    %665 = arith.andi %662, %664 : vector<8x16xi1>
    %cst_182 = arith.constant -1.000000e+30 : f32
    %666 = vector.broadcast %cst_182 : f32 to vector<8x16xf32>
    %667 = arith.select %665, %566, %666 : vector<8x16xi1>, vector<8x16xf32>
    %cst_183 = arith.constant dense<0xFF800000> : vector<16xf32>
    %668 = vector.multi_reduction <maximumf>, %667, %cst_183 [0] : vector<8x16xf32> to vector<16xf32>
    %669 = vector.shape_cast %668 : vector<16xf32> to vector<1x16xf32>
    %670 = arith.cmpi sle, %558, %556 : i32
    %671 = arith.cmpi sle, %660, %658 : i32
    %672 = arith.ori %670, %671 : i1
    %cst_184 = arith.constant 0.000000e+00 : f32
    %673 = vector.broadcast %cst_184 : f32 to vector<1x16xf32>
    %674 = arith.select %672, %673, %669 : vector<1x16xf32>
    %675 = arith.index_cast %arg0 : i32 to index
    %c6_185 = arith.constant 6 : index
    %676 = memref.load %arg3[%675, %c6_185] : memref<8x7xi32, #tpu.memory_space<smem>>
    %677 = arith.index_cast %arg0 : i32 to index
    %c6_186 = arith.constant 6 : index
    %678 = memref.load %arg4[%677, %c6_186] : memref<8x7xi32, #tpu.memory_space<smem>>
    %679 = vector.broadcast %676 : i32 to vector<8x16xi32>
    %680 = arith.cmpi sge, %2, %679 : vector<8x16xi32>
    %681 = vector.broadcast %678 : i32 to vector<8x16xi32>
    %682 = arith.cmpi slt, %2, %681 : vector<8x16xi32>
    %683 = arith.andi %680, %682 : vector<8x16xi1>
    %cst_187 = arith.constant -1.000000e+30 : f32
    %684 = vector.broadcast %cst_187 : f32 to vector<8x16xf32>
    %685 = arith.select %683, %566, %684 : vector<8x16xi1>, vector<8x16xf32>
    %cst_188 = arith.constant dense<0xFF800000> : vector<16xf32>
    %686 = vector.multi_reduction <maximumf>, %685, %cst_188 [0] : vector<8x16xf32> to vector<16xf32>
    %687 = vector.shape_cast %686 : vector<16xf32> to vector<1x16xf32>
    %688 = arith.cmpi sle, %558, %556 : i32
    %689 = arith.cmpi sle, %678, %676 : i32
    %690 = arith.ori %688, %689 : i1
    %cst_189 = arith.constant 0.000000e+00 : f32
    %691 = vector.broadcast %cst_189 : f32 to vector<1x16xf32>
    %692 = arith.select %690, %691, %687 : vector<1x16xf32>
    %693 = arith.index_cast %arg0 : i32 to index
    %c5_190 = arith.constant 5 : index
    %694 = memref.load %arg1[%693, %c5_190] : memref<8x7xi32, #tpu.memory_space<smem>>
    %695 = arith.index_cast %arg0 : i32 to index
    %c5_191 = arith.constant 5 : index
    %696 = memref.load %arg2[%695, %c5_191] : memref<8x7xi32, #tpu.memory_space<smem>>
    %697 = vector.broadcast %694 : i32 to vector<8x8x16xi32>
    %698 = arith.cmpi sge, %1, %697 : vector<8x8x16xi32>
    %699 = vector.broadcast %696 : i32 to vector<8x8x16xi32>
    %700 = arith.cmpi slt, %1, %699 : vector<8x8x16xi32>
    %701 = arith.andi %698, %700 : vector<8x8x16xi1>
    %cst_192 = arith.constant -1.000000e+30 : f32
    %702 = vector.broadcast %cst_192 : f32 to vector<8x8x16xf32>
    %703 = arith.select %701, %0, %702 : vector<8x8x16xi1>, vector<8x8x16xf32>
    %cst_193 = arith.constant dense<0xFF800000> : vector<8x16xf32>
    %704 = vector.multi_reduction <maximumf>, %703, %cst_193 [0] : vector<8x8x16xf32> to vector<8x16xf32>
    %705 = arith.index_cast %arg0 : i32 to index
    %c0_194 = arith.constant 0 : index
    %706 = memref.load %arg3[%705, %c0_194] : memref<8x7xi32, #tpu.memory_space<smem>>
    %707 = arith.index_cast %arg0 : i32 to index
    %c0_195 = arith.constant 0 : index
    %708 = memref.load %arg4[%707, %c0_195] : memref<8x7xi32, #tpu.memory_space<smem>>
    %709 = vector.broadcast %706 : i32 to vector<8x16xi32>
    %710 = arith.cmpi sge, %2, %709 : vector<8x16xi32>
    %711 = vector.broadcast %708 : i32 to vector<8x16xi32>
    %712 = arith.cmpi slt, %2, %711 : vector<8x16xi32>
    %713 = arith.andi %710, %712 : vector<8x16xi1>
    %cst_196 = arith.constant -1.000000e+30 : f32
    %714 = vector.broadcast %cst_196 : f32 to vector<8x16xf32>
    %715 = arith.select %713, %704, %714 : vector<8x16xi1>, vector<8x16xf32>
    %cst_197 = arith.constant dense<0xFF800000> : vector<16xf32>
    %716 = vector.multi_reduction <maximumf>, %715, %cst_197 [0] : vector<8x16xf32> to vector<16xf32>
    %717 = vector.shape_cast %716 : vector<16xf32> to vector<1x16xf32>
    %718 = arith.cmpi sle, %696, %694 : i32
    %719 = arith.cmpi sle, %708, %706 : i32
    %720 = arith.ori %718, %719 : i1
    %cst_198 = arith.constant 0.000000e+00 : f32
    %721 = vector.broadcast %cst_198 : f32 to vector<1x16xf32>
    %722 = arith.select %720, %721, %717 : vector<1x16xf32>
    %723 = arith.index_cast %arg0 : i32 to index
    %c1_199 = arith.constant 1 : index
    %724 = memref.load %arg3[%723, %c1_199] : memref<8x7xi32, #tpu.memory_space<smem>>
    %725 = arith.index_cast %arg0 : i32 to index
    %c1_200 = arith.constant 1 : index
    %726 = memref.load %arg4[%725, %c1_200] : memref<8x7xi32, #tpu.memory_space<smem>>
    %727 = vector.broadcast %724 : i32 to vector<8x16xi32>
    %728 = arith.cmpi sge, %2, %727 : vector<8x16xi32>
    %729 = vector.broadcast %726 : i32 to vector<8x16xi32>
    %730 = arith.cmpi slt, %2, %729 : vector<8x16xi32>
    %731 = arith.andi %728, %730 : vector<8x16xi1>
    %cst_201 = arith.constant -1.000000e+30 : f32
    %732 = vector.broadcast %cst_201 : f32 to vector<8x16xf32>
    %733 = arith.select %731, %704, %732 : vector<8x16xi1>, vector<8x16xf32>
    %cst_202 = arith.constant dense<0xFF800000> : vector<16xf32>
    %734 = vector.multi_reduction <maximumf>, %733, %cst_202 [0] : vector<8x16xf32> to vector<16xf32>
    %735 = vector.shape_cast %734 : vector<16xf32> to vector<1x16xf32>
    %736 = arith.cmpi sle, %696, %694 : i32
    %737 = arith.cmpi sle, %726, %724 : i32
    %738 = arith.ori %736, %737 : i1
    %cst_203 = arith.constant 0.000000e+00 : f32
    %739 = vector.broadcast %cst_203 : f32 to vector<1x16xf32>
    %740 = arith.select %738, %739, %735 : vector<1x16xf32>
    %741 = arith.index_cast %arg0 : i32 to index
    %c2_204 = arith.constant 2 : index
    %742 = memref.load %arg3[%741, %c2_204] : memref<8x7xi32, #tpu.memory_space<smem>>
    %743 = arith.index_cast %arg0 : i32 to index
    %c2_205 = arith.constant 2 : index
    %744 = memref.load %arg4[%743, %c2_205] : memref<8x7xi32, #tpu.memory_space<smem>>
    %745 = vector.broadcast %742 : i32 to vector<8x16xi32>
    %746 = arith.cmpi sge, %2, %745 : vector<8x16xi32>
    %747 = vector.broadcast %744 : i32 to vector<8x16xi32>
    %748 = arith.cmpi slt, %2, %747 : vector<8x16xi32>
    %749 = arith.andi %746, %748 : vector<8x16xi1>
    %cst_206 = arith.constant -1.000000e+30 : f32
    %750 = vector.broadcast %cst_206 : f32 to vector<8x16xf32>
    %751 = arith.select %749, %704, %750 : vector<8x16xi1>, vector<8x16xf32>
    %cst_207 = arith.constant dense<0xFF800000> : vector<16xf32>
    %752 = vector.multi_reduction <maximumf>, %751, %cst_207 [0] : vector<8x16xf32> to vector<16xf32>
    %753 = vector.shape_cast %752 : vector<16xf32> to vector<1x16xf32>
    %754 = arith.cmpi sle, %696, %694 : i32
    %755 = arith.cmpi sle, %744, %742 : i32
    %756 = arith.ori %754, %755 : i1
    %cst_208 = arith.constant 0.000000e+00 : f32
    %757 = vector.broadcast %cst_208 : f32 to vector<1x16xf32>
    %758 = arith.select %756, %757, %753 : vector<1x16xf32>
    %759 = arith.index_cast %arg0 : i32 to index
    %c3_209 = arith.constant 3 : index
    %760 = memref.load %arg3[%759, %c3_209] : memref<8x7xi32, #tpu.memory_space<smem>>
    %761 = arith.index_cast %arg0 : i32 to index
    %c3_210 = arith.constant 3 : index
    %762 = memref.load %arg4[%761, %c3_210] : memref<8x7xi32, #tpu.memory_space<smem>>
    %763 = vector.broadcast %760 : i32 to vector<8x16xi32>
    %764 = arith.cmpi sge, %2, %763 : vector<8x16xi32>
    %765 = vector.broadcast %762 : i32 to vector<8x16xi32>
    %766 = arith.cmpi slt, %2, %765 : vector<8x16xi32>
    %767 = arith.andi %764, %766 : vector<8x16xi1>
    %cst_211 = arith.constant -1.000000e+30 : f32
    %768 = vector.broadcast %cst_211 : f32 to vector<8x16xf32>
    %769 = arith.select %767, %704, %768 : vector<8x16xi1>, vector<8x16xf32>
    %cst_212 = arith.constant dense<0xFF800000> : vector<16xf32>
    %770 = vector.multi_reduction <maximumf>, %769, %cst_212 [0] : vector<8x16xf32> to vector<16xf32>
    %771 = vector.shape_cast %770 : vector<16xf32> to vector<1x16xf32>
    %772 = arith.cmpi sle, %696, %694 : i32
    %773 = arith.cmpi sle, %762, %760 : i32
    %774 = arith.ori %772, %773 : i1
    %cst_213 = arith.constant 0.000000e+00 : f32
    %775 = vector.broadcast %cst_213 : f32 to vector<1x16xf32>
    %776 = arith.select %774, %775, %771 : vector<1x16xf32>
    %777 = arith.index_cast %arg0 : i32 to index
    %c4_214 = arith.constant 4 : index
    %778 = memref.load %arg3[%777, %c4_214] : memref<8x7xi32, #tpu.memory_space<smem>>
    %779 = arith.index_cast %arg0 : i32 to index
    %c4_215 = arith.constant 4 : index
    %780 = memref.load %arg4[%779, %c4_215] : memref<8x7xi32, #tpu.memory_space<smem>>
    %781 = vector.broadcast %778 : i32 to vector<8x16xi32>
    %782 = arith.cmpi sge, %2, %781 : vector<8x16xi32>
    %783 = vector.broadcast %780 : i32 to vector<8x16xi32>
    %784 = arith.cmpi slt, %2, %783 : vector<8x16xi32>
    %785 = arith.andi %782, %784 : vector<8x16xi1>
    %cst_216 = arith.constant -1.000000e+30 : f32
    %786 = vector.broadcast %cst_216 : f32 to vector<8x16xf32>
    %787 = arith.select %785, %704, %786 : vector<8x16xi1>, vector<8x16xf32>
    %cst_217 = arith.constant dense<0xFF800000> : vector<16xf32>
    %788 = vector.multi_reduction <maximumf>, %787, %cst_217 [0] : vector<8x16xf32> to vector<16xf32>
    %789 = vector.shape_cast %788 : vector<16xf32> to vector<1x16xf32>
    %790 = arith.cmpi sle, %696, %694 : i32
    %791 = arith.cmpi sle, %780, %778 : i32
    %792 = arith.ori %790, %791 : i1
    %cst_218 = arith.constant 0.000000e+00 : f32
    %793 = vector.broadcast %cst_218 : f32 to vector<1x16xf32>
    %794 = arith.select %792, %793, %789 : vector<1x16xf32>
    %795 = arith.index_cast %arg0 : i32 to index
    %c5_219 = arith.constant 5 : index
    %796 = memref.load %arg3[%795, %c5_219] : memref<8x7xi32, #tpu.memory_space<smem>>
    %797 = arith.index_cast %arg0 : i32 to index
    %c5_220 = arith.constant 5 : index
    %798 = memref.load %arg4[%797, %c5_220] : memref<8x7xi32, #tpu.memory_space<smem>>
    %799 = vector.broadcast %796 : i32 to vector<8x16xi32>
    %800 = arith.cmpi sge, %2, %799 : vector<8x16xi32>
    %801 = vector.broadcast %798 : i32 to vector<8x16xi32>
    %802 = arith.cmpi slt, %2, %801 : vector<8x16xi32>
    %803 = arith.andi %800, %802 : vector<8x16xi1>
    %cst_221 = arith.constant -1.000000e+30 : f32
    %804 = vector.broadcast %cst_221 : f32 to vector<8x16xf32>
    %805 = arith.select %803, %704, %804 : vector<8x16xi1>, vector<8x16xf32>
    %cst_222 = arith.constant dense<0xFF800000> : vector<16xf32>
    %806 = vector.multi_reduction <maximumf>, %805, %cst_222 [0] : vector<8x16xf32> to vector<16xf32>
    %807 = vector.shape_cast %806 : vector<16xf32> to vector<1x16xf32>
    %808 = arith.cmpi sle, %696, %694 : i32
    %809 = arith.cmpi sle, %798, %796 : i32
    %810 = arith.ori %808, %809 : i1
    %cst_223 = arith.constant 0.000000e+00 : f32
    %811 = vector.broadcast %cst_223 : f32 to vector<1x16xf32>
    %812 = arith.select %810, %811, %807 : vector<1x16xf32>
    %813 = arith.index_cast %arg0 : i32 to index
    %c6_224 = arith.constant 6 : index
    %814 = memref.load %arg3[%813, %c6_224] : memref<8x7xi32, #tpu.memory_space<smem>>
    %815 = arith.index_cast %arg0 : i32 to index
    %c6_225 = arith.constant 6 : index
    %816 = memref.load %arg4[%815, %c6_225] : memref<8x7xi32, #tpu.memory_space<smem>>
    %817 = vector.broadcast %814 : i32 to vector<8x16xi32>
    %818 = arith.cmpi sge, %2, %817 : vector<8x16xi32>
    %819 = vector.broadcast %816 : i32 to vector<8x16xi32>
    %820 = arith.cmpi slt, %2, %819 : vector<8x16xi32>
    %821 = arith.andi %818, %820 : vector<8x16xi1>
    %cst_226 = arith.constant -1.000000e+30 : f32
    %822 = vector.broadcast %cst_226 : f32 to vector<8x16xf32>
    %823 = arith.select %821, %704, %822 : vector<8x16xi1>, vector<8x16xf32>
    %cst_227 = arith.constant dense<0xFF800000> : vector<16xf32>
    %824 = vector.multi_reduction <maximumf>, %823, %cst_227 [0] : vector<8x16xf32> to vector<16xf32>
    %825 = vector.shape_cast %824 : vector<16xf32> to vector<1x16xf32>
    %826 = arith.cmpi sle, %696, %694 : i32
    %827 = arith.cmpi sle, %816, %814 : i32
    %828 = arith.ori %826, %827 : i1
    %cst_228 = arith.constant 0.000000e+00 : f32
    %829 = vector.broadcast %cst_228 : f32 to vector<1x16xf32>
    %830 = arith.select %828, %829, %825 : vector<1x16xf32>
    %831 = arith.index_cast %arg0 : i32 to index
    %c6_229 = arith.constant 6 : index
    %832 = memref.load %arg1[%831, %c6_229] : memref<8x7xi32, #tpu.memory_space<smem>>
    %833 = arith.index_cast %arg0 : i32 to index
    %c6_230 = arith.constant 6 : index
    %834 = memref.load %arg2[%833, %c6_230] : memref<8x7xi32, #tpu.memory_space<smem>>
    %835 = vector.broadcast %832 : i32 to vector<8x8x16xi32>
    %836 = arith.cmpi sge, %1, %835 : vector<8x8x16xi32>
    %837 = vector.broadcast %834 : i32 to vector<8x8x16xi32>
    %838 = arith.cmpi slt, %1, %837 : vector<8x8x16xi32>
    %839 = arith.andi %836, %838 : vector<8x8x16xi1>
    %cst_231 = arith.constant -1.000000e+30 : f32
    %840 = vector.broadcast %cst_231 : f32 to vector<8x8x16xf32>
    %841 = arith.select %839, %0, %840 : vector<8x8x16xi1>, vector<8x8x16xf32>
    %cst_232 = arith.constant dense<0xFF800000> : vector<8x16xf32>
    %842 = vector.multi_reduction <maximumf>, %841, %cst_232 [0] : vector<8x8x16xf32> to vector<8x16xf32>
    %843 = arith.index_cast %arg0 : i32 to index
    %c0_233 = arith.constant 0 : index
    %844 = memref.load %arg3[%843, %c0_233] : memref<8x7xi32, #tpu.memory_space<smem>>
    %845 = arith.index_cast %arg0 : i32 to index
    %c0_234 = arith.constant 0 : index
    %846 = memref.load %arg4[%845, %c0_234] : memref<8x7xi32, #tpu.memory_space<smem>>
    %847 = vector.broadcast %844 : i32 to vector<8x16xi32>
    %848 = arith.cmpi sge, %2, %847 : vector<8x16xi32>
    %849 = vector.broadcast %846 : i32 to vector<8x16xi32>
    %850 = arith.cmpi slt, %2, %849 : vector<8x16xi32>
    %851 = arith.andi %848, %850 : vector<8x16xi1>
    %cst_235 = arith.constant -1.000000e+30 : f32
    %852 = vector.broadcast %cst_235 : f32 to vector<8x16xf32>
    %853 = arith.select %851, %842, %852 : vector<8x16xi1>, vector<8x16xf32>
    %cst_236 = arith.constant dense<0xFF800000> : vector<16xf32>
    %854 = vector.multi_reduction <maximumf>, %853, %cst_236 [0] : vector<8x16xf32> to vector<16xf32>
    %855 = vector.shape_cast %854 : vector<16xf32> to vector<1x16xf32>
    %856 = arith.cmpi sle, %834, %832 : i32
    %857 = arith.cmpi sle, %846, %844 : i32
    %858 = arith.ori %856, %857 : i1
    %cst_237 = arith.constant 0.000000e+00 : f32
    %859 = vector.broadcast %cst_237 : f32 to vector<1x16xf32>
    %860 = arith.select %858, %859, %855 : vector<1x16xf32>
    %861 = arith.index_cast %arg0 : i32 to index
    %c1_238 = arith.constant 1 : index
    %862 = memref.load %arg3[%861, %c1_238] : memref<8x7xi32, #tpu.memory_space<smem>>
    %863 = arith.index_cast %arg0 : i32 to index
    %c1_239 = arith.constant 1 : index
    %864 = memref.load %arg4[%863, %c1_239] : memref<8x7xi32, #tpu.memory_space<smem>>
    %865 = vector.broadcast %862 : i32 to vector<8x16xi32>
    %866 = arith.cmpi sge, %2, %865 : vector<8x16xi32>
    %867 = vector.broadcast %864 : i32 to vector<8x16xi32>
    %868 = arith.cmpi slt, %2, %867 : vector<8x16xi32>
    %869 = arith.andi %866, %868 : vector<8x16xi1>
    %cst_240 = arith.constant -1.000000e+30 : f32
    %870 = vector.broadcast %cst_240 : f32 to vector<8x16xf32>
    %871 = arith.select %869, %842, %870 : vector<8x16xi1>, vector<8x16xf32>
    %cst_241 = arith.constant dense<0xFF800000> : vector<16xf32>
    %872 = vector.multi_reduction <maximumf>, %871, %cst_241 [0] : vector<8x16xf32> to vector<16xf32>
    %873 = vector.shape_cast %872 : vector<16xf32> to vector<1x16xf32>
    %874 = arith.cmpi sle, %834, %832 : i32
    %875 = arith.cmpi sle, %864, %862 : i32
    %876 = arith.ori %874, %875 : i1
    %cst_242 = arith.constant 0.000000e+00 : f32
    %877 = vector.broadcast %cst_242 : f32 to vector<1x16xf32>
    %878 = arith.select %876, %877, %873 : vector<1x16xf32>
    %879 = arith.index_cast %arg0 : i32 to index
    %c2_243 = arith.constant 2 : index
    %880 = memref.load %arg3[%879, %c2_243] : memref<8x7xi32, #tpu.memory_space<smem>>
    %881 = arith.index_cast %arg0 : i32 to index
    %c2_244 = arith.constant 2 : index
    %882 = memref.load %arg4[%881, %c2_244] : memref<8x7xi32, #tpu.memory_space<smem>>
    %883 = vector.broadcast %880 : i32 to vector<8x16xi32>
    %884 = arith.cmpi sge, %2, %883 : vector<8x16xi32>
    %885 = vector.broadcast %882 : i32 to vector<8x16xi32>
    %886 = arith.cmpi slt, %2, %885 : vector<8x16xi32>
    %887 = arith.andi %884, %886 : vector<8x16xi1>
    %cst_245 = arith.constant -1.000000e+30 : f32
    %888 = vector.broadcast %cst_245 : f32 to vector<8x16xf32>
    %889 = arith.select %887, %842, %888 : vector<8x16xi1>, vector<8x16xf32>
    %cst_246 = arith.constant dense<0xFF800000> : vector<16xf32>
    %890 = vector.multi_reduction <maximumf>, %889, %cst_246 [0] : vector<8x16xf32> to vector<16xf32>
    %891 = vector.shape_cast %890 : vector<16xf32> to vector<1x16xf32>
    %892 = arith.cmpi sle, %834, %832 : i32
    %893 = arith.cmpi sle, %882, %880 : i32
    %894 = arith.ori %892, %893 : i1
    %cst_247 = arith.constant 0.000000e+00 : f32
    %895 = vector.broadcast %cst_247 : f32 to vector<1x16xf32>
    %896 = arith.select %894, %895, %891 : vector<1x16xf32>
    %897 = arith.index_cast %arg0 : i32 to index
    %c3_248 = arith.constant 3 : index
    %898 = memref.load %arg3[%897, %c3_248] : memref<8x7xi32, #tpu.memory_space<smem>>
    %899 = arith.index_cast %arg0 : i32 to index
    %c3_249 = arith.constant 3 : index
    %900 = memref.load %arg4[%899, %c3_249] : memref<8x7xi32, #tpu.memory_space<smem>>
    %901 = vector.broadcast %898 : i32 to vector<8x16xi32>
    %902 = arith.cmpi sge, %2, %901 : vector<8x16xi32>
    %903 = vector.broadcast %900 : i32 to vector<8x16xi32>
    %904 = arith.cmpi slt, %2, %903 : vector<8x16xi32>
    %905 = arith.andi %902, %904 : vector<8x16xi1>
    %cst_250 = arith.constant -1.000000e+30 : f32
    %906 = vector.broadcast %cst_250 : f32 to vector<8x16xf32>
    %907 = arith.select %905, %842, %906 : vector<8x16xi1>, vector<8x16xf32>
    %cst_251 = arith.constant dense<0xFF800000> : vector<16xf32>
    %908 = vector.multi_reduction <maximumf>, %907, %cst_251 [0] : vector<8x16xf32> to vector<16xf32>
    %909 = vector.shape_cast %908 : vector<16xf32> to vector<1x16xf32>
    %910 = arith.cmpi sle, %834, %832 : i32
    %911 = arith.cmpi sle, %900, %898 : i32
    %912 = arith.ori %910, %911 : i1
    %cst_252 = arith.constant 0.000000e+00 : f32
    %913 = vector.broadcast %cst_252 : f32 to vector<1x16xf32>
    %914 = arith.select %912, %913, %909 : vector<1x16xf32>
    %915 = arith.index_cast %arg0 : i32 to index
    %c4_253 = arith.constant 4 : index
    %916 = memref.load %arg3[%915, %c4_253] : memref<8x7xi32, #tpu.memory_space<smem>>
    %917 = arith.index_cast %arg0 : i32 to index
    %c4_254 = arith.constant 4 : index
    %918 = memref.load %arg4[%917, %c4_254] : memref<8x7xi32, #tpu.memory_space<smem>>
    %919 = vector.broadcast %916 : i32 to vector<8x16xi32>
    %920 = arith.cmpi sge, %2, %919 : vector<8x16xi32>
    %921 = vector.broadcast %918 : i32 to vector<8x16xi32>
    %922 = arith.cmpi slt, %2, %921 : vector<8x16xi32>
    %923 = arith.andi %920, %922 : vector<8x16xi1>
    %cst_255 = arith.constant -1.000000e+30 : f32
    %924 = vector.broadcast %cst_255 : f32 to vector<8x16xf32>
    %925 = arith.select %923, %842, %924 : vector<8x16xi1>, vector<8x16xf32>
    %cst_256 = arith.constant dense<0xFF800000> : vector<16xf32>
    %926 = vector.multi_reduction <maximumf>, %925, %cst_256 [0] : vector<8x16xf32> to vector<16xf32>
    %927 = vector.shape_cast %926 : vector<16xf32> to vector<1x16xf32>
    %928 = arith.cmpi sle, %834, %832 : i32
    %929 = arith.cmpi sle, %918, %916 : i32
    %930 = arith.ori %928, %929 : i1
    %cst_257 = arith.constant 0.000000e+00 : f32
    %931 = vector.broadcast %cst_257 : f32 to vector<1x16xf32>
    %932 = arith.select %930, %931, %927 : vector<1x16xf32>
    %933 = arith.index_cast %arg0 : i32 to index
    %c5_258 = arith.constant 5 : index
    %934 = memref.load %arg3[%933, %c5_258] : memref<8x7xi32, #tpu.memory_space<smem>>
    %935 = arith.index_cast %arg0 : i32 to index
    %c5_259 = arith.constant 5 : index
    %936 = memref.load %arg4[%935, %c5_259] : memref<8x7xi32, #tpu.memory_space<smem>>
    %937 = vector.broadcast %934 : i32 to vector<8x16xi32>
    %938 = arith.cmpi sge, %2, %937 : vector<8x16xi32>
    %939 = vector.broadcast %936 : i32 to vector<8x16xi32>
    %940 = arith.cmpi slt, %2, %939 : vector<8x16xi32>
    %941 = arith.andi %938, %940 : vector<8x16xi1>
    %cst_260 = arith.constant -1.000000e+30 : f32
    %942 = vector.broadcast %cst_260 : f32 to vector<8x16xf32>
    %943 = arith.select %941, %842, %942 : vector<8x16xi1>, vector<8x16xf32>
    %cst_261 = arith.constant dense<0xFF800000> : vector<16xf32>
    %944 = vector.multi_reduction <maximumf>, %943, %cst_261 [0] : vector<8x16xf32> to vector<16xf32>
    %945 = vector.shape_cast %944 : vector<16xf32> to vector<1x16xf32>
    %946 = arith.cmpi sle, %834, %832 : i32
    %947 = arith.cmpi sle, %936, %934 : i32
    %948 = arith.ori %946, %947 : i1
    %cst_262 = arith.constant 0.000000e+00 : f32
    %949 = vector.broadcast %cst_262 : f32 to vector<1x16xf32>
    %950 = arith.select %948, %949, %945 : vector<1x16xf32>
    %951 = arith.index_cast %arg0 : i32 to index
    %c6_263 = arith.constant 6 : index
    %952 = memref.load %arg3[%951, %c6_263] : memref<8x7xi32, #tpu.memory_space<smem>>
    %953 = arith.index_cast %arg0 : i32 to index
    %c6_264 = arith.constant 6 : index
    %954 = memref.load %arg4[%953, %c6_264] : memref<8x7xi32, #tpu.memory_space<smem>>
    %955 = vector.broadcast %952 : i32 to vector<8x16xi32>
    %956 = arith.cmpi sge, %2, %955 : vector<8x16xi32>
    %957 = vector.broadcast %954 : i32 to vector<8x16xi32>
    %958 = arith.cmpi slt, %2, %957 : vector<8x16xi32>
    %959 = arith.andi %956, %958 : vector<8x16xi1>
    %cst_265 = arith.constant -1.000000e+30 : f32
    %960 = vector.broadcast %cst_265 : f32 to vector<8x16xf32>
    %961 = arith.select %959, %842, %960 : vector<8x16xi1>, vector<8x16xf32>
    %cst_266 = arith.constant dense<0xFF800000> : vector<16xf32>
    %962 = vector.multi_reduction <maximumf>, %961, %cst_266 [0] : vector<8x16xf32> to vector<16xf32>
    %963 = vector.shape_cast %962 : vector<16xf32> to vector<1x16xf32>
    %964 = arith.cmpi sle, %834, %832 : i32
    %965 = arith.cmpi sle, %954, %952 : i32
    %966 = arith.ori %964, %965 : i1
    %cst_267 = arith.constant 0.000000e+00 : f32
    %967 = vector.broadcast %cst_267 : f32 to vector<1x16xf32>
    %968 = arith.select %966, %967, %963 : vector<1x16xf32>
    %969 = tpu.concatenate %32, %50, %68, %86, %104, %122, %140, %170, %188, %206, %224, %242, %260, %278, %308, %326 in 0 : vector<1x16xf32>, vector<1x16xf32>, vector<1x16xf32>, vector<1x16xf32>, vector<1x16xf32>, vector<1x16xf32>, vector<1x16xf32>, vector<1x16xf32>, vector<1x16xf32>, vector<1x16xf32>, vector<1x16xf32>, vector<1x16xf32>, vector<1x16xf32>, vector<1x16xf32>, vector<1x16xf32>, vector<1x16xf32> -> vector<16x16xf32>
    %970 = tpu.concatenate %344, %362, %380, %398, %416, %446, %464, %482, %500, %518, %536, %554, %584, %602, %620, %638 in 0 : vector<1x16xf32>, vector<1x16xf32>, vector<1x16xf32>, vector<1x16xf32>, vector<1x16xf32>, vector<1x16xf32>, vector<1x16xf32>, vector<1x16xf32>, vector<1x16xf32>, vector<1x16xf32>, vector<1x16xf32>, vector<1x16xf32>, vector<1x16xf32>, vector<1x16xf32>, vector<1x16xf32>, vector<1x16xf32> -> vector<16x16xf32>
    %971 = tpu.concatenate %656, %674, %692, %722, %740, %758, %776, %794, %812, %830, %860, %878, %896, %914, %932, %950 in 0 : vector<1x16xf32>, vector<1x16xf32>, vector<1x16xf32>, vector<1x16xf32>, vector<1x16xf32>, vector<1x16xf32>, vector<1x16xf32>, vector<1x16xf32>, vector<1x16xf32>, vector<1x16xf32>, vector<1x16xf32>, vector<1x16xf32>, vector<1x16xf32>, vector<1x16xf32>, vector<1x16xf32>, vector<1x16xf32> -> vector<16x16xf32>
    %972 = tpu.concatenate %969, %970, %971, %968 in 0 : vector<16x16xf32>, vector<16x16xf32>, vector<16x16xf32>, vector<1x16xf32> -> vector<49x16xf32>
    %973 = vector.shape_cast %972 : vector<49x16xf32> to vector<1x49x16xf32>
    %c0_268 = arith.constant 0 : index
    %c0_269 = arith.constant 0 : index
    %c0_270 = arith.constant 0 : index
    %974 = vector.load %arg6[%c0_268, %c0_269, %c0_270] : memref<1x49x16xf32, #tpu.memory_space<vmem>>, vector<1x49x16xf32>
    tpu.vector_store %arg6[%c0_268, %c0_269, %c0_270], %973 {strides = array<i32>} : memref<1x49x16xf32, #tpu.memory_space<vmem>>, vector<1x49x16xf32>,
    return
  }
  func.func @transform_0(%arg0: i32, %arg1: memref<8x7xi32, #tpu.memory_space<smem>>, %arg2: memref<8x7xi32, #tpu.memory_space<smem>>, %arg3: memref<8x7xi32, #tpu.memory_space<smem>>, %arg4: memref<8x7xi32, #tpu.memory_space<smem>>) -> (i32, i32, i32) {
    %c0_i32 = arith.constant 0 : i32
    %c0_i32_0 = arith.constant 0 : i32
    %c0_i32_1 = arith.constant 0 : i32
    %c0_i32_2 = arith.constant 0 : i32
    return %c0_i32, %c0_i32_0, %c0_i32_1 : i32, i32, i32
  }
  func.func @transform_1(%arg0: i32, %arg1: memref<8x7xi32, #tpu.memory_space<smem>>, %arg2: memref<8x7xi32, #tpu.memory_space<smem>>, %arg3: memref<8x7xi32, #tpu.memory_space<smem>>, %arg4: memref<8x7xi32, #tpu.memory_space<smem>>) -> (i32, i32, i32) {
    %c0_i32 = arith.constant 0 : i32
    %c0_i32_0 = arith.constant 0 : i32
    %c0_i32_1 = arith.constant 0 : i32
    return %arg0, %c0_i32, %c0_i32_0 : i32, i32, i32
  }
}

module attributes {stable_mosaic.version = 11 : i64} {
  func.func @_matmul_kernel(%arg0: i32, %arg1: i32, %arg2: i32, %arg3: memref<8x512xbf16, #tpu.memory_space<vmem>>, %arg4: memref<512x128xbf16, #tpu.memory_space<vmem>>, %arg5: memref<1x128xf32, #tpu.memory_space<vmem>>, %arg6: memref<8x128xbf16, #tpu.memory_space<vmem>>, %arg7: memref<8x128xf32, #tpu.memory_space<vmem>>) attributes {dimension_semantics = [#tpu.dimension_semantics<parallel>, #tpu.dimension_semantics<parallel>, #tpu.dimension_semantics<arbitrary>], iteration_bounds = array<i64: 1, 1, 2>, scalar_prefetch = 0 : i64, scratch_operands = 1 : i64, tpu.core_type = #tpu.core_type<tc>, window_params = [{transform_indices = @transform_0, window_bounds = array<i64: 8, 512>}, {transform_indices = @transform_1, window_bounds = array<i64: 512, 128>}, {transform_indices = @transform_2, window_bounds = array<i64: 1, 128>}, {transform_indices = @transform_3, window_bounds = array<i64: 8, 128>}]} {
    %c0_i32 = arith.constant 0 : i32
    %0 = arith.cmpi eq, %arg2, %c0_i32 : i32
    %1 = arith.extui %0 : i1 to i32
    %c0_i32_0 = arith.constant 0 : i32
    %2 = arith.cmpi ne, %1, %c0_i32_0 : i32
    scf.if %2 {
      %cst_9 = arith.constant 0.000000e+00 : f32
      %12 = vector.broadcast %cst_9 : f32 to vector<8x128xf32>
      %c0_10 = arith.constant 0 : index
      %c0_11 = arith.constant 0 : index
      %13 = vector.load %arg7[%c0_10, %c0_11] : memref<8x128xf32, #tpu.memory_space<vmem>>, vector<8x128xf32>
      tpu.vector_store %arg7[%c0_10, %c0_11], %12 {strides = array<i32>} : memref<8x128xf32, #tpu.memory_space<vmem>>, vector<8x128xf32>,
    } else {
    }
    %c0 = arith.constant 0 : index
    %c0_1 = arith.constant 0 : index
    %3 = vector.load %arg7[%c0, %c0_1] : memref<8x128xf32, #tpu.memory_space<vmem>>, vector<8x128xf32>
    %c0_2 = arith.constant 0 : index
    %c0_3 = arith.constant 0 : index
    %4 = vector.load %arg3[%c0_2, %c0_3] : memref<8x512xbf16, #tpu.memory_space<vmem>>, vector<8x512xbf16>
    %c0_4 = arith.constant 0 : index
    %c0_5 = arith.constant 0 : index
    %5 = vector.load %arg4[%c0_4, %c0_5] : memref<512x128xbf16, #tpu.memory_space<vmem>>, vector<512x128xbf16>
    %cst = arith.constant dense<0.000000e+00> : vector<8x128xf32>
    %6 = tpu.matmul %4, %5, %cst {dimension_numbers = #tpu.dot_dimension_numbers<[1], [0], [0], [1], [0, 0, 1, 1], [], []>} : vector<8x512xbf16>, vector<512x128xbf16>, vector<8x128xf32> -> vector<8x128xf32>
    %7 = arith.addf %3, %6 : vector<8x128xf32>
    %c0_6 = arith.constant 0 : index
    %c0_7 = arith.constant 0 : index
    %8 = vector.load %arg7[%c0_6, %c0_7] : memref<8x128xf32, #tpu.memory_space<vmem>>, vector<8x128xf32>
    tpu.vector_store %arg7[%c0_6, %c0_7], %7 {strides = array<i32>} : memref<8x128xf32, #tpu.memory_space<vmem>>, vector<8x128xf32>,
    %c1_i32 = arith.constant 1 : i32
    %9 = arith.cmpi eq, %arg2, %c1_i32 : i32
    %10 = arith.extui %9 : i1 to i32
    %c0_i32_8 = arith.constant 0 : i32
    %11 = arith.cmpi ne, %10, %c0_i32_8 : i32
    scf.if %11 {
      %c0_9 = arith.constant 0 : index
      %c0_10 = arith.constant 0 : index
      %12 = vector.load %arg7[%c0_9, %c0_10] : memref<8x128xf32, #tpu.memory_space<vmem>>, vector<8x128xf32>
      %c0_11 = arith.constant 0 : index
      %c0_12 = arith.constant 0 : index
      %13 = vector.load %arg5[%c0_11, %c0_12] : memref<1x128xf32, #tpu.memory_space<vmem>>, vector<1x128xf32>
      %14 = vector.broadcast %13 : vector<1x128xf32> to vector<8x128xf32>
      %15 = arith.addf %12, %14 : vector<8x128xf32>
      %cst_13 = arith.constant 0.000000e+00 : f32
      %16 = vector.broadcast %cst_13 : f32 to vector<8x128xf32>
      %17 = arith.maximumf %15, %16 : vector<8x128xf32>
      %18 = arith.truncf %17 : vector<8x128xf32> to vector<8x128xbf16>
      %c0_14 = arith.constant 0 : index
      %c0_15 = arith.constant 0 : index
      %19 = vector.load %arg6[%c0_14, %c0_15] : memref<8x128xbf16, #tpu.memory_space<vmem>>, vector<8x128xbf16>
      tpu.vector_store %arg6[%c0_14, %c0_15], %18 {strides = array<i32>} : memref<8x128xbf16, #tpu.memory_space<vmem>>, vector<8x128xbf16>,
    } else {
    }
    return
  }
  func.func @transform_0(%arg0: i32, %arg1: i32, %arg2: i32) -> (i32, i32) {
    %c0_i32 = arith.constant 0 : i32
    return %arg0, %arg2 : i32, i32
  }
  func.func @transform_1(%arg0: i32, %arg1: i32, %arg2: i32) -> (i32, i32) {
    %c0_i32 = arith.constant 0 : i32
    return %arg2, %arg1 : i32, i32
  }
  func.func @transform_2(%arg0: i32, %arg1: i32, %arg2: i32) -> (i32, i32) {
    %c0_i32 = arith.constant 0 : i32
    %c0_i32_0 = arith.constant 0 : i32
    return %c0_i32, %arg1 : i32, i32
  }
  func.func @transform_3(%arg0: i32, %arg1: i32, %arg2: i32) -> (i32, i32) {
    %c0_i32 = arith.constant 0 : i32
    return %arg0, %arg1 : i32, i32
  }
}

module attributes {stable_mosaic.version = 11 : i64} {
  func.func @_matmul_kernel(%arg0: i32, %arg1: i32, %arg2: i32, %arg3: memref<8x128xbf16, #tpu.memory_space<vmem>>, %arg4: memref<128x128xbf16, #tpu.memory_space<vmem>>, %arg5: memref<1x128xf32, #tpu.memory_space<vmem>>, %arg6: memref<8x128xbf16, #tpu.memory_space<vmem>>, %arg7: memref<8x128xf32, #tpu.memory_space<vmem>>) attributes {dimension_semantics = [#tpu.dimension_semantics<parallel>, #tpu.dimension_semantics<parallel>, #tpu.dimension_semantics<arbitrary>], iteration_bounds = array<i64: 1, 1, 1>, scalar_prefetch = 0 : i64, scratch_operands = 1 : i64, tpu.core_type = #tpu.core_type<tc>, window_params = [{transform_indices = @transform_0, window_bounds = array<i64: 8, 128>}, {transform_indices = @transform_1, window_bounds = array<i64: 128, 128>}, {transform_indices = @transform_2, window_bounds = array<i64: 1, 128>}, {transform_indices = @transform_3, window_bounds = array<i64: 8, 128>}]} {
    %c0_i32 = arith.constant 0 : i32
    %0 = arith.cmpi eq, %arg2, %c0_i32 : i32
    %1 = arith.extui %0 : i1 to i32
    %c0_i32_0 = arith.constant 0 : i32
    %2 = arith.cmpi ne, %1, %c0_i32_0 : i32
    scf.if %2 {
      %cst_10 = arith.constant 0.000000e+00 : f32
      %12 = vector.broadcast %cst_10 : f32 to vector<8x128xf32>
      %c0_11 = arith.constant 0 : index
      %c0_12 = arith.constant 0 : index
      %13 = vector.load %arg7[%c0_11, %c0_12] : memref<8x128xf32, #tpu.memory_space<vmem>>, vector<8x128xf32>
      tpu.vector_store %arg7[%c0_11, %c0_12], %12 {strides = array<i32>} : memref<8x128xf32, #tpu.memory_space<vmem>>, vector<8x128xf32>,
    } else {
    }
    %c0 = arith.constant 0 : index
    %c0_1 = arith.constant 0 : index
    %3 = vector.load %arg7[%c0, %c0_1] : memref<8x128xf32, #tpu.memory_space<vmem>>, vector<8x128xf32>
    %c0_2 = arith.constant 0 : index
    %c0_3 = arith.constant 0 : index
    %4 = vector.load %arg3[%c0_2, %c0_3] : memref<8x128xbf16, #tpu.memory_space<vmem>>, vector<8x128xbf16>
    %c0_4 = arith.constant 0 : index
    %c0_5 = arith.constant 0 : index
    %5 = vector.load %arg4[%c0_4, %c0_5] : memref<128x128xbf16, #tpu.memory_space<vmem>>, vector<128x128xbf16>
    %cst = arith.constant dense<0.000000e+00> : vector<8x128xf32>
    %6 = tpu.matmul %4, %5, %cst {dimension_numbers = #tpu.dot_dimension_numbers<[1], [0], [0], [1], [0, 0, 1, 1], [], []>} : vector<8x128xbf16>, vector<128x128xbf16>, vector<8x128xf32> -> vector<8x128xf32>
    %7 = arith.addf %3, %6 : vector<8x128xf32>
    %c0_6 = arith.constant 0 : index
    %c0_7 = arith.constant 0 : index
    %8 = vector.load %arg7[%c0_6, %c0_7] : memref<8x128xf32, #tpu.memory_space<vmem>>, vector<8x128xf32>
    tpu.vector_store %arg7[%c0_6, %c0_7], %7 {strides = array<i32>} : memref<8x128xf32, #tpu.memory_space<vmem>>, vector<8x128xf32>,
    %c0_i32_8 = arith.constant 0 : i32
    %9 = arith.cmpi eq, %arg2, %c0_i32_8 : i32
    %10 = arith.extui %9 : i1 to i32
    %c0_i32_9 = arith.constant 0 : i32
    %11 = arith.cmpi ne, %10, %c0_i32_9 : i32
    scf.if %11 {
      %c0_10 = arith.constant 0 : index
      %c0_11 = arith.constant 0 : index
      %12 = vector.load %arg7[%c0_10, %c0_11] : memref<8x128xf32, #tpu.memory_space<vmem>>, vector<8x128xf32>
      %c0_12 = arith.constant 0 : index
      %c0_13 = arith.constant 0 : index
      %13 = vector.load %arg5[%c0_12, %c0_13] : memref<1x128xf32, #tpu.memory_space<vmem>>, vector<1x128xf32>
      %14 = vector.broadcast %13 : vector<1x128xf32> to vector<8x128xf32>
      %15 = arith.addf %12, %14 : vector<8x128xf32>
      %cst_14 = arith.constant 0.000000e+00 : f32
      %16 = vector.broadcast %cst_14 : f32 to vector<8x128xf32>
      %17 = arith.maximumf %15, %16 : vector<8x128xf32>
      %18 = arith.truncf %17 : vector<8x128xf32> to vector<8x128xbf16>
      %c0_15 = arith.constant 0 : index
      %c0_16 = arith.constant 0 : index
      %19 = vector.load %arg6[%c0_15, %c0_16] : memref<8x128xbf16, #tpu.memory_space<vmem>>, vector<8x128xbf16>
      tpu.vector_store %arg6[%c0_15, %c0_16], %18 {strides = array<i32>} : memref<8x128xbf16, #tpu.memory_space<vmem>>, vector<8x128xbf16>,
    } else {
    }
    return
  }
  func.func @transform_0(%arg0: i32, %arg1: i32, %arg2: i32) -> (i32, i32) {
    %c0_i32 = arith.constant 0 : i32
    return %arg0, %arg2 : i32, i32
  }
  func.func @transform_1(%arg0: i32, %arg1: i32, %arg2: i32) -> (i32, i32) {
    %c0_i32 = arith.constant 0 : i32
    return %arg2, %arg1 : i32, i32
  }
  func.func @transform_2(%arg0: i32, %arg1: i32, %arg2: i32) -> (i32, i32) {
    %c0_i32 = arith.constant 0 : i32
    %c0_i32_0 = arith.constant 0 : i32
    return %c0_i32, %arg1 : i32, i32
  }
  func.func @transform_3(%arg0: i32, %arg1: i32, %arg2: i32) -> (i32, i32) {
    %c0_i32 = arith.constant 0 : i32
    return %arg0, %arg1 : i32, i32
  }
}

module attributes {stable_mosaic.version = 11 : i64} {
  func.func @_heads_kernel(%arg0: i32, %arg1: memref<8x128xbf16, #tpu.memory_space<vmem>>, %arg2: memref<128x256xbf16, #tpu.memory_space<vmem>>, %arg3: memref<1x256xf32, #tpu.memory_space<vmem>>, %arg4: memref<8x1xf32, #tpu.memory_space<vmem>>, %arg5: memref<8x256xf32, #tpu.memory_space<vmem>>) attributes {dimension_semantics = [#tpu.dimension_semantics<arbitrary>], iteration_bounds = array<i64: 1>, scalar_prefetch = 0 : i64, scratch_operands = 0 : i64, tpu.core_type = #tpu.core_type<tc>, window_params = [{pipeline_mode = #tpu.pipeline_mode<synchronous>, transform_indices = @transform_0, window_bounds = array<i64: 8, 128>}, {pipeline_mode = #tpu.pipeline_mode<synchronous>, transform_indices = @transform_1, window_bounds = array<i64: 128, 256>}, {pipeline_mode = #tpu.pipeline_mode<synchronous>, transform_indices = @transform_2, window_bounds = array<i64: 1, 256>}, {pipeline_mode = #tpu.pipeline_mode<synchronous>, transform_indices = @transform_3, window_bounds = array<i64: 8, 1>}, {pipeline_mode = #tpu.pipeline_mode<synchronous>, transform_indices = @transform_4, window_bounds = array<i64: 8, 256>}]} {
    %c0 = arith.constant 0 : index
    %c0_0 = arith.constant 0 : index
    %0 = vector.load %arg1[%c0, %c0_0] : memref<8x128xbf16, #tpu.memory_space<vmem>>, vector<8x128xbf16>
    %c0_1 = arith.constant 0 : index
    %c0_2 = arith.constant 0 : index
    %1 = vector.load %arg2[%c0_1, %c0_2] : memref<128x256xbf16, #tpu.memory_space<vmem>>, vector<128x256xbf16>
    %cst = arith.constant dense<0.000000e+00> : vector<8x256xf32>
    %2 = tpu.matmul %0, %1, %cst {dimension_numbers = #tpu.dot_dimension_numbers<[1], [0], [0], [1], [0, 0, 1, 1], [], []>} : vector<8x128xbf16>, vector<128x256xbf16>, vector<8x256xf32> -> vector<8x256xf32>
    %c0_3 = arith.constant 0 : index
    %c0_4 = arith.constant 0 : index
    %3 = vector.load %arg3[%c0_3, %c0_4] : memref<1x256xf32, #tpu.memory_space<vmem>>, vector<1x256xf32>
    %4 = vector.broadcast %3 : vector<1x256xf32> to vector<8x256xf32>
    %5 = arith.addf %2, %4 : vector<8x256xf32>
    %c0_5 = arith.constant 0 : index
    %c0_6 = arith.constant 0 : index
    %6 = vector.load %arg4[%c0_5, %c0_6] : memref<8x1xf32, #tpu.memory_space<vmem>>, vector<8x1xf32>
    %7 = vector.extract_strided_slice %5 {offsets = [0, 0], sizes = [8, 20], strides = [1, 1]} : vector<8x256xf32> to vector<8x20xf32>
    %8 = vector.extract_strided_slice %5 {offsets = [0, 20], sizes = [8, 20], strides = [1, 1]} : vector<8x256xf32> to vector<8x20xf32>
    %cst_7 = arith.constant dense<0xFF800000> : vector<8xf32>
    %9 = vector.multi_reduction <maximumf>, %7, %cst_7 [1] : vector<8x20xf32> to vector<8xf32>
    %10 = vector.shape_cast %9 : vector<8xf32> to vector<8x1xf32>
    %11 = vector.broadcast %10 : vector<8x1xf32> to vector<8x20xf32>
    %12 = arith.subf %7, %11 : vector<8x20xf32>
    %13 = math.exp %12 : vector<8x20xf32>
    %cst_8 = arith.constant dense<0.000000e+00> : vector<8xf32>
    %14 = vector.multi_reduction <add>, %13, %cst_8 [1] : vector<8x20xf32> to vector<8xf32>
    %15 = vector.shape_cast %14 : vector<8xf32> to vector<8x1xf32>
    %16 = tpu.reciprocal %15 {approx = true} : vector<8x1xf32> -> vector<8x1xf32>
    %17 = vector.broadcast %16 : vector<8x1xf32> to vector<8x20xf32>
    %18 = arith.mulf %13, %17 : vector<8x20xf32>
    %cst_9 = arith.constant 0.000000e+00 : f32
    %19 = vector.broadcast %cst_9 : f32 to vector<8x1xf32>
    %20 = arith.cmpf ogt, %6, %19 : vector<8x1xf32>
    %cst_10 = arith.constant -1.000000e+30 : f32
    %21 = vector.shape_cast %20 : vector<8x1xi1> to vector<8x1xi1>
    %22 = vector.broadcast %21 : vector<8x1xi1> to vector<8x20xi1>
    %23 = vector.broadcast %cst_10 : f32 to vector<8x20xf32>
    %24 = arith.select %22, %8, %23 : vector<8x20xi1>, vector<8x20xf32>
    %cst_11 = arith.constant dense<0xFF800000> : vector<20xf32>
    %25 = vector.multi_reduction <maximumf>, %24, %cst_11 [0] : vector<8x20xf32> to vector<20xf32>
    %26 = vector.shape_cast %25 : vector<20xf32> to vector<1x20xf32>
    %27 = vector.broadcast %26 : vector<1x20xf32> to vector<8x20xf32>
    %28 = arith.subf %24, %27 : vector<8x20xf32>
    %29 = math.exp %28 : vector<8x20xf32>
    %30 = vector.broadcast %6 : vector<8x1xf32> to vector<8x20xf32>
    %31 = arith.mulf %29, %30 : vector<8x20xf32>
    %cst_12 = arith.constant dense<0.000000e+00> : vector<20xf32>
    %32 = vector.multi_reduction <add>, %31, %cst_12 [0] : vector<8x20xf32> to vector<20xf32>
    %33 = vector.shape_cast %32 : vector<20xf32> to vector<1x20xf32>
    %34 = tpu.reciprocal %33 {approx = true} : vector<1x20xf32> -> vector<1x20xf32>
    %35 = vector.broadcast %34 : vector<1x20xf32> to vector<8x20xf32>
    %36 = arith.mulf %31, %35 : vector<8x20xf32>
    %37 = arith.mulf %18, %36 : vector<8x20xf32>
    %38 = vector.extract_strided_slice %5 {offsets = [0, 40], sizes = [8, 21], strides = [1, 1]} : vector<8x256xf32> to vector<8x21xf32>
    %cst_13 = arith.constant dense<0xFF800000> : vector<8xf32>
    %39 = vector.multi_reduction <maximumf>, %38, %cst_13 [1] : vector<8x21xf32> to vector<8xf32>
    %40 = vector.shape_cast %39 : vector<8xf32> to vector<8x1xf32>
    %41 = vector.broadcast %40 : vector<8x1xf32> to vector<8x21xf32>
    %42 = arith.subf %38, %41 : vector<8x21xf32>
    %43 = math.exp %42 : vector<8x21xf32>
    %cst_14 = arith.constant dense<0.000000e+00> : vector<8xf32>
    %44 = vector.multi_reduction <add>, %43, %cst_14 [1] : vector<8x21xf32> to vector<8xf32>
    %45 = vector.shape_cast %44 : vector<8xf32> to vector<8x1xf32>
    %46 = tpu.reciprocal %45 {approx = true} : vector<8x1xf32> -> vector<8x1xf32>
    %47 = vector.broadcast %46 : vector<8x1xf32> to vector<8x21xf32>
    %48 = arith.mulf %43, %47 : vector<8x21xf32>
    %49 = vector.extract_strided_slice %5 {offsets = [0, 61], sizes = [8, 21], strides = [1, 1]} : vector<8x256xf32> to vector<8x21xf32>
    %cst_15 = arith.constant dense<0xFF800000> : vector<8xf32>
    %50 = vector.multi_reduction <maximumf>, %49, %cst_15 [1] : vector<8x21xf32> to vector<8xf32>
    %51 = vector.shape_cast %50 : vector<8xf32> to vector<8x1xf32>
    %52 = vector.broadcast %51 : vector<8x1xf32> to vector<8x21xf32>
    %53 = arith.subf %49, %52 : vector<8x21xf32>
    %54 = math.exp %53 : vector<8x21xf32>
    %cst_16 = arith.constant dense<0.000000e+00> : vector<8xf32>
    %55 = vector.multi_reduction <add>, %54, %cst_16 [1] : vector<8x21xf32> to vector<8xf32>
    %56 = vector.shape_cast %55 : vector<8xf32> to vector<8x1xf32>
    %57 = tpu.reciprocal %56 {approx = true} : vector<8x1xf32> -> vector<8x1xf32>
    %58 = vector.broadcast %57 : vector<8x1xf32> to vector<8x21xf32>
    %59 = arith.mulf %54, %58 : vector<8x21xf32>
    %60 = vector.extract_strided_slice %5 {offsets = [0, 82], sizes = [8, 21], strides = [1, 1]} : vector<8x256xf32> to vector<8x21xf32>
    %cst_17 = arith.constant dense<0xFF800000> : vector<8xf32>
    %61 = vector.multi_reduction <maximumf>, %60, %cst_17 [1] : vector<8x21xf32> to vector<8xf32>
    %62 = vector.shape_cast %61 : vector<8xf32> to vector<8x1xf32>
    %63 = vector.broadcast %62 : vector<8x1xf32> to vector<8x21xf32>
    %64 = arith.subf %60, %63 : vector<8x21xf32>
    %65 = math.exp %64 : vector<8x21xf32>
    %cst_18 = arith.constant dense<0.000000e+00> : vector<8xf32>
    %66 = vector.multi_reduction <add>, %65, %cst_18 [1] : vector<8x21xf32> to vector<8xf32>
    %67 = vector.shape_cast %66 : vector<8xf32> to vector<8x1xf32>
    %68 = tpu.reciprocal %67 {approx = true} : vector<8x1xf32> -> vector<8x1xf32>
    %69 = vector.broadcast %68 : vector<8x1xf32> to vector<8x21xf32>
    %70 = arith.mulf %65, %69 : vector<8x21xf32>
    %71 = vector.extract_strided_slice %5 {offsets = [0, 103], sizes = [8, 21], strides = [1, 1]} : vector<8x256xf32> to vector<8x21xf32>
    %cst_19 = arith.constant dense<0xFF800000> : vector<8xf32>
    %72 = vector.multi_reduction <maximumf>, %71, %cst_19 [1] : vector<8x21xf32> to vector<8xf32>
    %73 = vector.shape_cast %72 : vector<8xf32> to vector<8x1xf32>
    %74 = vector.broadcast %73 : vector<8x1xf32> to vector<8x21xf32>
    %75 = arith.subf %71, %74 : vector<8x21xf32>
    %76 = math.exp %75 : vector<8x21xf32>
    %cst_20 = arith.constant dense<0.000000e+00> : vector<8xf32>
    %77 = vector.multi_reduction <add>, %76, %cst_20 [1] : vector<8x21xf32> to vector<8xf32>
    %78 = vector.shape_cast %77 : vector<8xf32> to vector<8x1xf32>
    %79 = tpu.reciprocal %78 {approx = true} : vector<8x1xf32> -> vector<8x1xf32>
    %80 = vector.broadcast %79 : vector<8x1xf32> to vector<8x21xf32>
    %81 = arith.mulf %76, %80 : vector<8x21xf32>
    %82 = vector.extract_strided_slice %5 {offsets = [0, 124], sizes = [8, 84], strides = [1, 1]} : vector<8x256xf32> to vector<8x84xf32>
    %83 = tpu.concatenate %37, %48, %59, %70, %81, %82 in 1 : vector<8x20xf32>, vector<8x21xf32>, vector<8x21xf32>, vector<8x21xf32>, vector<8x21xf32>, vector<8x84xf32> -> vector<8x188xf32>
    %cst_21 = arith.constant 0.000000e+00 : f32
    %84 = vector.broadcast %cst_21 : f32 to vector<8x68xf32>
    %85 = tpu.concatenate %83, %84 in 1 : vector<8x188xf32>, vector<8x68xf32> -> vector<8x256xf32>
    %c0_22 = arith.constant 0 : index
    %c0_23 = arith.constant 0 : index
    %86 = vector.load %arg5[%c0_22, %c0_23] : memref<8x256xf32, #tpu.memory_space<vmem>>, vector<8x256xf32>
    tpu.vector_store %arg5[%c0_22, %c0_23], %85 {strides = array<i32>} : memref<8x256xf32, #tpu.memory_space<vmem>>, vector<8x256xf32>,
    return
  }
  func.func @transform_0(%arg0: i32) -> (i32, i32) {
    %c0_i32 = arith.constant 0 : i32
    %c0_i32_0 = arith.constant 0 : i32
    %c0_i32_1 = arith.constant 0 : i32
    return %c0_i32, %c0_i32_0 : i32, i32
  }
  func.func @transform_1(%arg0: i32) -> (i32, i32) {
    %c0_i32 = arith.constant 0 : i32
    %c0_i32_0 = arith.constant 0 : i32
    %c0_i32_1 = arith.constant 0 : i32
    return %c0_i32, %c0_i32_0 : i32, i32
  }
  func.func @transform_2(%arg0: i32) -> (i32, i32) {
    %c0_i32 = arith.constant 0 : i32
    %c0_i32_0 = arith.constant 0 : i32
    %c0_i32_1 = arith.constant 0 : i32
    return %c0_i32, %c0_i32_0 : i32, i32
  }
  func.func @transform_3(%arg0: i32) -> (i32, i32) {
    %c0_i32 = arith.constant 0 : i32
    %c0_i32_0 = arith.constant 0 : i32
    %c0_i32_1 = arith.constant 0 : i32
    return %c0_i32, %c0_i32_0 : i32, i32
  }
  func.func @transform_4(%arg0: i32) -> (i32, i32) {
    %c0_i32 = arith.constant 0 : i32
    %c0_i32_0 = arith.constant 0 : i32
    %c0_i32_1 = arith.constant 0 : i32
    return %c0_i32, %c0_i32_0 : i32, i32
  }
}

</mosaic_0001>

<bundles_post_ra>
// kernel: generalized_rcnn_forward.6
= control target key start
LH: loop header
LB: loop body
LE: loop exit
PB: predicated region body
PF: predicated region fallthrough
CT: control target
= control target key end

     0   :  { %s1144_s12 = smov 0   ;;  %s1146_s13 = smov 0   ;;  %s1297_s0 = inlined_call_operand.vmem [shape: bf16[1024,128], index: 0, kind: input, shape index: {}]   ;;  %s1298_s1 = inlined_call_operand.vmem [shape: bf16[128,128], index: 1, kind: input, shape index: {}]   ;;  %s1299_s2 = inlined_call_operand.vmem [shape: f32[1,128], index: 2, kind: input, shape index: {}]   ;;  %s1300_s3 = inlined_call_operand.vmem [shape: f32[1024,128], index: 3, kind: output, shape index: {}]  }
   0x1   :  { %s1148_s14 = smov 0  }
   0x2 LB: > { %s32_s15 = sadd.s32 1, %s1118_s13  ;;  %p924_p0 = scmp.ge.s32.totalorder %s1122_s14, 1  ;;  %s1122_s14 = sphi %s1148_s14, %s13_s14   ;;  %s1118_s13 = sphi %s1146_s13, %s1302_s13   ;;  %s1114_s12 = sphi %s1144_s12, %s1301_s12  }
   0x3   : > { %p34_p1 = scmp.ge.s32.totalorder %s32_s15, 4  ;;  %p188_p2 = scmp.lt.s32.totalorder %s1122_s14, 5 }
   0x5   : > { %s1304_s15 = smov (%p34_p1, %s32_s15), 0  ;;  %p189_p3 = pnand %p924_p0, %p188_p2 }
   0x6   : > { %s925_s24 = sshll.u32 (!%p189_p3), %s1114_s12, 5 }
   0x7   : > { %192 = sbr.rel (%p189_p3) target bundleno = 239 (0xef), region = 32  ;;  %p230_p4 = scmp.lt.s32.totalorder (!%p189_p3), %s925_s24, 127 }
   0xc   : > { %v1050_v0 = vld [vmem:[%s1298_s1 + $0x38] sm:$0xff]  ;;  %v1049_v1 = vld [vmem:[%s1298_s1 + $0x30] sm:$0xff]  ;;  %v1048_v2 = vld [vmem:[%s1298_s1 + $0x28] sm:$0xff]  ;;  %s1306_s24 = smov (!%p230_p4, %s925_s24), 127 }
   0xd   : > { %519 = vmatpush.bf16.msra.mxu0 %v1050_v0  ;;  %1051 = vmatpush.bf16.msra.mxu1 %v1050_v0  ;;  %v1047_v3 = vld [vmem:[%s1298_s1 + $0x20] sm:$0xff]  ;;  %v1046_v4 = vld [vmem:[%s1298_s1 + $0x18] sm:$0xff]  ;;  %v1045_v5 = vld [vmem:[%s1298_s1 + $0x10] sm:$0xff]  ;;  %s926_s4 = sshll.u32 %s1306_s24, 2  ;;  %s928_s12 = sshll.u32 %s1306_s24, 3 }
   0xe   : > { %1052 = vmatpush.bf16.msra.mxu2 %v1050_v0  ;;  %1053 = vmatpush.bf16.msra.mxu3 %v1050_v0  ;;  %v1044_v6 = vld [vmem:[%s1298_s1 + $0x8] sm:$0xff]  ;;  %v1043_v7 = vld [vmem:[%s1298_s1] sm:$0xff]  ;;  %s1195_s9 = scalar_lea.vmem %s1297_s0, %s926_s4  ;;  %s1224_s18 = scalar_lea.vmem %s1300_s3, %s928_s12 }
   0xf   : > { %v1027_v8 = vld [vmem:[%s1195_s9] sm:$0xff]  ;;  %v1028_v12 = vld [vmem:[%s1195_s9 + $0x8] sm:$0xff]  ;;  %v1029_v16 = vld [vmem:[%s1195_s9 + $0x10] sm:$0xff] }
  0x10   : > { %v1031_v9 = vld [vmem:[%s1195_s9 + $0x20] sm:$0xff]  ;;  %v1032_v13 = vld [vmem:[%s1195_s9 + $0x28] sm:$0xff]  ;;  %v1033_v17 = vld [vmem:[%s1195_s9 + $0x30] sm:$0xff] }
  0x11   : > { %520 = vmatpush.bf16.msra.mxu0 %v1049_v1  ;;  %1054 = vmatpush.bf16.msra.mxu1 %v1049_v1  ;;  %v1035_v10 = vld [vmem:[%s1195_s9 + $0x40] sm:$0xff]  ;;  %v1036_v14 = vld [vmem:[%s1195_s9 + $0x48] sm:$0xff]  ;;  %v1037_v18 = vld [vmem:[%s1195_s9 + $0x50] sm:$0xff] }
  0x12   : > { %1055 = vmatpush.bf16.msra.mxu2 %v1049_v1  ;;  %1056 = vmatpush.bf16.msra.mxu3 %v1049_v1  ;;  %v1039_v11 = vld [vmem:[%s1195_s9 + $0x60] sm:$0xff]  ;;  %v1040_v15 = vld [vmem:[%s1195_s9 + $0x68] sm:$0xff]  ;;  %v1041_v19 = vld [vmem:[%s1195_s9 + $0x70] sm:$0xff] }
  0x13   : > { %v1030_v20 = vld [vmem:[%s1195_s9 + $0x18] sm:$0xff]  ;;  %v1216_v24 = vld [vmem:[%s1299_s2] ss:$0 sm:$0xff] }
  0x14   : > { %v1034_v21 = vld [vmem:[%s1195_s9 + $0x38] sm:$0xff] }
  0x15   : > { %521 = vmatpush.bf16.msra.mxu0 %v1048_v2  ;;  %1057 = vmatpush.bf16.msra.mxu1 %v1048_v2  ;;  %v1038_v22 = vld [vmem:[%s1195_s9 + $0x58] sm:$0xff] }
  0x16   : > { %1058 = vmatpush.bf16.msra.mxu2 %v1048_v2  ;;  %1059 = vmatpush.bf16.msra.mxu3 %v1048_v2  ;;  %v1042_v23 = vld [vmem:[%s1195_s9 + $0x78] sm:$0xff] }
  0x19   : > { %522 = vmatpush.bf16.msra.mxu0 %v1047_v3  ;;  %1060 = vmatpush.bf16.msra.mxu1 %v1047_v3 }
  0x1a   : > { %1061 = vmatpush.bf16.msra.mxu2 %v1047_v3  ;;  %1062 = vmatpush.bf16.msra.mxu3 %v1047_v3 }
  0x1d   : > { %523 = vmatpush.bf16.msra.mxu0 %v1046_v4  ;;  %1063 = vmatpush.bf16.msra.mxu1 %v1046_v4 }
  0x1e   : > { %1064 = vmatpush.bf16.msra.mxu2 %v1046_v4  ;;  %1065 = vmatpush.bf16.msra.mxu3 %v1046_v4 }
  0x21   : > { %524 = vmatpush.bf16.msra.mxu0 %v1045_v5  ;;  %1066 = vmatpush.bf16.msra.mxu1 %v1045_v5 }
  0x22   : > { %1067 = vmatpush.bf16.msra.mxu2 %v1045_v5  ;;  %1068 = vmatpush.bf16.msra.mxu3 %v1045_v5 }
  0x25   : > { %525 = vmatpush.bf16.msra.mxu0 %v1044_v6  ;;  %1069 = vmatpush.bf16.msra.mxu1 %v1044_v6 }
  0x26   : > { %1070 = vmatpush.bf16.msra.mxu2 %v1044_v6  ;;  %1071 = vmatpush.bf16.msra.mxu3 %v1044_v6 }
  0x29   : > { %526 = vmatpush.bf16.msra.mxu0 %v1043_v7  ;;  %1072 = vmatpush.bf16.msra.mxu1 %v1043_v7 }
  0x2a   : > { %1073 = vmatpush.bf16.msra.mxu2 %v1043_v7  ;;  %1074 = vmatpush.bf16.msra.mxu3 %v1043_v7 }
  0x2c   : > { %527 = vmatmul.bf16.vlgmr.msra.gmra.mxu0 %v1027_v8  ;;  %547 = vmatmul.bf16.vlgmr.msra.gmra.mxu1 %v1031_v9 }
  0x2d   : > { %567 = vmatmul.bf16.vlgmr.msra.gmra.mxu2 %v1035_v10  ;;  %587 = vmatmul.bf16.vlgmr.msra.gmra.mxu3 %v1039_v11 }
  0x3c   : > { %532 = vmatmul.bf16.gmra.mxu0 %v1028_v12  ;;  %552 = vmatmul.bf16.gmra.mxu1 %v1032_v13 }
  0x3d   : > { %572 = vmatmul.bf16.gmra.mxu2 %v1036_v14  ;;  %592 = vmatmul.bf16.gmra.mxu3 %v1040_v15 }
  0x4c   : > { %537 = vmatmul.bf16.gmra.mxu0 %v1029_v16  ;;  %557 = vmatmul.bf16.gmra.mxu1 %v1033_v17 }
  0x4d   : > { %577 = vmatmul.bf16.gmra.mxu2 %v1037_v18  ;;  %597 = vmatmul.bf16.gmra.mxu3 %v1041_v19 }
  0x5c   : > { %542 = vmatmul.bf16.gmra.mxu0 %v1030_v20  ;;  %562 = vmatmul.bf16.gmra.mxu1 %v1034_v21 }
  0x5d   : > { %582 = vmatmul.bf16.gmra.mxu2 %v1038_v22  ;;  %602 = vmatmul.bf16.gmra.mxu3 %v1042_v23 }
  0xa9   : > { %v528_v25 = vpop.f32.mrf.mxu0  ;;  %v548_v26 = vpop.f32.mrf.mxu1 }
  0xaa   : > { %v711_v27 = vadd.f32 %v1216_v24, %v528_v25  ;;  %v719_v28 = vadd.f32 %v1216_v24, %v548_v26 }
  0xac   : > { %v743_v29 = vmax.f32 %v711_v27, 0.0  ;;  %v751_v30 = vmax.f32 %v719_v28, 0.0 }
  0xae   : > { %775 = vst [vmem:[%s1224_s18] sm:$0xff] %v743_v29 }
  0xaf   : > { %783 = vst [vmem:[%s1224_s18 + $0x40] sm:$0xff] %v751_v30 }
  0xb0   : > { %v568_v31 = vpop.f32.mrf.mxu2  ;;  %v588_v32 = vpop.f32.mrf.mxu3 }
  0xb1   : > { %v727_v33 = vadd.f32 %v1216_v24, %v568_v31  ;;  %v735_v34 = vadd.f32 %v1216_v24, %v588_v32  ;;  %v530_v35 = vpop.f32.mrf.mxu0  ;;  %v550_v36 = vpop.f32.mrf.mxu1 }
  0xb2   : > { %v712_v37 = vadd.f32 %v1216_v24, %v530_v35  ;;  %v720_v38 = vadd.f32 %v1216_v24, %v550_v36 }
  0xb3   : > { %v759_v39 = vmax.f32 %v727_v33, 0.0  ;;  %v767_v40 = vmax.f32 %v735_v34, 0.0 }
  0xb4   : > { %v744_v41 = vmax.f32 %v712_v37, 0.0  ;;  %v752_v42 = vmax.f32 %v720_v38, 0.0 }
  0xb5   : > { %791 = vst [vmem:[%s1224_s18 + $0x80] sm:$0xff] %v759_v39 }
  0xb6   : > { %799 = vst [vmem:[%s1224_s18 + $0xc0] sm:$0xff] %v767_v40 }
  0xb7   : > { %776 = vst [vmem:[%s1224_s18 + $0x8] sm:$0xff] %v744_v41 }
  0xb8   : > { %784 = vst [vmem:[%s1224_s18 + $0x48] sm:$0xff] %v752_v42  ;;  %v570_v43 = vpop.f32.mrf.mxu2  ;;  %v590_v44 = vpop.f32.mrf.mxu3 }
  0xb9   : > { %v728_v45 = vadd.f32 %v1216_v24, %v570_v43  ;;  %v736_v46 = vadd.f32 %v1216_v24, %v590_v44  ;;  %v533_v47 = vpop.f32.mrf.mxu0  ;;  %v553_v48 = vpop.f32.mrf.mxu1 }
  0xba   : > { %v713_v49 = vadd.f32 %v1216_v24, %v533_v47  ;;  %v721_v50 = vadd.f32 %v1216_v24, %v553_v48 }
  0xbb   : > { %v760_v51 = vmax.f32 %v728_v45, 0.0  ;;  %v768_v52 = vmax.f32 %v736_v46, 0.0 }
  0xbc   : > { %v745_v53 = vmax.f32 %v713_v49, 0.0  ;;  %v753_v54 = vmax.f32 %v721_v50, 0.0 }
  0xbd   : > { %792 = vst [vmem:[%s1224_s18 + $0x88] sm:$0xff] %v760_v51 }
  0xbe   : > { %800 = vst [vmem:[%s1224_s18 + $0xc8] sm:$0xff] %v768_v52 }
  0xbf   : > { %777 = vst [vmem:[%s1224_s18 + $0x10] sm:$0xff] %v745_v53 }
  0xc0   : > { %785 = vst [vmem:[%s1224_s18 + $0x50] sm:$0xff] %v753_v54  ;;  %v573_v55 = vpop.f32.mrf.mxu2  ;;  %v593_v56 = vpop.f32.mrf.mxu3 }
  0xc1   : > { %v729_v57 = vadd.f32 %v1216_v24, %v573_v55  ;;  %v737_v58 = vadd.f32 %v1216_v24, %v593_v56  ;;  %v535_v59 = vpop.f32.mrf.mxu0  ;;  %v555_v60 = vpop.f32.mrf.mxu1 }
  0xc2   : > { %v714_v61 = vadd.f32 %v1216_v24, %v535_v59  ;;  %v722_v62 = vadd.f32 %v1216_v24, %v555_v60 }
  0xc3   : > { %v761_v63 = vmax.f32 %v729_v57, 0.0  ;;  %v769_v0 = vmax.f32 %v737_v58, 0.0 }
  0xc4   : > { %v746_v1 = vmax.f32 %v714_v61, 0.0  ;;  %v754_v2 = vmax.f32 %v722_v62, 0.0 }
  0xc5   : > { %793 = vst [vmem:[%s1224_s18 + $0x90] sm:$0xff] %v761_v63 }
  0xc6   : > { %801 = vst [vmem:[%s1224_s18 + $0xd0] sm:$0xff] %v769_v0 }
  0xc7   : > { %778 = vst [vmem:[%s1224_s18 + $0x18] sm:$0xff] %v746_v1 }
  0xc8   : > { %786 = vst [vmem:[%s1224_s18 + $0x58] sm:$0xff] %v754_v2  ;;  %v575_v3 = vpop.f32.mrf.mxu2  ;;  %v595_v4 = vpop.f32.mrf.mxu3 }
  0xc9   : > { %v730_v5 = vadd.f32 %v1216_v24, %v575_v3  ;;  %v738_v6 = vadd.f32 %v1216_v24, %v595_v4  ;;  %v538_v7 = vpop.f32.mrf.mxu0  ;;  %v558_v8 = vpop.f32.mrf.mxu1 }
  0xca   : > { %v715_v9 = vadd.f32 %v1216_v24, %v538_v7  ;;  %v723_v10 = vadd.f32 %v1216_v24, %v558_v8 }
  0xcb   : > { %v762_v11 = vmax.f32 %v730_v5, 0.0  ;;  %v770_v12 = vmax.f32 %v738_v6, 0.0 }
  0xcc   : > { %v747_v13 = vmax.f32 %v715_v9, 0.0  ;;  %v755_v14 = vmax.f32 %v723_v10, 0.0 }
  0xcd   : > { %794 = vst [vmem:[%s1224_s18 + $0x98] sm:$0xff] %v762_v11 }
  0xce   : > { %802 = vst [vmem:[%s1224_s18 + $0xd8] sm:$0xff] %v770_v12 }
  0xcf   : > { %779 = vst [vmem:[%s1224_s18 + $0x20] sm:$0xff] %v747_v13 }
  0xd0   : > { %787 = vst [vmem:[%s1224_s18 + $0x60] sm:$0xff] %v755_v14  ;;  %v578_v15 = vpop.f32.mrf.mxu2  ;;  %v598_v16 = vpop.f32.mrf.mxu3 }
  0xd1   : > { %v731_v17 = vadd.f32 %v1216_v24, %v578_v15  ;;  %v739_v18 = vadd.f32 %v1216_v24, %v598_v16  ;;  %v540_v19 = vpop.f32.mrf.mxu0  ;;  %v560_v20 = vpop.f32.mrf.mxu1 }
  0xd2   : > { %v716_v21 = vadd.f32 %v1216_v24, %v540_v19  ;;  %v724_v22 = vadd.f32 %v1216_v24, %v560_v20 }
  0xd3   : > { %v763_v23 = vmax.f32 %v731_v17, 0.0  ;;  %v771_v25 = vmax.f32 %v739_v18, 0.0 }
  0xd4   : > { %v748_v26 = vmax.f32 %v716_v21, 0.0  ;;  %v756_v27 = vmax.f32 %v724_v22, 0.0 }
  0xd5   : > { %795 = vst [vmem:[%s1224_s18 + $0xa0] sm:$0xff] %v763_v23 }
  0xd6   : > { %803 = vst [vmem:[%s1224_s18 + $0xe0] sm:$0xff] %v771_v25 }
  0xd7   : > { %780 = vst [vmem:[%s1224_s18 + $0x28] sm:$0xff] %v748_v26 }
  0xd8   : > { %788 = vst [vmem:[%s1224_s18 + $0x68] sm:$0xff] %v756_v27  ;;  %v580_v28 = vpop.f32.mrf.mxu2  ;;  %v600_v29 = vpop.f32.mrf.mxu3 }
  0xd9   : > { %v732_v30 = vadd.f32 %v1216_v24, %v580_v28  ;;  %v740_v31 = vadd.f32 %v1216_v24, %v600_v29  ;;  %v543_v32 = vpop.f32.mrf.mxu0  ;;  %v563_v33 = vpop.f32.mrf.mxu1 }
  0xda   : > { %v717_v34 = vadd.f32 %v1216_v24, %v543_v32  ;;  %v725_v35 = vadd.f32 %v1216_v24, %v563_v33 }
  0xdb   : > { %v764_v36 = vmax.f32 %v732_v30, 0.0  ;;  %v772_v37 = vmax.f32 %v740_v31, 0.0 }
  0xdc   : > { %v749_v38 = vmax.f32 %v717_v34, 0.0  ;;  %v757_v39 = vmax.f32 %v725_v35, 0.0 }
  0xdd   : > { %796 = vst [vmem:[%s1224_s18 + $0xa8] sm:$0xff] %v764_v36 }
  0xde   : > { %804 = vst [vmem:[%s1224_s18 + $0xe8] sm:$0xff] %v772_v37 }
  0xdf   : > { %781 = vst [vmem:[%s1224_s18 + $0x30] sm:$0xff] %v749_v38 }
  0xe0   : > { %789 = vst [vmem:[%s1224_s18 + $0x70] sm:$0xff] %v757_v39  ;;  %v583_v40 = vpop.f32.mrf.mxu2  ;;  %v603_v41 = vpop.f32.mrf.mxu3 }
  0xe1   : > { %v733_v42 = vadd.f32 %v1216_v24, %v583_v40  ;;  %v741_v43 = vadd.f32 %v1216_v24, %v603_v41  ;;  %v545_v44 = vpop.f32.mrf.mxu0  ;;  %v565_v45 = vpop.f32.mrf.mxu1 }
  0xe2   : > { %v718_v46 = vadd.f32 %v1216_v24, %v545_v44  ;;  %v726_v47 = vadd.f32 %v1216_v24, %v565_v45 }
  0xe3   : > { %v765_v48 = vmax.f32 %v733_v42, 0.0  ;;  %v773_v49 = vmax.f32 %v741_v43, 0.0 }
  0xe4   : > { %v750_v50 = vmax.f32 %v718_v46, 0.0  ;;  %v758_v51 = vmax.f32 %v726_v47, 0.0 }
  0xe5   : > { %797 = vst [vmem:[%s1224_s18 + $0xb0] sm:$0xff] %v765_v48 }
  0xe6   : > { %805 = vst [vmem:[%s1224_s18 + $0xf0] sm:$0xff] %v773_v49 }
  0xe7   : > { %782 = vst [vmem:[%s1224_s18 + $0x38] sm:$0xff] %v750_v50 }
  0xe8   : > { %790 = vst [vmem:[%s1224_s18 + $0x78] sm:$0xff] %v758_v51  ;;  %v585_v52 = vpop.f32.mrf.mxu2  ;;  %v605_v53 = vpop.f32.mrf.mxu3 }
  0xe9   : > { %v734_v54 = vadd.f32 %v1216_v24, %v585_v52  ;;  %v742_v55 = vadd.f32 %v1216_v24, %v605_v53 }
  0xeb   : > { %v766_v56 = vmax.f32 %v734_v54, 0.0  ;;  %v774_v57 = vmax.f32 %v742_v55, 0.0 }
  0xed   : > { %798 = vst [vmem:[%s1224_s18 + $0xb8] sm:$0xff] %v766_v56 }
  0xee   : > { %806 = vst [vmem:[%s1224_s18 + $0xf8] sm:$0xff] %v774_v57 }
  0xef PF: > { %s13_s14 = sadd.s32 1, %s1122_s14   ;;  %s1301_s12 = smov %s1118_s13 }
  0xf0   : > { %p10_p5 = scmp.ge.s32.totalorder %s13_s14, 6   ;;  %s1302_s13 = smov %s1304_s15 }
  0xf2   :  { %12 = sbr.rel (!%p10_p5) target bundleno = 2 (0x2), region = 76 }

// kernel: generalized_rcnn_forward.7
= control target key start
LH: loop header
LB: loop body
LE: loop exit
PB: predicated region body
PF: predicated region fallthrough
CT: control target
= control target key end

     0   :  { %s1433_s1 = inlined_call_operand.vmem [shape: bf16[256,128], index: 1, kind: input, shape index: {}]   ;;  %s1434_s0 = inlined_call_operand.vmem [shape: bf16[256,256], index: 0, kind: input, shape index: {}]   ;;  %s1435_s2 = inlined_call_operand.vmem [shape: f32[1,128], index: 2, kind: input, shape index: {}]   ;;  %s1436_s3 = inlined_call_operand.vmem [shape: f32[256,128], index: 3, kind: output, shape index: {}]  }
   0x1   :  { %v1014_v0 = vld [vmem:[%s1433_s1 + $0x38] sm:$0xff]  ;;  %v1013_v2 = vld [vmem:[%s1433_s1 + $0x30] sm:$0xff]  ;;  %v1012_v4 = vld [vmem:[%s1433_s1 + $0x28] sm:$0xff] }
   0x2   :  { %v1022_v1 = vld [vmem:[%s1433_s1 + $0x78] sm:$0xff]  ;;  %402 = vmatpush.bf16.msra.mxu0 %v1014_v0  ;;  %1023 = vmatpush.bf16.msra.mxu2 %v1014_v0  ;;  %v1021_v3 = vld [vmem:[%s1433_s1 + $0x70] sm:$0xff]  ;;  %v1020_v5 = vld [vmem:[%s1433_s1 + $0x68] sm:$0xff] }
   0x3   :  { %491 = vmatpush.bf16.msra.mxu1 %v1022_v1  ;;  %1031 = vmatpush.bf16.msra.mxu3 %v1022_v1  ;;  %v1011_v6 = vld [vmem:[%s1433_s1 + $0x20] sm:$0xff]  ;;  %v1010_v8 = vld [vmem:[%s1433_s1 + $0x18] sm:$0xff]  ;;  %v1009_v10 = vld [vmem:[%s1433_s1 + $0x10] sm:$0xff] }
   0x4   :  { %v1019_v7 = vld [vmem:[%s1433_s1 + $0x60] sm:$0xff]  ;;  %v1018_v9 = vld [vmem:[%s1433_s1 + $0x58] sm:$0xff]  ;;  %v1017_v11 = vld [vmem:[%s1433_s1 + $0x50] sm:$0xff] }
   0x5   :  { %v1008_v12 = vld [vmem:[%s1433_s1 + $0x8] sm:$0xff]  ;;  %v1007_v14 = vld [vmem:[%s1433_s1] sm:$0xff]  ;;  %v793_v28 = vld [vmem:[%s1434_s0 + $0x10] sm:$0xf] }
   0x6   :  { %403 = vmatpush.bf16.msra.mxu0 %v1013_v2  ;;  %1024 = vmatpush.bf16.msra.mxu2 %v1013_v2  ;;  %v1016_v13 = vld [vmem:[%s1433_s1 + $0x48] sm:$0xff]  ;;  %v1015_v15 = vld [vmem:[%s1433_s1 + $0x40] sm:$0xff]  ;;  %v978_v29 = vld [vmem:[%s1434_s0 + $0x14] sm:$0xf0] }
   0x7   :  { %492 = vmatpush.bf16.msra.mxu1 %v1021_v3  ;;  %1032 = vmatpush.bf16.msra.mxu3 %v1021_v3  ;;  %v785_v16 = vld [vmem:[%s1434_s0] sm:$0xf]  ;;  %v976_v17 = vld [vmem:[%s1434_s0 + $0x4] sm:$0xf0]  ;;  %v975_v20 = vld [vmem:[%s1434_s0 + $0x4] sm:$0xf]  ;;  %v794_v36 = vor.u32 %v978_v29, %v793_v28 }
   0x8   :  { %v849_v18 = vld [vmem:[%s1434_s0 + $0x80] sm:$0xf]  ;;  %v992_v19 = vld [vmem:[%s1434_s0 + $0x84] sm:$0xf0]  ;;  %v787_v21 = vld [vmem:[%s1434_s0 + $0x8] sm:$0xf0]  ;;  %v786_v24 = vor.u32 %v976_v17, %v785_v16 }
   0x9   :  { %v991_v22 = vld [vmem:[%s1434_s0 + $0x84] sm:$0xf]  ;;  %v851_v23 = vld [vmem:[%s1434_s0 + $0x88] sm:$0xf0]  ;;  %v850_v25 = vor.u32 %v992_v19, %v849_v18  ;;  %v790_v26 = vor.u32 %v975_v20, %v787_v21  ;;  %v857_v30 = vld [vmem:[%s1434_s0 + $0x90] sm:$0xf] }
   0xa   :  { %404 = vmatpush.bf16.msra.mxu0 %v1012_v4  ;;  %1025 = vmatpush.bf16.msra.mxu2 %v1012_v4  ;;  %v854_v27 = vor.u32 %v991_v22, %v851_v23  ;;  %v994_v31 = vld [vmem:[%s1434_s0 + $0x94] sm:$0xf0]  ;;  %v977_v32 = vld [vmem:[%s1434_s0 + $0x14] sm:$0xf]  ;;  %v795_v33 = vld [vmem:[%s1434_s0 + $0x18] sm:$0xf0] }
   0xb   :  { %493 = vmatpush.bf16.msra.mxu1 %v1020_v5  ;;  %1033 = vmatpush.bf16.msra.mxu3 %v1020_v5  ;;  %v993_v34 = vld [vmem:[%s1434_s0 + $0x94] sm:$0xf]  ;;  %v859_v35 = vld [vmem:[%s1434_s0 + $0x98] sm:$0xf0]  ;;  %v858_v37 = vor.u32 %v994_v31, %v857_v30  ;;  %v798_v38 = vor.u32 %v977_v32, %v795_v33  ;;  %v801_v40 = vld [vmem:[%s1434_s0 + $0x20] sm:$0xf] }
   0xc   :  { %v862_v39 = vor.u32 %v993_v34, %v859_v35  ;;  %v980_v41 = vld [vmem:[%s1434_s0 + $0x24] sm:$0xf0]  ;;  %v865_v42 = vld [vmem:[%s1434_s0 + $0xa0] sm:$0xf]  ;;  %v979_v44 = vld [vmem:[%s1434_s0 + $0x24] sm:$0xf] }
   0xd   :  { %v996_v43 = vld [vmem:[%s1434_s0 + $0xa4] sm:$0xf0]  ;;  %v803_v45 = vld [vmem:[%s1434_s0 + $0x28] sm:$0xf0]  ;;  %v995_v46 = vld [vmem:[%s1434_s0 + $0xa4] sm:$0xf]  ;;  %v802_v48 = vor.u32 %v980_v41, %v801_v40 }
   0xe   :  { %405 = vmatpush.bf16.msra.mxu0 %v1011_v6  ;;  %1026 = vmatpush.bf16.msra.mxu2 %v1011_v6  ;;  %v867_v47 = vld [vmem:[%s1434_s0 + $0xa8] sm:$0xf0]  ;;  %v866_v49 = vor.u32 %v996_v43, %v865_v42  ;;  %v806_v50 = vor.u32 %v979_v44, %v803_v45  ;;  %v809_v52 = vld [vmem:[%s1434_s0 + $0x30] sm:$0xf]  ;;  %v982_v53 = vld [vmem:[%s1434_s0 + $0x34] sm:$0xf0] }
   0xf   :  { %494 = vmatpush.bf16.msra.mxu1 %v1019_v7  ;;  %1034 = vmatpush.bf16.msra.mxu3 %v1019_v7  ;;  %v870_v51 = vor.u32 %v995_v46, %v867_v47  ;;  %v873_v54 = vld [vmem:[%s1434_s0 + $0xb0] sm:$0xf]  ;;  %v998_v55 = vld [vmem:[%s1434_s0 + $0xb4] sm:$0xf0]  ;;  %v981_v56 = vld [vmem:[%s1434_s0 + $0x34] sm:$0xf]  ;;  %v810_v60 = vor.u32 %v982_v53, %v809_v52 }
  0x10   :  { %v811_v57 = vld [vmem:[%s1434_s0 + $0x38] sm:$0xf0]  ;;  %v997_v58 = vld [vmem:[%s1434_s0 + $0xb4] sm:$0xf]  ;;  %v874_v61 = vor.u32 %v998_v55, %v873_v54  ;;  %v817_v0 = vld [vmem:[%s1434_s0 + $0x40] sm:$0xf] }
  0x11   :  { %v875_v59 = vld [vmem:[%s1434_s0 + $0xb8] sm:$0xf0]  ;;  %v814_v62 = vor.u32 %v981_v56, %v811_v57  ;;  %v984_v1 = vld [vmem:[%s1434_s0 + $0x44] sm:$0xf0]  ;;  %v881_v2 = vld [vmem:[%s1434_s0 + $0xc0] sm:$0xf] }
  0x12   :  { %406 = vmatpush.bf16.msra.mxu0 %v1010_v8  ;;  %1027 = vmatpush.bf16.msra.mxu2 %v1010_v8  ;;  %v878_v63 = vor.u32 %v997_v58, %v875_v59  ;;  %v1000_v3 = vld [vmem:[%s1434_s0 + $0xc4] sm:$0xf0]  ;;  %v983_v4 = vld [vmem:[%s1434_s0 + $0x44] sm:$0xf]  ;;  %v819_v5 = vld [vmem:[%s1434_s0 + $0x48] sm:$0xf0]  ;;  %v818_v8 = vor.u32 %v984_v1, %v817_v0 }
  0x13   :  { %495 = vmatpush.bf16.msra.mxu1 %v1018_v9  ;;  %1035 = vmatpush.bf16.msra.mxu3 %v1018_v9  ;;  %v999_v6 = vld [vmem:[%s1434_s0 + $0xc4] sm:$0xf]  ;;  %v883_v7 = vld [vmem:[%s1434_s0 + $0xc8] sm:$0xf0]  ;;  %v882_v9 = vor.u32 %v1000_v3, %v881_v2  ;;  %v985_v16 = vld [vmem:[%s1434_s0 + $0x54] sm:$0xf] }
  0x14   :  { %v827_v17 = vld [vmem:[%s1434_s0 + $0x58] sm:$0xf0]  ;;  %v1001_v18 = vld [vmem:[%s1434_s0 + $0xd4] sm:$0xf]  ;;  %v987_v28 = vld [vmem:[%s1434_s0 + $0x64] sm:$0xf] }
  0x15   :  { %v891_v19 = vld [vmem:[%s1434_s0 + $0xd8] sm:$0xf0]  ;;  %v830_v22 = vor.u32 %v985_v16, %v827_v17  ;;  %v835_v29 = vld [vmem:[%s1434_s0 + $0x68] sm:$0xf0]  ;;  %v1003_v30 = vld [vmem:[%s1434_s0 + $0xe4] sm:$0xf] }
  0x16   :  { %407 = vmatpush.bf16.msra.mxu0 %v1009_v10  ;;  %1028 = vmatpush.bf16.msra.mxu2 %v1009_v10  ;;  %v822_v10 = vor.u32 %v983_v4, %v819_v5  ;;  %v894_v23 = vor.u32 %v1001_v18, %v891_v19  ;;  %v899_v31 = vld [vmem:[%s1434_s0 + $0xe8] sm:$0xf0]  ;;  %v838_v34 = vor.u32 %v987_v28, %v835_v29  ;;  %v989_v40 = vld [vmem:[%s1434_s0 + $0x74] sm:$0xf]  ;;  %v843_v41 = vld [vmem:[%s1434_s0 + $0x78] sm:$0xf0] }
  0x17   :  { %496 = vmatpush.bf16.msra.mxu1 %v1017_v11  ;;  %1036 = vmatpush.bf16.msra.mxu3 %v1017_v11  ;;  %v886_v11 = vor.u32 %v999_v6, %v883_v7  ;;  %v902_v35 = vor.u32 %v1003_v30, %v899_v31  ;;  %v1005_v42 = vld [vmem:[%s1434_s0 + $0xf4] sm:$0xf]  ;;  %v907_v43 = vld [vmem:[%s1434_s0 + $0xf8] sm:$0xf0]  ;;  %v846_v46 = vor.u32 %v989_v40, %v843_v41 }
  0x18   :  { %v910_v47 = vor.u32 %v1005_v42, %v907_v43 }
  0x1a   :  { %408 = vmatpush.bf16.msra.mxu0 %v1008_v12  ;;  %1029 = vmatpush.bf16.msra.mxu2 %v1008_v12  ;;  %v825_v12 = vld [vmem:[%s1434_s0 + $0x50] sm:$0xf] }
  0x1b   :  { %497 = vmatpush.bf16.msra.mxu1 %v1016_v13  ;;  %1037 = vmatpush.bf16.msra.mxu3 %v1016_v13  ;;  %v986_v13 = vld [vmem:[%s1434_s0 + $0x54] sm:$0xf0] }
  0x1c   :  { %v826_v20 = vor.u32 %v986_v13, %v825_v12 }
  0x1e   :  { %409 = vmatpush.bf16.msra.mxu0 %v1007_v14  ;;  %1030 = vmatpush.bf16.msra.mxu2 %v1007_v14  ;;  %v889_v14 = vld [vmem:[%s1434_s0 + $0xd0] sm:$0xf] }
  0x1f   :  { %498 = vmatpush.bf16.msra.mxu1 %v1015_v15  ;;  %1038 = vmatpush.bf16.msra.mxu3 %v1015_v15  ;;  %v1002_v15 = vld [vmem:[%s1434_s0 + $0xd4] sm:$0xf0] }
  0x20   :  { %v890_v21 = vor.u32 %v1002_v15, %v889_v14 }
  0x21   :  { %410 = vmatmul.bf16.vlgmr.msra.gmra.mxu0 %v786_v24  ;;  %450 = vmatmul.bf16.vlgmr.msra.gmra.mxu2 %v850_v25  ;;  %v833_v24 = vld [vmem:[%s1434_s0 + $0x60] sm:$0xf]  ;;  %v988_v25 = vld [vmem:[%s1434_s0 + $0x64] sm:$0xf0] }
  0x22   :  { %499 = vmatmul.bf16.vlgmr.msra.gmra.mxu1 %v790_v26  ;;  %539 = vmatmul.bf16.vlgmr.msra.gmra.mxu3 %v854_v27  ;;  %v897_v26 = vld [vmem:[%s1434_s0 + $0xe0] sm:$0xf]  ;;  %v1004_v27 = vld [vmem:[%s1434_s0 + $0xe4] sm:$0xf0]  ;;  %v834_v32 = vor.u32 %v988_v25, %v833_v24 }
  0x23   :  { %v898_v33 = vor.u32 %v1004_v27, %v897_v26 }
  0x31   :  { %415 = vmatmul.bf16.gmra.mxu0 %v794_v36  ;;  %455 = vmatmul.bf16.gmra.mxu2 %v858_v37  ;;  %v841_v36 = vld [vmem:[%s1434_s0 + $0x70] sm:$0xf]  ;;  %v990_v37 = vld [vmem:[%s1434_s0 + $0x74] sm:$0xf0] }
  0x32   :  { %504 = vmatmul.bf16.gmra.mxu1 %v798_v38  ;;  %544 = vmatmul.bf16.gmra.mxu3 %v862_v39  ;;  %v905_v38 = vld [vmem:[%s1434_s0 + $0xf0] sm:$0xf]  ;;  %v1006_v39 = vld [vmem:[%s1434_s0 + $0xf4] sm:$0xf0]  ;;  %v842_v44 = vor.u32 %v990_v37, %v841_v36 }
  0x33   :  { %v906_v45 = vor.u32 %v1006_v39, %v905_v38 }
  0x41   :  { %420 = vmatmul.bf16.gmra.mxu0 %v802_v48  ;;  %460 = vmatmul.bf16.gmra.mxu2 %v866_v49  ;;  %v1303_v49 = vld [vmem:[%s1435_s2] ss:$0 sm:$0xff] }
  0x42   :  { %509 = vmatmul.bf16.gmra.mxu1 %v806_v50  ;;  %549 = vmatmul.bf16.gmra.mxu3 %v870_v51 }
  0x51   :  { %425 = vmatmul.bf16.gmra.mxu0 %v810_v60  ;;  %465 = vmatmul.bf16.gmra.mxu2 %v874_v61 }
  0x52   :  { %514 = vmatmul.bf16.gmra.mxu1 %v814_v62  ;;  %554 = vmatmul.bf16.gmra.mxu3 %v878_v63 }
  0x61   :  { %430 = vmatmul.bf16.gmra.mxu0 %v818_v8  ;;  %470 = vmatmul.bf16.gmra.mxu2 %v882_v9 }
  0x62   :  { %519 = vmatmul.bf16.gmra.mxu1 %v822_v10  ;;  %559 = vmatmul.bf16.gmra.mxu3 %v886_v11 }
  0x71   :  { %435 = vmatmul.bf16.gmra.mxu0 %v826_v20  ;;  %475 = vmatmul.bf16.gmra.mxu2 %v890_v21 }
  0x72   :  { %524 = vmatmul.bf16.gmra.mxu1 %v830_v22  ;;  %564 = vmatmul.bf16.gmra.mxu3 %v894_v23 }
  0x81   :  { %440 = vmatmul.bf16.gmra.mxu0 %v834_v32  ;;  %480 = vmatmul.bf16.gmra.mxu2 %v898_v33 }
  0x82   :  { %529 = vmatmul.bf16.gmra.mxu1 %v838_v34  ;;  %569 = vmatmul.bf16.gmra.mxu3 %v902_v35 }
  0x91   :  { %445 = vmatmul.bf16.gmra.mxu0 %v842_v44  ;;  %485 = vmatmul.bf16.gmra.mxu2 %v906_v45 }
  0x92   :  { %534 = vmatmul.bf16.gmra.mxu1 %v846_v46  ;;  %574 = vmatmul.bf16.gmra.mxu3 %v910_v47 }
  0x9e   :  { %v411_v48 = vpop.f32.mrf.mxu0 }
  0x9f   :  { %v500_v50 = vpop.f32.mrf.mxu1 }
  0xa0   :  { %v501_v51 = vadd.f32 %v500_v50, %v411_v48 }
  0xa2   :  { %v683_v52 = vadd.f32 %v1303_v49, %v501_v51 }
  0xa4   :  { %v715_v53 = vmax.f32 %v683_v52, 0.0  ;;  %v451_v54 = vpop.f32.mrf.mxu2 }
  0xa5   :  { %v540_v55 = vpop.f32.mrf.mxu3 }
  0xa6   :  { %747 = vst [vmem:[%s1436_s3] sm:$0xff] %v715_v53  ;;  %v541_v56 = vadd.f32 %v540_v55, %v451_v54  ;;  %v413_v57 = vpop.f32.mrf.mxu0 }
  0xa7   :  { %v502_v58 = vpop.f32.mrf.mxu1 }
  0xa8   :  { %v699_v59 = vadd.f32 %v1303_v49, %v541_v56  ;;  %v503_v60 = vadd.f32 %v502_v58, %v413_v57 }
  0xaa   :  { %v731_v61 = vmax.f32 %v699_v59, 0.0  ;;  %v684_v62 = vadd.f32 %v1303_v49, %v503_v60 }
  0xac   :  { %763 = vst [vmem:[%s1436_s3 + $0x80] sm:$0xff] %v731_v61  ;;  %v716_v63 = vmax.f32 %v684_v62, 0.0  ;;  %v453_v0 = vpop.f32.mrf.mxu2 }
  0xad   :  { %v542_v1 = vpop.f32.mrf.mxu3 }
  0xae   :  { %748 = vst [vmem:[%s1436_s3 + $0x8] sm:$0xff] %v716_v63  ;;  %v543_v2 = vadd.f32 %v542_v1, %v453_v0  ;;  %v416_v3 = vpop.f32.mrf.mxu0 }
  0xaf   :  { %v505_v4 = vpop.f32.mrf.mxu1 }
  0xb0   :  { %v700_v5 = vadd.f32 %v1303_v49, %v543_v2  ;;  %v506_v6 = vadd.f32 %v505_v4, %v416_v3 }
  0xb2   :  { %v732_v7 = vmax.f32 %v700_v5, 0.0  ;;  %v685_v8 = vadd.f32 %v1303_v49, %v506_v6 }
  0xb4   :  { %764 = vst [vmem:[%s1436_s3 + $0x88] sm:$0xff] %v732_v7  ;;  %v717_v9 = vmax.f32 %v685_v8, 0.0  ;;  %v456_v10 = vpop.f32.mrf.mxu2 }
  0xb5   :  { %v545_v11 = vpop.f32.mrf.mxu3 }
  0xb6   :  { %749 = vst [vmem:[%s1436_s3 + $0x10] sm:$0xff] %v717_v9  ;;  %v546_v12 = vadd.f32 %v545_v11, %v456_v10  ;;  %v418_v13 = vpop.f32.mrf.mxu0 }
  0xb7   :  { %v507_v14 = vpop.f32.mrf.mxu1 }
  0xb8   :  { %v701_v15 = vadd.f32 %v1303_v49, %v546_v12  ;;  %v508_v16 = vadd.f32 %v507_v14, %v418_v13 }
  0xba   :  { %v733_v17 = vmax.f32 %v701_v15, 0.0  ;;  %v686_v18 = vadd.f32 %v1303_v49, %v508_v16 }
  0xbc   :  { %765 = vst [vmem:[%s1436_s3 + $0x90] sm:$0xff] %v733_v17  ;;  %v718_v19 = vmax.f32 %v686_v18, 0.0  ;;  %v458_v20 = vpop.f32.mrf.mxu2 }
  0xbd   :  { %v547_v21 = vpop.f32.mrf.mxu3 }
  0xbe   :  { %750 = vst [vmem:[%s1436_s3 + $0x18] sm:$0xff] %v718_v19  ;;  %v548_v22 = vadd.f32 %v547_v21, %v458_v20  ;;  %v421_v23 = vpop.f32.mrf.mxu0 }
  0xbf   :  { %v510_v24 = vpop.f32.mrf.mxu1 }
  0xc0   :  { %v702_v25 = vadd.f32 %v1303_v49, %v548_v22  ;;  %v511_v26 = vadd.f32 %v510_v24, %v421_v23 }
  0xc2   :  { %v734_v27 = vmax.f32 %v702_v25, 0.0  ;;  %v687_v28 = vadd.f32 %v1303_v49, %v511_v26 }
  0xc4   :  { %766 = vst [vmem:[%s1436_s3 + $0x98] sm:$0xff] %v734_v27  ;;  %v719_v29 = vmax.f32 %v687_v28, 0.0  ;;  %v461_v30 = vpop.f32.mrf.mxu2 }
  0xc5   :  { %v550_v31 = vpop.f32.mrf.mxu3 }
  0xc6   :  { %751 = vst [vmem:[%s1436_s3 + $0x20] sm:$0xff] %v719_v29  ;;  %v551_v32 = vadd.f32 %v550_v31, %v461_v30  ;;  %v423_v33 = vpop.f32.mrf.mxu0 }
  0xc7   :  { %v512_v34 = vpop.f32.mrf.mxu1 }
  0xc8   :  { %v703_v35 = vadd.f32 %v1303_v49, %v551_v32  ;;  %v513_v36 = vadd.f32 %v512_v34, %v423_v33 }
  0xca   :  { %v735_v37 = vmax.f32 %v703_v35, 0.0  ;;  %v688_v38 = vadd.f32 %v1303_v49, %v513_v36 }
  0xcc   :  { %767 = vst [vmem:[%s1436_s3 + $0xa0] sm:$0xff] %v735_v37  ;;  %v720_v39 = vmax.f32 %v688_v38, 0.0  ;;  %v463_v40 = vpop.f32.mrf.mxu2 }
  0xcd   :  { %v552_v41 = vpop.f32.mrf.mxu3 }
  0xce   :  { %752 = vst [vmem:[%s1436_s3 + $0x28] sm:$0xff] %v720_v39  ;;  %v553_v42 = vadd.f32 %v552_v41, %v463_v40  ;;  %v426_v43 = vpop.f32.mrf.mxu0 }
  0xcf   :  { %v515_v44 = vpop.f32.mrf.mxu1 }
  0xd0   :  { %v704_v45 = vadd.f32 %v1303_v49, %v553_v42  ;;  %v516_v46 = vadd.f32 %v515_v44, %v426_v43 }
  0xd2   :  { %v736_v47 = vmax.f32 %v704_v45, 0.0  ;;  %v689_v48 = vadd.f32 %v1303_v49, %v516_v46 }
  0xd4   :  { %768 = vst [vmem:[%s1436_s3 + $0xa8] sm:$0xff] %v736_v47  ;;  %v721_v50 = vmax.f32 %v689_v48, 0.0  ;;  %v466_v51 = vpop.f32.mrf.mxu2 }
  0xd5   :  { %v555_v52 = vpop.f32.mrf.mxu3 }
  0xd6   :  { %753 = vst [vmem:[%s1436_s3 + $0x30] sm:$0xff] %v721_v50  ;;  %v556_v53 = vadd.f32 %v555_v52, %v466_v51  ;;  %v428_v54 = vpop.f32.mrf.mxu0 }
  0xd7   :  { %v517_v55 = vpop.f32.mrf.mxu1 }
  0xd8   :  { %v705_v56 = vadd.f32 %v1303_v49, %v556_v53  ;;  %v518_v57 = vadd.f32 %v517_v55, %v428_v54 }
  0xda   :  { %v737_v58 = vmax.f32 %v705_v56, 0.0  ;;  %v690_v59 = vadd.f32 %v1303_v49, %v518_v57 }
  0xdc   :  { %769 = vst [vmem:[%s1436_s3 + $0xb0] sm:$0xff] %v737_v58  ;;  %v722_v60 = vmax.f32 %v690_v59, 0.0  ;;  %v468_v61 = vpop.f32.mrf.mxu2 }
  0xdd   :  { %v557_v62 = vpop.f32.mrf.mxu3 }
  0xde   :  { %754 = vst [vmem:[%s1436_s3 + $0x38] sm:$0xff] %v722_v60  ;;  %v558_v63 = vadd.f32 %v557_v62, %v468_v61  ;;  %v431_v0 = vpop.f32.mrf.mxu0 }
  0xdf   :  { %v520_v1 = vpop.f32.mrf.mxu1 }
  0xe0   :  { %v706_v2 = vadd.f32 %v1303_v49, %v558_v63  ;;  %v521_v3 = vadd.f32 %v520_v1, %v431_v0 }
  0xe2   :  { %v738_v4 = vmax.f32 %v706_v2, 0.0  ;;  %v691_v5 = vadd.f32 %v1303_v49, %v521_v3 }
  0xe4   :  { %770 = vst [vmem:[%s1436_s3 + $0xb8] sm:$0xff] %v738_v4  ;;  %v723_v6 = vmax.f32 %v691_v5, 0.0  ;;  %v471_v7 = vpop.f32.mrf.mxu2 }
  0xe5   :  { %v560_v8 = vpop.f32.mrf.mxu3 }
  0xe6   :  { %755 = vst [vmem:[%s1436_s3 + $0x40] sm:$0xff] %v723_v6  ;;  %v561_v9 = vadd.f32 %v560_v8, %v471_v7  ;;  %v433_v10 = vpop.f32.mrf.mxu0 }
  0xe7   :  { %v522_v11 = vpop.f32.mrf.mxu1 }
  0xe8   :  { %v707_v12 = vadd.f32 %v1303_v49, %v561_v9  ;;  %v523_v13 = vadd.f32 %v522_v11, %v433_v10 }
  0xea   :  { %v739_v14 = vmax.f32 %v707_v12, 0.0  ;;  %v692_v15 = vadd.f32 %v1303_v49, %v523_v13 }
  0xec   :  { %771 = vst [vmem:[%s1436_s3 + $0xc0] sm:$0xff] %v739_v14  ;;  %v724_v16 = vmax.f32 %v692_v15, 0.0  ;;  %v473_v17 = vpop.f32.mrf.mxu2 }
  0xed   :  { %v562_v18 = vpop.f32.mrf.mxu3 }
  0xee   :  { %756 = vst [vmem:[%s1436_s3 + $0x48] sm:$0xff] %v724_v16  ;;  %v563_v19 = vadd.f32 %v562_v18, %v473_v17  ;;  %v436_v20 = vpop.f32.mrf.mxu0 }
  0xef   :  { %v525_v21 = vpop.f32.mrf.mxu1 }
  0xf0   :  { %v708_v22 = vadd.f32 %v1303_v49, %v563_v19  ;;  %v526_v23 = vadd.f32 %v525_v21, %v436_v20 }
  0xf2   :  { %v740_v24 = vmax.f32 %v708_v22, 0.0  ;;  %v693_v25 = vadd.f32 %v1303_v49, %v526_v23 }
  0xf4   :  { %772 = vst [vmem:[%s1436_s3 + $0xc8] sm:$0xff] %v740_v24  ;;  %v725_v26 = vmax.f32 %v693_v25, 0.0  ;;  %v476_v27 = vpop.f32.mrf.mxu2 }
  0xf5   :  { %v565_v28 = vpop.f32.mrf.mxu3 }
  0xf6   :  { %757 = vst [vmem:[%s1436_s3 + $0x50] sm:$0xff] %v725_v26  ;;  %v566_v29 = vadd.f32 %v565_v28, %v476_v27  ;;  %v438_v30 = vpop.f32.mrf.mxu0 }
  0xf7   :  { %v527_v31 = vpop.f32.mrf.mxu1 }
  0xf8   :  { %v709_v32 = vadd.f32 %v1303_v49, %v566_v29  ;;  %v528_v33 = vadd.f32 %v527_v31, %v438_v30 }
  0xfa   :  { %v741_v34 = vmax.f32 %v709_v32, 0.0  ;;  %v694_v35 = vadd.f32 %v1303_v49, %v528_v33 }
  0xfc   :  { %773 = vst [vmem:[%s1436_s3 + $0xd0] sm:$0xff] %v741_v34  ;;  %v726_v36 = vmax.f32 %v694_v35, 0.0  ;;  %v478_v37 = vpop.f32.mrf.mxu2 }
  0xfd   :  { %v567_v38 = vpop.f32.mrf.mxu3 }
  0xfe   :  { %758 = vst [vmem:[%s1436_s3 + $0x58] sm:$0xff] %v726_v36  ;;  %v568_v39 = vadd.f32 %v567_v38, %v478_v37  ;;  %v441_v40 = vpop.f32.mrf.mxu0 }
  0xff   :  { %v530_v41 = vpop.f32.mrf.mxu1 }
 0x100   :  { %v710_v42 = vadd.f32 %v1303_v49, %v568_v39  ;;  %v531_v43 = vadd.f32 %v530_v41, %v441_v40 }
 0x102   :  { %v742_v44 = vmax.f32 %v710_v42, 0.0  ;;  %v695_v45 = vadd.f32 %v1303_v49, %v531_v43 }
 0x104   :  { %774 = vst [vmem:[%s1436_s3 + $0xd8] sm:$0xff] %v742_v44  ;;  %v727_v46 = vmax.f32 %v695_v45, 0.0  ;;  %v481_v47 = vpop.f32.mrf.mxu2 }
 0x105   :  { %v570_v48 = vpop.f32.mrf.mxu3 }
 0x106   :  { %759 = vst [vmem:[%s1436_s3 + $0x60] sm:$0xff] %v727_v46  ;;  %v571_v50 = vadd.f32 %v570_v48, %v481_v47  ;;  %v443_v51 = vpop.f32.mrf.mxu0 }
 0x107   :  { %v532_v52 = vpop.f32.mrf.mxu1 }
 0x108   :  { %v711_v53 = vadd.f32 %v1303_v49, %v571_v50  ;;  %v533_v54 = vadd.f32 %v532_v52, %v443_v51 }
 0x10a   :  { %v743_v55 = vmax.f32 %v711_v53, 0.0  ;;  %v696_v56 = vadd.f32 %v1303_v49, %v533_v54 }
 0x10c   :  { %775 = vst [vmem:[%s1436_s3 + $0xe0] sm:$0xff] %v743_v55  ;;  %v728_v57 = vmax.f32 %v696_v56, 0.0  ;;  %v483_v58 = vpop.f32.mrf.mxu2 }
 0x10d   :  { %v572_v59 = vpop.f32.mrf.mxu3 }
 0x10e   :  { %760 = vst [vmem:[%s1436_s3 + $0x68] sm:$0xff] %v728_v57  ;;  %v573_v60 = vadd.f32 %v572_v59, %v483_v58  ;;  %v446_v61 = vpop.f32.mrf.mxu0 }
 0x10f   :  { %v535_v62 = vpop.f32.mrf.mxu1 }
 0x110   :  { %v712_v63 = vadd.f32 %v1303_v49, %v573_v60  ;;  %v536_v0 = vadd.f32 %v535_v62, %v446_v61 }
 0x112   :  { %v744_v1 = vmax.f32 %v712_v63, 0.0  ;;  %v697_v2 = vadd.f32 %v1303_v49, %v536_v0 }
 0x114   :  { %776 = vst [vmem:[%s1436_s3 + $0xe8] sm:$0xff] %v744_v1  ;;  %v729_v3 = vmax.f32 %v697_v2, 0.0  ;;  %v486_v4 = vpop.f32.mrf.mxu2 }
 0x115   :  { %v575_v5 = vpop.f32.mrf.mxu3 }
 0x116   :  { %761 = vst [vmem:[%s1436_s3 + $0x70] sm:$0xff] %v729_v3  ;;  %v576_v6 = vadd.f32 %v575_v5, %v486_v4  ;;  %v448_v7 = vpop.f32.mrf.mxu0 }
 0x117   :  { %v537_v8 = vpop.f32.mrf.mxu1 }
 0x118   :  { %v713_v9 = vadd.f32 %v1303_v49, %v576_v6  ;;  %v538_v10 = vadd.f32 %v537_v8, %v448_v7 }
 0x11a   :  { %v745_v11 = vmax.f32 %v713_v9, 0.0  ;;  %v698_v12 = vadd.f32 %v1303_v49, %v538_v10 }
 0x11c   :  { %777 = vst [vmem:[%s1436_s3 + $0xf0] sm:$0xff] %v745_v11  ;;  %v730_v13 = vmax.f32 %v698_v12, 0.0  ;;  %v488_v14 = vpop.f32.mrf.mxu2 }
 0x11d   :  { %v577_v15 = vpop.f32.mrf.mxu3 }
 0x11e   :  { %762 = vst [vmem:[%s1436_s3 + $0x78] sm:$0xff] %v730_v13  ;;  %v578_v16 = vadd.f32 %v577_v15, %v488_v14 }
 0x120   :  { %v714_v17 = vadd.f32 %v1303_v49, %v578_v16 }
 0x122   :  { %v746_v18 = vmax.f32 %v714_v17, 0.0 }
 0x124   :  { %778 = vst [vmem:[%s1436_s3 + $0xf8] sm:$0xff] %v746_v18 }

// kernel: generalized_rcnn_forward.10
= control target key start
LH: loop header
LB: loop body
LE: loop exit
PB: predicated region body
PF: predicated region fallthrough
CT: control target
= control target key end

     0   :  { %s210_s1 = inlined_call_operand.vmem [shape: bf16[128,128], index: 1, kind: input, shape index: {}]   ;;  %s211_s2 = inlined_call_operand.vmem [shape: f32[1,128], index: 2, kind: input, shape index: {}]   ;;  %s212_s0 = inlined_call_operand.vmem [shape: bf16[8,128], index: 0, kind: input, shape index: {}]   ;;  %s213_s3 = inlined_call_operand.vmem [shape: bf16[8,128], index: 3, kind: output, shape index: {}]  }
   0x1   :  { %v155_v0 = vld [vmem:[%s210_s1 + $0x38] sm:$0xff]  ;;  %v154_v1 = vld [vmem:[%s210_s1 + $0x30] sm:$0xff]  ;;  %v153_v2 = vld [vmem:[%s210_s1 + $0x28] sm:$0xff] }
   0x2   :  { %85 = vmatpush.bf16.msra.mxu0 %v155_v0  ;;  %v152_v3 = vld [vmem:[%s210_s1 + $0x20] sm:$0xff]  ;;  %v151_v4 = vld [vmem:[%s210_s1 + $0x18] sm:$0xff]  ;;  %v150_v5 = vld [vmem:[%s210_s1 + $0x10] sm:$0xff] }
   0x3   :  { %v149_v6 = vld [vmem:[%s210_s1 + $0x8] sm:$0xff]  ;;  %v148_v7 = vld [vmem:[%s210_s1] sm:$0xff] }
   0x4   :  { %v20_v8 = vld [vmem:[%s212_s0] sm:$0xf] }
   0x5   :  { %v156_v9 = vld [vmem:[%s211_s2] ss:$0 sm:$0xff] }
   0x6   :  { %86 = vmatpush.bf16.msra.mxu0 %v154_v1 }
   0xa   :  { %87 = vmatpush.bf16.msra.mxu0 %v153_v2 }
   0xe   :  { %88 = vmatpush.bf16.msra.mxu0 %v152_v3 }
  0x12   :  { %89 = vmatpush.bf16.msra.mxu0 %v151_v4 }
  0x16   :  { %90 = vmatpush.bf16.msra.mxu0 %v150_v5 }
  0x1a   :  { %91 = vmatpush.bf16.msra.mxu0 %v149_v6 }
  0x1e   :  { %92 = vmatpush.bf16.msra.mxu0 %v148_v7 }
  0x21   :  { %93 = vmatmul.bf16.vlgmr.msra.gmra.mxu0 %v20_v8 }
  0x9e   :  { %v94_v10 = vpop.f32.mrf.mxu0 }
  0x9f   :  { %v108_v11 = vadd.f32 %v156_v9, %v94_v10 }
  0xa1   :  { %v109_v12 = vmax.f32 %v108_v11, 0.0 }
  0xa3   :  { %v110_v13 = vpack.c.bf16 %v109_v12, %v109_v12 }
  0xa5   :  { %111 = vst [vmem:[%s213_s3] sm:$0xf] %v110_v13 }
  0xa6   :  { %v96_v14 = vpop.f32.mrf.mxu0 }

// kernel: generalized_rcnn_forward.11
= control target key start
LH: loop header
LB: loop body
LE: loop exit
PB: predicated region body
PF: predicated region fallthrough
CT: control target
= control target key end

     0   :  { %v417_v25 = vmov 0   ;;  %vm230_vm0 = vcmask 843408   ;;  %vm197_vm1 = vcmask 499008   ;;  %vm147_vm2 = vcmask 162816   ;;  %s419_s25 = smov 25   ;;  %s420_s26 = smov 67   ;;  %s617_s1 = inlined_call_operand.vmem [shape: bf16[128,256], index: 1, kind: input, shape index: {}]   ;;  %s618_s0 = inlined_call_operand.vmem [shape: bf16[8,128], index: 0, kind: input, shape index: {}]   ;;  %s619_s2 = inlined_call_operand.vmem [shape: f32[1,256], index: 2, kind: input, shape index: {}]   ;;  %s620_s3 = inlined_call_operand.vmem [shape: f32[8,1], index: 3, kind: input, shape index: {}]   ;;  %s621_s4 = inlined_call_operand.vmem [shape: f32[8,256], index: 4, kind: output, shape index: {}]  }
   0x1   :  { %v363_v0 = vld [vmem:[%s617_s1 + $0x70] sm:$0xf]  ;;  %v384_v1 = vld [vmem:[%s617_s1 + $0x74] sm:$0xf0]  ;;  %v355_v2 = vld [vmem:[%s617_s1 + $0x60] sm:$0xf]  ;;  %391 = vset.pattern.permute.xlu0 %v417_v25  ;;  %392 = vset.pattern.permute.xlu2 %v417_v25 }
   0x2   :  { %v364_v3 = vor.u32 %v384_v1, %v363_v0  ;;  %v382_v4 = vld [vmem:[%s617_s1 + $0x64] sm:$0xf0]  ;;  %v347_v6 = vld [vmem:[%s617_s1 + $0x50] sm:$0xf]  ;;  %v380_v7 = vld [vmem:[%s617_s1 + $0x54] sm:$0xf0] }
   0x3   :  { %v356_v5 = vor.u32 %v382_v4, %v355_v2  ;;  %v348_v8 = vor.u32 %v380_v7, %v347_v6  ;;  %v339_v9 = vld [vmem:[%s617_s1 + $0x40] sm:$0xf]  ;;  %v378_v10 = vld [vmem:[%s617_s1 + $0x44] sm:$0xf0]  ;;  %v331_v12 = vld [vmem:[%s617_s1 + $0x30] sm:$0xf] }
   0x4   :  { %120 = vmatpush.bf16.msra.mxu0 %v364_v3  ;;  %v340_v11 = vor.u32 %v378_v10, %v339_v9  ;;  %v376_v13 = vld [vmem:[%s617_s1 + $0x34] sm:$0xf0]  ;;  %v323_v15 = vld [vmem:[%s617_s1 + $0x20] sm:$0xf]  ;;  %v374_v16 = vld [vmem:[%s617_s1 + $0x24] sm:$0xf0] }
   0x5   :  { %v332_v14 = vor.u32 %v376_v13, %v331_v12  ;;  %v324_v17 = vor.u32 %v374_v16, %v323_v15  ;;  %v315_v18 = vld [vmem:[%s617_s1 + $0x10] sm:$0xf]  ;;  %v372_v19 = vld [vmem:[%s617_s1 + $0x14] sm:$0xf0]  ;;  %v307_v21 = vld [vmem:[%s617_s1] sm:$0xf] }
   0x6   :  { %v316_v20 = vor.u32 %v372_v19, %v315_v18  ;;  %v370_v22 = vld [vmem:[%s617_s1 + $0x4] sm:$0xf0]  ;;  %v499_v24 = vld [vmem:[%s618_s0] sm:$0xf]  ;;  %vm246_vm3 = vcmask 1015608   ;;  %vm214_vm4 = vcmask 671208  }
   0x7   :  { %v308_v23 = vor.u32 %v370_v22, %v307_v21  ;;  %v505_v26 = vld [vmem:[%s619_s2] sm:$0x3]  ;;  %s421_s27 = smov 46   ;;  %v383_v54 = vld [vmem:[%s617_s1 + $0x74] sm:$0xf]  ;;  %vm166_vm7 = vcmask 326816  }
   0x8   :  { %121 = vmatpush.bf16.msra.mxu0 %v356_v5  ;;  %v36_v27 = vperm.slane %v505_v26, 0  ;;  %v146_v36 = vld [vmem:[%s620_s3] sm:$0xff]  ;;  %s418_s3 = smov 88   ;;  %v365_v55 = vld [vmem:[%s617_s1 + $0x78] sm:$0xf0]  ;;  %vm208_vm8 = vcmask 171008  }
   0x9   :  { %vm159_vm5 = vcmp.gt.f32.partialorder %v146_v36, 0.0  ;;  %v368_v56 = vor.u32 %v383_v54, %v365_v55  ;;  %v381_v63 = vld [vmem:[%s617_s1 + $0x64] sm:$0xf]  ;;  %v357_v0 = vld [vmem:[%s617_s1 + $0x68] sm:$0xf0]  ;;  %vm297_vm9 = vcmask 490496  }
   0xa   :  { %v160_v37 = vsel %vm159_vm5, 1, %v417_v25  ;;  %v379_v1 = vld [vmem:[%s617_s1 + $0x54] sm:$0xf]  ;;  %v360_v2 = vor.u32 %v381_v63, %v357_v0  ;;  %v349_v3 = vld [vmem:[%s617_s1 + $0x58] sm:$0xf0]  ;;  %vm289_vm10 = vcmask 334848  }
   0xb   :  { %133 = vmatpush.bf16.msra.mxu1 %v368_v56  ;;  %v352_v5 = vor.u32 %v379_v1, %v349_v3  ;;  %v377_v7 = vld [vmem:[%s617_s1 + $0x44] sm:$0xf]  ;;  %v333_v12 = vld [vmem:[%s617_s1 + $0x38] sm:$0xf0]  ;;  %vm291_vm11 = vcmask 506880   ;;  %vm284_vm12 = vcmask 883712  }
   0xc   :  { %122 = vmatpush.bf16.msra.mxu0 %v348_v8  ;;  %v341_v8 = vld [vmem:[%s617_s1 + $0x48] sm:$0xf0]  ;;  %v373_v16 = vld [vmem:[%s617_s1 + $0x24] sm:$0xf]  ;;  %v317_v21 = vld [vmem:[%s617_s1 + $0x18] sm:$0xf0] }
   0xd   :  { %v344_v9 = vor.u32 %v377_v7, %v341_v8  ;;  %v369_v25 = vld [vmem:[%s617_s1 + $0x4] sm:$0xf]  ;;  %vm293_vm13 = vcmask 678912   ;;  %vm295_vm14 = vcmask 850944  }
   0xf   :  { %134 = vmatpush.bf16.msra.mxu1 %v360_v2 }
  0x10   :  { %123 = vmatpush.bf16.msra.mxu0 %v340_v11  ;;  %v375_v11 = vld [vmem:[%s617_s1 + $0x34] sm:$0xf] }
  0x11   :  { %v336_v13 = vor.u32 %v375_v11, %v333_v12 }
  0x13   :  { %135 = vmatpush.bf16.msra.mxu1 %v352_v5  ;;  %v37_v5 = vperm.slane %v505_v26, 1 }
  0x14   :  { %124 = vmatpush.bf16.msra.mxu0 %v332_v14 }
  0x17   :  { %136 = vmatpush.bf16.msra.mxu1 %v344_v9 }
  0x18   :  { %125 = vmatpush.bf16.msra.mxu0 %v324_v17  ;;  %v325_v17 = vld [vmem:[%s617_s1 + $0x28] sm:$0xf0] }
  0x19   :  { %v328_v18 = vor.u32 %v373_v16, %v325_v17 }
  0x1b   :  { %137 = vmatpush.bf16.msra.mxu1 %v336_v13 }
  0x1c   :  { %126 = vmatpush.bf16.msra.mxu0 %v316_v20  ;;  %v371_v20 = vld [vmem:[%s617_s1 + $0x14] sm:$0xf] }
  0x1d   :  { %v320_v22 = vor.u32 %v371_v20, %v317_v21 }
  0x1f   :  { %138 = vmatpush.bf16.msra.mxu1 %v328_v18 }
  0x20   :  { %127 = vmatpush.bf16.msra.mxu0 %v308_v23 }
  0x23   :  { %128 = vmatmul.bf16.vlgmr.msra.gmra.mxu0 %v499_v24  ;;  %139 = vmatpush.bf16.msra.mxu1 %v320_v22 }
  0xa0   :  { %v129_v28 = vpop.f32.mrf.mxu0 }
  0xa1   :  { %v508_v29 = vadd.f32 %v129_v28, %v36_v27  ;;  %v309_v27 = vld [vmem:[%s617_s1 + $0x8] sm:$0xf0]  ;;  %s422_s1 = smov 108  }
  0xa2   :  { %v312_v28 = vor.u32 %v369_v25, %v309_v27 }
  0xa3   :  { %v231_v30 = vsel %vm230_vm0, %v508_v29, -inf  ;;  %v198_v31 = vsel %vm197_vm1, %v508_v29, -inf  ;;  %v148_v32 = vsel %vm147_vm2, %v508_v29, -inf  ;;  %v247_v34 = vsel %vm246_vm3, %v508_v29, -inf }
  0xa4   :  { %232 = vmax.xlane.f32.xlu1 %v231_v30  ;;  %199 = vmax.xlane.f32.xlu0 %v198_v31  ;;  %v215_v35 = vsel %vm214_vm4, %v508_v29, -inf }
  0xa5   :  { %149 = vmax.xlane.f32.xlu2 %v148_v32  ;;  %140 = vmatpush.bf16.msra.mxu1 %v312_v28 }
  0xa8   :  { %v131_v33 = vpop.f32.mrf.mxu0  ;;  %141 = vmatmul.bf16.vlgmr.msra.gmra.mxu1 %v499_v24 }
  0xac   :  { %248 = vmax.xlane.f32.xlu1 %v247_v34  ;;  %216 = vmax.xlane.f32.xlu0 %v215_v35 }
  0xc0   :  { %162 = vperm.xlu0 %391, %v160_v37  }
 0x117   :  { %v233_v38 = vpop.xlane.xlu1 %232  ;;  %v200_v39 = vpop.xlane.xlu0 %199 }
 0x118   :  { %v201_v40 = vsub.f32 %v508_v29, %v200_v39  ;;  %v234_v49 = vsub.f32 %v508_v29, %v233_v38  ;;  %v150_v57 = vpop.xlane.xlu2 %149 }
 0x119   :  { %v151_v58 = vsub.f32 %v508_v29, %v150_v57 }
 0x11a   :  { %v202_v41 = vmul.f32 1.442695, %v201_v40  ;;  %v235_v50 = vmul.f32 1.442695, %v234_v49 }
 0x11b   :  { %v152_v59 = vmul.f32 1.442695, %v151_v58 }
 0x11c   :  { %393 = vpow2.f32 %v202_v41 }
 0x11f   :  { %v249_v42 = vpop.xlane.xlu1 %248  ;;  %v217_v43 = vpop.xlane.xlu0 %216 }
 0x120   :  { %v250_v44 = vsub.f32 %v508_v29, %v249_v42  ;;  %v218_v45 = vsub.f32 %v508_v29, %v217_v43 }
 0x122   :  { %v251_v46 = vmul.f32 1.442695, %v250_v44  ;;  %v219_v47 = vmul.f32 1.442695, %v218_v45  ;;  %v522_v48 = vpop.eup %393 }
 0x123   :  { %205 = vrot.lane.b32.xlu1 %v522_v48, %s418_s3 }
 0x124   :  { %395 = vpow2.f32 %v251_v46 }
 0x125   :  { %397 = vpow2.f32 %v219_v47 }
 0x126   :  { %399 = vpow2.f32 %v235_v50 }
 0x127   :  { %401 = vpow2.f32 %v152_v59 }
 0x12a   :  { %v526_v51 = vpop.eup %395 }
 0x12b   :  { %v528_v52 = vpop.eup %397  ;;  %254 = vrot.lane.b32.xlu1 %v526_v51, %s419_s25 }
 0x12c   :  { %222 = vrot.lane.b32.xlu2 %v528_v52, %s420_s26  ;;  %v532_v53 = vpop.eup %399 }
 0x12d   :  { %v542_v60 = vpop.eup %401 }
 0x12e   :  { %v154_v62 = vsel %vm147_vm2, %v542_v60, 0.0 }
 0x132   :  { %v163_v61 = vpop.permute.xlu0 %162 }
 0x133   :  { %vm164_vm6 = vcmp.eq.s32.totalorder %v163_v61, 1  ;;  %v142_v61 = vpop.f32.mrf.mxu1 }
 0x134   :  { %238 = vrot.lane.b32.xlu2 %v532_v53, %s421_s27  ;;  %v165_v4 = vsel %vm164_vm6, %v508_v29, -1e+30 }
 0x135   :  { %v167_v6 = vsel %vm166_vm7, %v165_v4, -inf }
 0x136   :  { %v168_v10 = vrot.slane %v167_v6, 4 }
 0x138   :  { %v169_v14 = vmax.f32 %v167_v6, %v168_v10 }
 0x13a   :  { %v170_v15 = vrot.slane %v169_v14, 2 }
 0x13b   :  { %v144_v63 = vpop.f32.mrf.mxu1 }
 0x13c   :  { %179 = vperm.xlu2 %392, %v146_v36   ;;  %v171_v19 = vmax.f32 %v169_v14, %v170_v15 }
 0x13e   :  { %v172_v23 = vrot.slane %v171_v19, 1 }
 0x140   :  { %v173_v30 = vmax.f32 %v171_v19, %v172_v23 }
 0x142   :  { %v174_v33 = vsub.f32 %v165_v4, %v173_v30 }
 0x144   :  { %v175_v34 = vmul.f32 1.442695, %v174_v33 }
 0x146   :  { %403 = vpow2.f32 %v175_v34 }
 0x14c   :  { %v404_v37 = vpop.eup %403 }
 0x165   :  { %155 = vadd.xlane.f32.xlu2 %v154_v62 }
 0x186   :  { %v223_v31 = vpop.permute.xlu2 %222 }
 0x187   :  { %v225_v32 = vsel %vm208_vm8, %v223_v31, 0.0 }
 0x188   :  { %226 = vadd.xlane.f32.xlu2 %v225_v32 }
 0x18e   :  { %v239_v35 = vpop.permute.xlu2 %238 }
 0x18f   :  { %v241_v36 = vsel %vm208_vm8, %v239_v35, 0.0 }
 0x195   :  { %v206_v38 = vpop.permute.xlu1 %205 }
 0x196   :  { %v180_v39 = vpop.permute.xlu2 %179  ;;  %v209_v41 = vsel %vm208_vm8, %v206_v38, 0.0 }
 0x197   :  { %v182_v40 = vmul.f32 %v404_v37, %v180_v39  ;;  %210 = vadd.xlane.f32.xlu0 %v209_v41 }
 0x199   :  { %v183_v42 = vsel %vm166_vm7, %v182_v40, 0.0 }
 0x19a   :  { %v184_v43 = vrot.slane %v183_v42, 4 }
 0x19c   :  { %v185_v24 = vadd.f32 %v184_v43, %v183_v42 }
 0x19d   :  { %v255_v45 = vpop.permute.xlu1 %254 }
 0x19e   :  { %v186_v44 = vrot.slane %v185_v24, 2  ;;  %v257_v46 = vsel %vm208_vm8, %v255_v45, 0.0 }
 0x19f   :  { %258 = vadd.xlane.f32.xlu2 %v257_v46 }
 0x1a0   :  { %v187_v47 = vadd.f32 %v186_v44, %v185_v24 }
 0x1a2   :  { %v188_v49 = vrot.slane %v187_v47, 1 }
 0x1a4   :  { %v189_v50 = vadd.f32 %v188_v49, %v187_v47 }
 0x1a6   :  { %405 = vrcp.f32 %v189_v50 }
 0x1ac   :  { %v406_v54 = vpop.eup %405 }
 0x1ad   :  { %v191_v55 = vmul.f32 %v406_v54, %v182_v40 }
 0x1af   :  { %193 = vrot.lane.b32.xlu1 %v191_v55, %s422_s1 }
 0x1d8   :  { %v156_v56 = vpop.xlane.xlu2 %155 }
 0x1d9   :  { %242 = vadd.xlane.f32.xlu1 %v241_v36 }
 0x1fb   :  { %v227_v57 = vpop.xlane.xlu2 %226 }
 0x1fc   :  { %407 = vrcp.f32 %v227_v57 }
 0x202   :  { %v408_v58 = vpop.eup %407 }
 0x203   :  { %v229_v59 = vmul.f32 %v408_v58, %v528_v52 }
 0x205   :  { %267 = vrot.lane.b32.xlu1 %v229_v59, %s422_s1 }
 0x20a   :  { %v211_v62 = vpop.xlane.xlu0 %210 }
 0x20b   :  { %409 = vrcp.f32 %v211_v62 }
 0x20d   :  { %280 = vrot.lane.b32.xlu1 %v508_v29, %s422_s1  ;;  %v143_v29 = vadd.f32 %v142_v61, %v37_v5 }
 0x211   :  { %v410_v0 = vpop.eup %409 }
 0x212   :  { %v259_v1 = vpop.xlane.xlu2 %258  ;;  %v213_v2 = vmul.f32 %v410_v0, %v522_v48 }
 0x213   :  { %411 = vrcp.f32 %v259_v1 }
 0x214   :  { %263 = vrot.lane.b32.xlu0 %v213_v2, %s422_s1  ;;  %413 = vrcp.f32 %v156_v56 }
 0x219   :  { %v412_v3 = vpop.eup %411 }
 0x21a   :  { %v261_v52 = vmul.f32 %v412_v3, %v526_v51  ;;  %v414_v4 = vpop.eup %413 }
 0x21b   :  { %v158_v6 = vmul.f32 %v414_v4, %v542_v60 }
 0x21c   :  { %275 = vrot.lane.b32.xlu0 %v261_v52, %s422_s1 }
 0x221   :  { %v194_v7 = vpop.permute.xlu1 %193 }
 0x222   :  { %v196_v8 = vmul.f32 %v194_v7, %v158_v6 }
 0x224   :  { %282 = vrot.lane.b32.xlu0 %v143_v29, %s422_s1 }
 0x24c   :  { %v243_v48 = vpop.xlane.xlu1 %242 }
 0x24d   :  { %415 = vrcp.f32 %v243_v48 }
 0x253   :  { %v416_v9 = vpop.eup %415 }
 0x254   :  { %v245_v10 = vmul.f32 %v416_v9, %v532_v53 }
 0x256   :  { %271 = vrot.lane.b32.xlu2 %v245_v10, %s422_s1 }
 0x277   :  { %v268_v26 = vpop.permute.xlu1 %267 }
 0x27f   :  { %v281_v15 = vpop.permute.xlu1 %280 }
 0x286   :  { %v264_v51 = vpop.permute.xlu0 %263 }
 0x287   :  { %v288_v60 = vsel %vm147_vm2, %v196_v8, %v264_v51 }
 0x288   :  { %v290_v14 = vsel %vm289_vm10, %v288_v60, %v268_v26 }
 0x28e   :  { %v276_v11 = vpop.permute.xlu0 %275 }
 0x296   :  { %v283_v12 = vpop.permute.xlu0 %282 }
 0x297   :  { %v298_v13 = vsel %vm297_vm9, %v283_v12, 0.0  ;;  %v285_v17 = vsel %vm284_vm12, %v281_v15, %v283_v12 }
 0x298   :  { %300 = vst [vmem:[%s621_s4 + $0x8] sm:$0xff] %v298_v13 }
 0x2b0   :  { %v272_v53 = vpop.permute.xlu2 %271 }
 0x2b1   :  { %v292_v16 = vsel %vm291_vm11, %v290_v14, %v272_v53 }
 0x2b2   :  { %v294_v18 = vsel %vm293_vm13, %v292_v16, %v276_v11 }
 0x2b3   :  { %v296_v19 = vsel %vm295_vm14, %v294_v18, %v285_v17 }
 0x2b4   :  { %299 = vst [vmem:[%s621_s4] sm:$0xff] %v296_v19 }

// kernel: generalized_rcnn_forward.9
= control target key start
LH: loop header
LB: loop body
LE: loop exit
PB: predicated region body
PF: predicated region fallthrough
CT: control target
= control target key end

     0   :  { %s954_s12 = smov 0   ;;  %s956_s13 = smov 0   ;;  %s1037_s0 = inlined_call_operand.vmem [shape: bf16[8,1024], index: 0, kind: input, shape index: {}]   ;;  %s1038_s1 = inlined_call_operand.vmem [shape: bf16[1024,128], index: 1, kind: input, shape index: {}]   ;;  %s1039_s2 = inlined_call_operand.vmem [shape: f32[1,128], index: 2, kind: input, shape index: {}]   ;;  %s1040_s3 = inlined_call_operand.vmem [shape: bf16[8,128], index: 3, kind: output, shape index: {}]  }
   0x1   :  { %s958_s14 = smov 0  }
   0x2 LB: > { %s25_s15 = sadd.s32 1, %s927_s13  ;;  %p713_p0 = scmp.ge.s32.totalorder %s931_s14, 1  ;;  %s931_s14 = sphi %s958_s14, %s13_s14   ;;  %s927_s13 = sphi %s956_s13, %s1042_s13   ;;  %s923_s12 = sphi %s954_s12, %s1041_s12  }
   0x3   : > { %p26_p1 = scmp.ge.s32.totalorder %s25_s15, 2  ;;  %p189_p2 = scmp.lt.s32.totalorder %s931_s14, 3 }
   0x5   : > { %s1044_s15 = smov (%p26_p1, %s25_s15), 0  ;;  %p190_p3 = pnand %p713_p0, %p189_p2 }
   0x6   : > { %s714_s16 = sshll.u32 (!%p190_p3), %s923_s12, 2  ;;  %s716_s17 = sshll.u32 (!%p190_p3), %s923_s12, 6 }
   0x7   : > { %193 = sbr.rel (%p190_p3) target bundleno = 209 (0xd1), region = 32  ;;  %p233_p4 = scmp.lt.s32.totalorder (!%p190_p3), %s714_s16, 7 }
   0x8   : > { %p241_p5 = scmp.lt.s32.totalorder (!%p190_p3), %s716_s17, 127  ;;  %p718_p6 = scmp.ne.s32.totalorder (!%p190_p3), %s923_s12, 0 }
   0xc   : > { %s1046_s16 = smov (!%p233_p4, %s714_s16), 7  ;;  %s1048_s17 = smov (!%p241_p5, %s716_s17), 127 }
   0xd   : > { %s715_s18 = sshll.u32 %s1046_s16, 2  ;;  %s717_s22 = sshll.u32 %s1048_s17, 2 }
   0xe   : > { %s979_s21 = scalar_lea.vmem %s1037_s0, %s715_s18  ;;  %s984_s25 = scalar_lea.vmem %s1038_s1, %s717_s22 }
   0xf   : > { %262 = sbr.rel (%p718_p6) target bundleno = 22 (0x16), region = 36 }
  0x14   : > { %v933_v0 = vmov 0.0  }
  0x15   : > { %263 = vst [vmem:[#allocation2] sm:$0xff] %v933_v0 }
  0x16 PF: > { %v858_v1 = vld [vmem:[%s984_s25 + $0x38] sm:$0xff]  ;;  %v857_v5 = vld [vmem:[%s984_s25 + $0x30] sm:$0xff]  ;;  %v856_v9 = vld [vmem:[%s984_s25 + $0x28] sm:$0xff]  ;;  %p847_p7 = scmp.ne.s32.totalorder %s923_s12, 1 }
  0x17   : > { %v866_v2 = vld [vmem:[%s984_s25 + $0x78] sm:$0xff]  ;;  %537 = vmatpush.bf16.msra.mxu0 %v858_v1  ;;  %v865_v6 = vld [vmem:[%s984_s25 + $0x70] sm:$0xff]  ;;  %v864_v10 = vld [vmem:[%s984_s25 + $0x68] sm:$0xff] }
  0x18   : > { %v874_v3 = vld [vmem:[%s984_s25 + $0xb8] sm:$0xff]  ;;  %550 = vmatpush.bf16.msra.mxu1 %v866_v2  ;;  %v873_v7 = vld [vmem:[%s984_s25 + $0xb0] sm:$0xff]  ;;  %v872_v11 = vld [vmem:[%s984_s25 + $0xa8] sm:$0xff] }
  0x19   : > { %v882_v4 = vld [vmem:[%s984_s25 + $0xf8] sm:$0xff]  ;;  %563 = vmatpush.bf16.msra.mxu2 %v874_v3  ;;  %v881_v8 = vld [vmem:[%s984_s25 + $0xf0] sm:$0xff]  ;;  %v880_v12 = vld [vmem:[%s984_s25 + $0xe8] sm:$0xff] }
  0x1a   : > { %576 = vmatpush.bf16.msra.mxu3 %v882_v4  ;;  %v855_v13 = vld [vmem:[%s984_s25 + $0x20] sm:$0xff]  ;;  %v854_v17 = vld [vmem:[%s984_s25 + $0x18] sm:$0xff]  ;;  %v853_v21 = vld [vmem:[%s984_s25 + $0x10] sm:$0xff] }
  0x1b   : > { %538 = vmatpush.bf16.msra.mxu0 %v857_v5  ;;  %v863_v14 = vld [vmem:[%s984_s25 + $0x60] sm:$0xff]  ;;  %v862_v18 = vld [vmem:[%s984_s25 + $0x58] sm:$0xff]  ;;  %v861_v22 = vld [vmem:[%s984_s25 + $0x50] sm:$0xff] }
  0x1c   : > { %551 = vmatpush.bf16.msra.mxu1 %v865_v6  ;;  %v871_v15 = vld [vmem:[%s984_s25 + $0xa0] sm:$0xff]  ;;  %v870_v19 = vld [vmem:[%s984_s25 + $0x98] sm:$0xff]  ;;  %v869_v23 = vld [vmem:[%s984_s25 + $0x90] sm:$0xff] }
  0x1d   : > { %564 = vmatpush.bf16.msra.mxu2 %v873_v7  ;;  %v879_v16 = vld [vmem:[%s984_s25 + $0xe0] sm:$0xff]  ;;  %v878_v20 = vld [vmem:[%s984_s25 + $0xd8] sm:$0xff]  ;;  %v877_v24 = vld [vmem:[%s984_s25 + $0xd0] sm:$0xff] }
  0x1e   : > { %577 = vmatpush.bf16.msra.mxu3 %v881_v8  ;;  %v852_v25 = vld [vmem:[%s984_s25 + $0x8] sm:$0xff]  ;;  %v265_v27 = vld [vmem:[%s979_s21] sm:$0xff] }
  0x1f   : > { %539 = vmatpush.bf16.msra.mxu0 %v856_v9  ;;  %v860_v26 = vld [vmem:[%s984_s25 + $0x48] sm:$0xff]  ;;  %v333_v31 = vunpack.c.l.b16 %v265_v27  ;;  %v334_v32 = vunpack.c.h.b16 %v265_v27  ;;  %v851_v33 = vld [vmem:[%s984_s25] sm:$0xff] }
  0x20   : > { %552 = vmatpush.bf16.msra.mxu1 %v864_v10  ;;  %v868_v28 = vld [vmem:[%s984_s25 + $0x88] sm:$0xff]  ;;  %v859_v34 = vld [vmem:[%s984_s25 + $0x40] sm:$0xff] }
  0x21   : > { %565 = vmatpush.bf16.msra.mxu2 %v872_v11  ;;  %v876_v29 = vld [vmem:[%s984_s25 + $0xc8] sm:$0xff]  ;;  %v867_v37 = vld [vmem:[%s984_s25 + $0x80] sm:$0xff]  ;;  %v337_v39 = vpack.c.b16 %v333_v31, %v333_v31  ;;  %v338_v40 = vpack.c.b16 %v334_v32, %v334_v32 }
  0x22   : > { %578 = vmatpush.bf16.msra.mxu3 %v880_v12  ;;  %v266_v30 = vld [vmem:[%s979_s21 + $0x8] sm:$0xff]  ;;  %v875_v38 = vld [vmem:[%s984_s25 + $0xc0] sm:$0xff] }
  0x23   : > { %540 = vmatpush.bf16.msra.mxu0 %v855_v13  ;;  %v335_v35 = vunpack.c.l.b16 %v266_v30  ;;  %v336_v36 = vunpack.c.h.b16 %v266_v30  ;;  %v264_v51 = vld [vmem:[#allocation2] sm:$0xff] }
  0x24   : > { %553 = vmatpush.bf16.msra.mxu1 %v863_v14 }
  0x25   : > { %566 = vmatpush.bf16.msra.mxu2 %v871_v15  ;;  %v339_v41 = vpack.c.b16 %v335_v35, %v335_v35  ;;  %v340_v42 = vpack.c.b16 %v336_v36, %v336_v36 }
  0x26   : > { %579 = vmatpush.bf16.msra.mxu3 %v879_v16 }
  0x27   : > { %541 = vmatpush.bf16.msra.mxu0 %v854_v17 }
  0x28   : > { %554 = vmatpush.bf16.msra.mxu1 %v862_v18 }
  0x29   : > { %567 = vmatpush.bf16.msra.mxu2 %v870_v19 }
  0x2a   : > { %580 = vmatpush.bf16.msra.mxu3 %v878_v20 }
  0x2b   : > { %542 = vmatpush.bf16.msra.mxu0 %v853_v21 }
  0x2c   : > { %555 = vmatpush.bf16.msra.mxu1 %v861_v22 }
  0x2d   : > { %568 = vmatpush.bf16.msra.mxu2 %v869_v23 }
  0x2e   : > { %581 = vmatpush.bf16.msra.mxu3 %v877_v24 }
  0x2f   : > { %543 = vmatpush.bf16.msra.mxu0 %v852_v25 }
  0x30   : > { %556 = vmatpush.bf16.msra.mxu1 %v860_v26 }
  0x31   : > { %569 = vmatpush.bf16.msra.mxu2 %v868_v28 }
  0x32   : > { %582 = vmatpush.bf16.msra.mxu3 %v876_v29 }
  0x33   : > { %544 = vmatpush.bf16.msra.mxu0 %v851_v33 }
  0x34   : > { %557 = vmatpush.bf16.msra.mxu1 %v859_v34 }
  0x35   : > { %570 = vmatpush.bf16.msra.mxu2 %v867_v37 }
  0x36   : > { %583 = vmatpush.bf16.msra.mxu3 %v875_v38  ;;  %545 = vmatmul.bf16.vlgmr.msra.gmra.mxu0 %v337_v39 }
  0x37   : > { %558 = vmatmul.bf16.vlgmr.msra.gmra.mxu1 %v338_v40 }
  0x38   : > { %571 = vmatmul.bf16.vlgmr.msra.gmra.mxu2 %v339_v41 }
  0x39   : > { %584 = vmatmul.bf16.vlgmr.msra.gmra.mxu3 %v340_v42 }
  0xb3   : > { %v546_v43 = vpop.f32.mrf.mxu0 }
  0xb4   : > { %v559_v44 = vpop.f32.mrf.mxu1 }
  0xb5   : > { %v560_v45 = vadd.f32 %v559_v44, %v546_v43 }
  0xbb   : > { %v572_v46 = vpop.f32.mrf.mxu2  ;;  %v548_v49 = vpop.f32.mrf.mxu0 }
  0xbc   : > { %v585_v47 = vpop.f32.mrf.mxu3  ;;  %v573_v48 = vadd.f32 %v572_v46, %v560_v45  ;;  %v561_v50 = vpop.f32.mrf.mxu1 }
  0xbe   : > { %v586_v52 = vadd.f32 %v585_v47, %v573_v48 }
  0xc0   : > { %v589_v53 = vadd.f32 %v586_v52, %v264_v51  ;;  %594 = sbr.rel (%p847_p7) target bundleno = 209 (0xd1), region = 40 }
  0xc2   : > { %590 = vst [vmem:[#allocation2] sm:$0xff] %v589_v53 }
  0xc3   : > { %v574_v54 = vpop.f32.mrf.mxu2 }
  0xc4   : > { %v587_v55 = vpop.f32.mrf.mxu3 }
  0xc5   : > { %v908_v57 = vld [vmem:[%s1039_s2] ss:$0 sm:$0xff] }
  0xc9   : > { %v595_v56 = vld [vmem:[#allocation2] sm:$0xff] }
  0xca   : > { %v600_v58 = vadd.f32 %v908_v57, %v595_v56 }
  0xcc   : > { %v601_v59 = vmax.f32 %v600_v58, 0.0 }
  0xce   : > { %v602_v60 = vpack.c.bf16 %v601_v59, %v601_v59 }
  0xd0   : > { %603 = vst [vmem:[%s1040_s3] sm:$0xf] %v602_v60 }
  0xd1 PF: > { %s13_s14 = sadd.s32 1, %s931_s14   ;;  %s1041_s12 = smov %s927_s13 }
  0xd2   : > { %p10_p8 = scmp.ge.s32.totalorder %s13_s14, 4   ;;  %s1042_s13 = smov %s1044_s15 }
  0xd4   :  { %12 = sbr.rel (!%p10_p8) target bundleno = 2 (0x2), region = 76 }

// kernel: generalized_rcnn_forward.8
= control target key start
LH: loop header
LB: loop body
LE: loop exit
PB: predicated region body
PF: predicated region fallthrough
CT: control target
= control target key end

     0   :  { %s1386_s24 = smov [#allocation3]   ;;  %s1387_s25 = smov [#allocation4]   ;;  %s4014_s0 = inlined_call_operand.vmem [shape: s32[8,7], index: 0, kind: input, shape index: {}]   ;;  %s4015_s4 = inlined_call_operand.vmem [shape: f32[8,8,16], index: 4, kind: input, shape index: {}]   ;;  %s4016_s5 = inlined_call_operand.vmem [shape: f32[8,49,16], index: 5, kind: output, shape index: {}]   ;;  %s4017_s1 = inlined_call_operand.vmem [shape: s32[8,7], index: 1, kind: input, shape index: {}]   ;;  %s4018_s2 = inlined_call_operand.vmem [shape: s32[8,7], index: 2, kind: input, shape index: {}]   ;;  %s4019_s3 = inlined_call_operand.vmem [shape: s32[8,7], index: 3, kind: input, shape index: {}]  }
   0x1   :  { %s11_s20 = sshll.u32 %s4014_s0, 4  ;;  %s16_s23 = sshll.u32 %s4017_s1, 4  ;;  %s12_s20 = int_to_ptr.vmem [resolvable:$true] %s11_s20  ;;  %s17_s23 = int_to_ptr.vmem [resolvable:$true] %s16_s23 }
   0x2   :  { %14 = dma.vmem_to_smem %s12_s20, 128, %s1386_s24, [#allocation2] }
   0x3   :  { %19 = dma.vmem_to_smem %s17_s23, 128, %s1387_s25, [#allocation2] }
   0x4   :  { %s21_s28 = sshll.u32 %s4018_s2, 4  ;;  %s26_s6 = sshll.u32 %s4019_s3, 4  ;;  %s22_s28 = int_to_ptr.vmem [resolvable:$true] %s21_s28  ;;  %s27_s6 = int_to_ptr.vmem [resolvable:$true] %s26_s6 }
   0x5   :  { %s1388_s0 = smov [#allocation5]   ;;  %s1389_s7 = smov [#allocation6]  }
   0x6   :  { %24 = dma.vmem_to_smem %s22_s28, 128, %s1388_s0, [#allocation2] }
   0x7   :  { %29 = dma.vmem_to_smem %s27_s6, 128, %s1389_s7, [#allocation2] }
   0x8   :  { %1380 = dma.done.wait [#allocation2], 512 }
   0x9   :  { %1381 = vsyncadd [#allocation2], 4294966784 }
   0xa   :  { %32 = sfence }
   0xb   :  { %s1432_s1 = smov 0  }
   0xc LB: > { %s1438_s2 = sadd.s32 4294967295, %s1384_s1   ;;  %p1302_p0 = scmp.ge.s32.totalorder %s1384_s1, 1  ;;  %s1384_s1 = sphi %s1432_s1, %s38_s1  }
   0xd   : > { %p104_p1 = scmp.lt.s32.totalorder %s1384_s1, 9 }
   0xf   : > { %p105_p2 = pnand %p1302_p0, %p104_p1 }
  0x11   : > { %108 = sbr.rel (%p105_p2) target bundleno = 330 (0x14a), region = 24 }
  0x16   : > { %s1443_s3 = sshll.u32 %s1438_s2, 7  ;;  %v132_v0 = vlaneseq  ;;  %vm4020_vm1 = vcmask 130048   ;;  %v1479_v2 = vld [vmem:[%s4015_s4] sm:$0xff]  ;;  %v1492_v5 = vld [vmem:[%s4015_s4 + $0x8] sm:$0xff]  ;;  %v1498_v6 = vld [vmem:[%s4015_s4 + $0x10] sm:$0xff]  ;;  %v4153_v50 = vmov 0 }
  0x17   : > { %s1446_s8 = sld [smem:[#allocation3 + %s1443_s3]]  ;;  %s1458_s12 = sadd.s32 1, %s1443_s3  ;;  %v1503_v7 = vld [vmem:[%s4015_s4 + $0x18] sm:$0xff]  ;;  %v1520_v10 = vld [vmem:[%s4015_s4 + $0x20] sm:$0xff]  ;;  %v1557_v17 = vld [vmem:[%s4015_s4 + $0x28] sm:$0xff]  ;;  %v4156_v52 = vmov 0 }
  0x18   : > { %s1449_s9 = sld [smem:[#allocation4 + %s1443_s3]]  ;;  %s1470_s15 = sadd.s32 2, %s1443_s3  ;;  %v1481_v3 = vshrl.u32 %v132_v0, 7  ;;  %v1580_v21 = vld [vmem:[%s4015_s4 + $0x30] sm:$0xff]  ;;  %v1612_v27 = vld [vmem:[%s4015_s4 + $0x38] sm:$0xff]  ;;  %v4159_v55 = vmov 0 }
  0x19   : > { %s1452_s10 = sld [smem:[#allocation5 + %s1443_s3]]  ;;  %s1515_s26 = sadd.s32 3, %s1443_s3  ;;  %v4176_v61 = vmov 0 }
  0x1a   : > { %s1455_s11 = sld [smem:[#allocation6 + %s1443_s3]]  ;;  %s1537_s30 = sadd.s32 4, %s1443_s3 }
  0x1b   : > { %s1461_s13 = sld [smem:[#allocation5 + %s1458_s12]]  ;;  %s1607_s22 = sadd.s32 5, %s1443_s3 }
  0x1c   : > { %s1467_s14 = sld [smem:[#allocation6 + %s1458_s12]] }
  0x1d   : > { %v1464_v1 = vstv %s1446_s8  ;;  %s1474_s16 = sld [smem:[#allocation5 + %s1470_s15]] }
  0x1e   : > { %vm138_vm0 = vcmp.le.s32.totalorder %v1464_v1, 0  ;;  %vm139_vm2 = vcmp.le.s32.totalorder %v1464_v1, 1  ;;  %vm140_vm3 = vcmp.le.s32.totalorder %v1464_v1, 2  ;;  %v146_v4 = vstv %s1449_s9  ;;  %s1487_s19 = sld [smem:[#allocation6 + %s1470_s15]]  ;;  %p1640_p3 = scmp.le.s32.totalorder %s1449_s9, %s1446_s8 }
  0x1f   : > { %vm141_vm4 = vcmp.le.s32.totalorder %v1464_v1, 3  ;;  %vm147_vm5 = vcmp.gt.s32.totalorder %v146_v4, 0  ;;  %vm148_vm6 = vcmp.gt.s32.totalorder %v146_v4, 1  ;;  %vm149_vm7 = vcmp.gt.s32.totalorder %v146_v4, 2  ;;  %s1534_s29 = sld [smem:[#allocation5 + %s1515_s26]] }
  0x20   : > { %vm142_vm8 = vcmp.le.s32.totalorder %v1464_v1, 4  ;;  %vm143_vm9 = vcmp.le.s32.totalorder %v1464_v1, 5  ;;  %vm150_vm10 = vcmp.gt.s32.totalorder %v146_v4, 3  ;;  %vm1509_vm11 = vmand %vm138_vm0, %vm147_vm5  ;;  %v189_v9 = vstv %s1452_s10  ;;  %s1552_s6 = sld [smem:[#allocation6 + %s1515_s26]]  ;;  %p1646_p4 = scmp.le.s32.totalorder %s1455_s11, %s1452_s10 }
  0x21   : > { %vm151_vm12 = vcmp.gt.s32.totalorder %v146_v4, 4  ;;  %vm1524_vm13 = vmand %vm139_vm2, %vm148_vm6  ;;  %v163_v12 = vsel %vm1509_vm11, %v1479_v2, -1e+30  ;;  %v191_v13 = vstv %s1455_s11  ;;  %v212_v14 = vstv %s1461_s13  ;;  %s1575_s17 = sld [smem:[#allocation5 + %s1537_s30]] }
  0x22   : > { %vm144_vm14 = vcmp.le.s32.totalorder %v1464_v1, 6  ;;  %vm145_vm15 = vcmp.le.s32.totalorder %v1464_v1, 7  ;;  %vm152_vm0 = vcmp.gt.s32.totalorder %v146_v4, 5  ;;  %vm1544_vm2 = vmand %vm140_vm3, %vm149_vm7  ;;  %v164_v16 = vsel %vm1524_vm13, %v1492_v5, -1e+30  ;;  %s1604_s21 = sld [smem:[#allocation6 + %s1537_s30]]  ;;  %p204_p5 = por %p1646_p4, %p1640_p3 }
  0x23   : > { %vm153_vm5 = vcmp.gt.s32.totalorder %v146_v4, 6  ;;  %vm154_vm6 = vcmp.gt.s32.totalorder %v146_v4, 7  ;;  %vm1562_vm3 = vmand %vm141_vm4, %vm150_vm10  ;;  %v165_v19 = vsel %vm1544_vm2, %v1498_v6, -1e+30  ;;  %vm1570_vm7 = vcmp.ge.s32.totalorder %v1481_v3, %v189_v9  ;;  %s1628_s25 = sld [smem:[#allocation5 + %s1607_s22]]  ;;  %p1682_p6 = scmp.le.s32.totalorder %s1467_s14, %s1461_s13 }
  0x24   : > { %vm1585_vm4 = vmand %vm142_vm8, %vm151_vm12  ;;  %v166_v23 = vsel %vm1562_vm3, %v1503_v7, -1e+30  ;;  %v172_v24 = vsel %vm4020_vm1, %v163_v12, -inf  ;;  %vm1594_vm10 = vcmp.lt.s32.totalorder %v1481_v3, %v191_v13  ;;  %vm1599_vm8 = vcmp.ge.s32.totalorder %v1481_v3, %v212_v14  ;;  %s1661_s8 = sld [smem:[#allocation6 + %s1607_s22]]  ;;  %p1694_p7 = scmp.le.s32.totalorder %s1487_s19, %s1474_s16 }
  0x25   : > { %vm1617_vm11 = vmand %vm143_vm9, %vm152_vm0  ;;  %v167_v29 = vsel %vm1585_vm4, %v1520_v10, -1e+30  ;;  %v173_v30 = vsel %vm4020_vm1, %v164_v16, -inf  ;;  %v214_v31 = vstv %s1467_s14  ;;  %v234_v32 = vstv %s1474_s16  ;;  %s1714_s11 = scalar_select %p204_p5, 1, 0 }
  0x26   : > { %vm161_vm12 = vmand %vm144_vm14, %vm153_vm5  ;;  %v168_v33 = vsel %vm1617_vm11, %v1557_v17, -1e+30  ;;  %v174_v34 = vsel %vm4020_vm1, %v165_v19, -inf  ;;  %v176_v35 = vsel %vm4020_vm1, %v167_v29, -inf  ;;  %v236_v36 = vstv %s1487_s19  ;;  %p226_p8 = por %p1682_p6, %p1640_p3  ;;  %p248_p9 = por %p1694_p7, %p1640_p3 }
  0x27   : > { %vm162_vm9 = vmand %vm145_vm15, %vm154_vm6  ;;  %v169_v37 = vsel %vm161_vm12, %v1580_v21, -1e+30  ;;  %v175_v38 = vsel %vm4020_vm1, %v166_v23, -inf  ;;  %v177_v39 = vmax.f32 %v172_v24, %v176_v35  ;;  %v178_v40 = vsel %vm4020_vm1, %v168_v33, -inf  ;;  %p1763_p10 = scmp.le.s32.totalorder %s1552_s6, %s1534_s29  ;;  %s1776_s14 = sadd.s32 6, %s1443_s3 }
  0x28   : > { %v170_v41 = vsel %vm162_vm9, %v1612_v27, -1e+30  ;;  %v179_v42 = vmax.f32 %v173_v30, %v178_v40  ;;  %v180_v43 = vsel %vm4020_vm1, %v169_v37, -inf  ;;  %vm215_vm13 = vcmp.lt.s32.totalorder %v1481_v3, %v214_v31  ;;  %vm1676_vm0 = vmand %vm1570_vm7, %vm1594_vm10  ;;  %s1783_s16 = scalar_select %p226_p8, 1, 0 }
  0x29   : > { %v181_v44 = vmax.f32 %v174_v34, %v180_v43  ;;  %v182_v45 = vsel %vm4020_vm1, %v170_v41, -inf  ;;  %vm235_vm14 = vcmp.ge.s32.totalorder %v1481_v3, %v234_v32  ;;  %vm237_vm15 = vcmp.lt.s32.totalorder %v1481_v3, %v236_v36  ;;  %vm1688_vm2 = vmand %vm1599_vm8, %vm215_vm13  ;;  %s1799_s3 = scalar_select %p248_p9, 1, 0 }
  0x2a   : > { %v183_v46 = vmax.f32 %v175_v38, %v182_v45  ;;  %v184_v47 = vmax.f32 %v177_v39, %v179_v42  ;;  %v256_v48 = vstv %s1534_s29  ;;  %v258_v49 = vstv %s1552_s6  ;;  %vm1700_vm5 = vmand %vm235_vm14, %vm237_vm15  ;;  %p270_p11 = por %p1763_p10, %p1640_p3  ;;  %s1809_s19 = sld [smem:[#allocation5 + %s1776_s14]] }
  0x2b   : > { %v4154_v50 = vsel %vm1676_vm0, 4294967295, %v4153_v50  ;;  %v4157_v52 = vsel %vm1688_vm2, 4294967295, %v4156_v52  ;;  %v278_v53 = vstv %s1575_s17  ;;  %v280_v54 = vstv %s1604_s21  ;;  %p1814_p12 = scmp.le.s32.totalorder %s1604_s21, %s1575_s17  ;;  %s1819_s6 = sld [smem:[#allocation6 + %s1776_s14]] }
  0x2c   : > { %v185_v51 = vmax.f32 %v181_v44, %v183_v46  ;;  %v4160_v55 = vsel %vm1700_vm5, 4294967295, %v4159_v55  ;;  %vm257_vm6 = vcmp.ge.s32.totalorder %v1481_v3, %v256_v48  ;;  %vm259_vm3 = vcmp.lt.s32.totalorder %v1481_v3, %v258_v49  ;;  %p1824_p13 = scmp.le.s32.totalorder %s1661_s8, %s1628_s25  ;;  %s1829_s7 = sld [smem:[#allocation3 + %s1458_s12]] }
  0x2d   : > { %v300_v56 = vstv %s1628_s25  ;;  %v302_v58 = vstv %s1661_s8  ;;  %vm1722_vm7 = vcmp.ge.s32.totalorder %v1481_v3, %v278_v53  ;;  %vm1727_vm4 = vcmp.lt.s32.totalorder %v1481_v3, %v280_v54  ;;  %vm1749_vm8 = vmand %vm257_vm6, %vm259_vm3  ;;  %p292_p0 = por %p1814_p12, %p1640_p3  ;;  %s1847_s18 = sld [smem:[#allocation4 + %s1458_s12]] }
  0x2e   : > { %v1707_v57 = vmax.f32 %v184_v47, %v185_v51  ;;  %vm1732_vm10 = vcmp.ge.s32.totalorder %v1481_v3, %v300_v56  ;;  %v4167_v1 = vmov 0  ;;  %vm303_vm11 = vcmp.lt.s32.totalorder %v1481_v3, %v302_v58  ;;  %vm1771_vm12 = vmand %vm1722_vm7, %vm1727_vm4  ;;  %p314_p1 = por %p1824_p13, %p1640_p3  ;;  %s1989_s24 = sld [smem:[#allocation3 + %s1470_s15]] }
  0x2f   : > { %v4168_v1 = vsel %vm1749_vm8, 4294967295, %v4167_v1  ;;  %v4170_v14 = vmov 0  ;;  %vm1790_vm9 = vmand %vm1732_vm10, %vm303_vm11  ;;  %v4172_v19 = vmov 0  ;;  %s1844_s17 = scalar_select %p270_p11, 1, 0  ;;  %v206_v41 = vstv %s1714_s11 }
  0x30   : > { %v194_v62 = vsel %vm1676_vm0, %v1707_v57, -1e+30  ;;  %v217_v63 = vsel %vm1688_vm2, %v1707_v57, -1e+30  ;;  %v239_v0 = vsel %vm1700_vm5, %v1707_v57, -1e+30  ;;  %v322_v39 = vstv %s1809_s19 }
  0x31   : > { %v195_v4 = vsel %vm4020_vm1, %v194_v62, -inf  ;;  %v218_v8 = vsel %vm4020_vm1, %v217_v63, -inf  ;;  %v240_v9 = vsel %vm4020_vm1, %v239_v0, -inf  ;;  %v261_v11 = vsel %vm1749_vm8, %v1707_v57, -1e+30  ;;  %p1930_p2 = scmp.le.s32.totalorder %s1819_s6, %s1809_s19  ;;  %s1999_s25 = sld [smem:[#allocation4 + %s1470_s15]] }
  0x32   : > { %v196_v12 = vrot.slane %v195_v4, 4  ;;  %v262_v13 = vsel %vm4020_vm1, %v261_v11, -inf  ;;  %v4171_v14 = vsel %vm1771_vm12, 4294967295, %v4170_v14  ;;  %v219_v15 = vrot.slane %v218_v8, 4  ;;  %s1849_s20 = scalar_select %p292_p0, 1, 0 }
  0x33   : > { %v241_v16 = vrot.slane %v240_v9, 4  ;;  %v283_v18 = vsel %vm1771_vm12, %v1707_v57, -1e+30  ;;  %v4173_v19 = vsel %vm1790_vm9, 4294967295, %v4172_v19  ;;  %v305_v20 = vsel %vm1790_vm9, %v1707_v57, -1e+30  ;;  %p336_p5 = por %p1930_p2, %p1640_p3  ;;  %p1964_p8 = scmp.le.s32.totalorder %s1847_s18, %s1829_s7 }
  0x34   : > { %v263_v22 = vrot.slane %v262_v13, 4  ;;  %v197_v23 = vmax.f32 %v195_v4, %v196_v12  ;;  %v284_v24 = vsel %vm4020_vm1, %v283_v18, -inf  ;;  %v220_v25 = vmax.f32 %v218_v8, %v219_v15  ;;  %s1851_s21 = scalar_select %p314_p1, 1, 0 }
  0x35   : > { %v242_v26 = vmax.f32 %v240_v9, %v241_v16  ;;  %v306_v28 = vsel %vm4020_vm1, %v305_v20, -inf  ;;  %v285_v30 = vrot.slane %v284_v24, 4  ;;  %v324_v40 = vstv %s1819_s6  ;;  %p401_p9 = por %p1964_p8, %p1646_p4  ;;  %p414_p3 = por %p1964_p8, %p1682_p6 }
  0x36   : > { %v264_v29 = vmax.f32 %v262_v13, %v263_v22  ;;  %v198_v31 = vrot.slane %v197_v23, 2  ;;  %v307_v32 = vrot.slane %v306_v28, 4  ;;  %v221_v33 = vrot.slane %v220_v25, 2  ;;  %s2012_s8 = scalar_select %p336_p5, 1, 0 }
  0x37   : > { %v243_v34 = vrot.slane %v242_v26, 2  ;;  %v286_v36 = vmax.f32 %v284_v24, %v285_v30  ;;  %v1863_v44 = vstv %s1829_s7  ;;  %v228_v45 = vstv %s1783_s16  ;;  %s2039_s15 = scalar_select %p401_p9, 1, 0 }
  0x38   : > { %v265_v35 = vrot.slane %v264_v29, 2  ;;  %v1853_v37 = vmax.f32 %v197_v23, %v198_v31  ;;  %v308_v38 = vmax.f32 %v306_v28, %v307_v32  ;;  %v1858_v42 = vmax.f32 %v220_v25, %v221_v33  ;;  %p427_p11 = por %p1964_p8, %p1694_p7  ;;  %p440_p0 = por %p1964_p8, %p1763_p10 }
  0x39   : > { %v1860_v43 = vmax.f32 %v242_v26, %v243_v34  ;;  %v250_v46 = vstv %s1799_s3  ;;  %v272_v47 = vstv %s1844_s17  ;;  %v294_v48 = vstv %s1849_s20  ;;  %s2115_s27 = scalar_select %p414_p3, 1, 0 }
  0x3a   : > { %v287_v49 = vrot.slane %v286_v36, 2  ;;  %v316_v51 = vstv %s1851_s21  ;;  %vm323_vm13 = vcmp.ge.s32.totalorder %v1481_v3, %v322_v39  ;;  %vm325_vm14 = vcmp.lt.s32.totalorder %v1481_v3, %v324_v40  ;;  %p453_p1 = por %p1964_p8, %p1814_p12  ;;  %p466_p5 = por %p1964_p8, %p1824_p13 }
  0x3b   : > { %v200_v53 = vrot.slane %v1853_v37, 1  ;;  %v1873_v54 = vmax.f32 %v264_v29, %v265_v35  ;;  %v309_v56 = vrot.slane %v308_v38, 2  ;;  %vm344_vm15 = vcmp.le.s32.totalorder %v1863_v44, 0  ;;  %vm1880_vm3 = vmand %vm323_vm13, %vm325_vm14  ;;  %s2133_s11 = scalar_select %p427_p11, 1, 0 }
  0x3c   : > { %v223_v58 = vrot.slane %v1858_v42, 1  ;;  %v245_v59 = vrot.slane %v1860_v43, 1  ;;  %v352_v60 = vstv %s1847_s18  ;;  %v4177_v61 = vsel %vm1880_vm3, 4294967295, %v4176_v61  ;;  %s2142_s16 = scalar_select %p440_p0, 1, 0 }
  0x3d   : > { %vm353_vm4 = vcmp.gt.s32.totalorder %v352_v60, 0  ;;  %vm354_vm10 = vcmp.gt.s32.totalorder %v352_v60, 1  ;;  %v288_v3 = vmax.f32 %v286_v36, %v287_v49  ;;  %v327_v62 = vsel %vm1880_vm3, %v1707_v57, -1e+30  ;;  %s2173_s3 = scalar_select %p453_p1, 1, 0 }
  0x3e   : > { %vm1889_vm6 = vmand %vm344_vm15, %vm353_vm4  ;;  %v310_v0 = vmax.f32 %v308_v38, %v309_v56  ;;  %vm4180_vm7 = vcmp.le.s32.totalorder %v1863_v44, 1  ;;  %vm1903_vm1 = vcmp.eq.s32.totalorder %v206_v41, 1  ;;  %v4183_v8 = vmov 0  ;;  %p479_p9 = por %p1964_p8, %p1930_p2  ;;  %p2286_p3 = scmp.le.s32.totalorder %s1999_s25, %s1989_s24 }
  0x3f   : > { %vm1896_vm11 = vmand %vm4180_vm7, %vm354_vm10  ;;  %v369_v57 = vsel %vm1889_vm6, %v1479_v2, -1e+30  ;;  %v4184_v8 = vsel %vm1903_vm1, 4294967295, %v4183_v8  ;;  %vm1907_vm15 = vcmp.eq.s32.totalorder %v228_v45, 1  ;;  %v4185_v9 = vmov 0  ;;  %s2291_s6 = sld [smem:[#allocation3 + %s1515_s26]] }
  0x40   : > { %v4186_v9 = vsel %vm1907_vm15, 4294967295, %v4185_v9  ;;  %v267_v11 = vrot.slane %v1873_v54, 1  ;;  %vm4187_vm10 = vcmp.gt.s32.totalorder %v352_v60, 2  ;;  %vm4188_vm13 = vcmp.le.s32.totalorder %v1863_v44, 2  ;;  %s2298_s7 = scalar_select %p466_p5, 1, 0 }
  0x41   : > { %vm1916_vm14 = vmand %vm4188_vm13, %vm4187_vm10  ;;  %v370_v13 = vsel %vm1896_vm11, %v1492_v5, -1e+30  ;;  %vm1923_vm6 = vcmp.eq.s32.totalorder %v250_v46, 1  ;;  %v4191_v15 = vmov 0  ;;  %vm4193_vm9 = vcmask 130048   ;;  %p544_p11 = por %p2286_p3, %p1646_p4  ;;  %p557_p8 = por %p2286_p3, %p1682_p6 }
  0x42   : > { %v4192_v15 = vsel %vm1923_vm6, 4294967295, %v4191_v15  ;;  %v328_v16 = vsel %vm4193_vm9, %v327_v62, -inf  ;;  %vm359_vm10 = vcmp.gt.s32.totalorder %v352_v60, 6  ;;  %vm4195_vm4 = vcmp.gt.s32.totalorder %v352_v60, 3  ;;  %s2308_s17 = scalar_select %p479_p9, 1, 0 }
  0x43   : > { %vm4196_vm7 = vcmp.le.s32.totalorder %v1863_v44, 3  ;;  %v371_v20 = vsel %vm1916_vm14, %v1498_v6, -1e+30  ;;  %vm351_vm9 = vcmp.le.s32.totalorder %v1863_v44, 7  ;;  %vm360_vm3 = vcmp.gt.s32.totalorder %v352_v60, 7  ;;  %p570_p0 = por %p2286_p3, %p1694_p7  ;;  %s2361_s20 = sld [smem:[#allocation4 + %s1515_s26]] }
  0x44   : > { %vm1938_vm11 = vmand %vm4196_vm7, %vm4195_vm4  ;;  %vm4199_vm12 = vcmp.gt.s32.totalorder %v352_v60, 4  ;;  %vm4200_vm8 = vcmp.le.s32.totalorder %v1863_v44, 4  ;;  %vm4201_vm13 = vcmask 130048   ;;  %v289_v24 = vrot.slane %v288_v3, 1  ;;  %s2350_s18 = scalar_select %p544_p11, 1, 0 }
  0x45   : > { %vm365_vm5 = vmand %vm4200_vm8, %vm4199_vm12  ;;  %v372_v22 = vsel %vm1938_vm11, %v1503_v7, -1e+30  ;;  %v377_v23 = vsel %vm4201_vm13, %v369_v57, -inf  ;;  %v311_v25 = vrot.slane %v310_v0, 1  ;;  %vm4202_vm14 = vcmp.gt.s32.totalorder %v352_v60, 5  ;;  %p583_p1 = por %p2286_p3, %p1763_p10  ;;  %p596_p5 = por %p2286_p3, %p1814_p12 }
  0x46   : > { %vm4203_vm4 = vcmp.le.s32.totalorder %v1863_v44, 5  ;;  %v373_v26 = vsel %vm365_vm5, %v1520_v10, -1e+30  ;;  %vm4204_vm8 = vmmov %vm4201_vm13  ;;  %v329_v29 = vrot.slane %v328_v16, 4  ;;  %vm4206_vm12 = vcmp.le.s32.totalorder %v1863_v44, 6  ;;  %p609_p9 = por %p2286_p3, %p1824_p13  ;;  %p622_p11 = por %p2286_p3, %p1930_p2 }
  0x47   : > { %vm366_vm7 = vmand %vm4203_vm4, %vm4202_vm14  ;;  %v378_v28 = vsel %vm4204_vm8, %v370_v13, -inf  ;;  %v1992_v39 = vmax.f32 %v1853_v37, %v200_v53  ;;  %v2002_v45 = vmax.f32 %v1858_v42, %v223_v58  ;;  %v2005_v46 = vmax.f32 %v1860_v43, %v245_v59  ;;  %s2377_s21 = scalar_select %p557_p8, 1, 0 }
  0x48   : > { %vm367_vm13 = vmand %vm4206_vm12, %vm359_vm10  ;;  %v374_v30 = vsel %vm366_vm7, %v1557_v17, -1e+30  ;;  %v2016_v53 = vmax.f32 %v1873_v54, %v267_v11  ;;  %v2018_v56 = vmax.f32 %v288_v3, %v289_v24  ;;  %vm2022_vm7 = vcmp.eq.s32.totalorder %v272_v47, 1  ;;  %s2401_s26 = scalar_select %p570_p0, 1, 0 }
  0x49   : > { %vm4207_vm11 = vmmov %vm4204_vm8  ;;  %v375_v34 = vsel %vm367_vm13, %v1580_v21, -1e+30  ;;  %v4215_v43 = vmov 0  ;;  %v4217_v58 = vmov 0  ;;  %v2032_v59 = vmax.f32 %v310_v0, %v311_v25  ;;  %s2421_s23 = scalar_select %p583_p1, 1, 0 }
  0x4a   : > { %v379_v31 = vsel %vm4207_vm11, %v371_v20, -inf  ;;  %vm4208_vm14 = vmmov %vm4204_vm8  ;;  %v4216_v43 = vsel %vm2022_vm7, 4294967295, %v4215_v43  ;;  %v330_v62 = vmax.f32 %v328_v16, %v329_v29  ;;  %vm2043_vm12 = vcmp.eq.s32.totalorder %v316_v51, 1  ;;  %p2610_p3 = scmp.le.s32.totalorder %s2361_s20, %s2291_s6 }
  0x4b   : > { %v381_v32 = vsel %vm4208_vm14, %v373_v26, -inf  ;;  %vm1977_vm5 = vmand %vm351_vm9, %vm360_vm3  ;;  %v4219_v47 = vmov 0  ;;  %v338_v63 = vstv %s2012_s8  ;;  %v403_v13 = vstv %s2039_s15  ;;  %s2592_s8 = scalar_select %p622_p11, 1, 0 }
  0x4c   : > { %vm4211_vm4 = vmmov %vm4204_vm8  ;;  %v382_v36 = vmax.f32 %v377_v23, %v381_v32  ;;  %v376_v40 = vsel %vm1977_vm5, %v1612_v27, -1e+30  ;;  %vm2028_vm8 = vcmp.eq.s32.totalorder %v294_v48, 1  ;;  %v4220_v47 = vsel %vm2043_vm12, 4294967295, %v4219_v47  ;;  %p687_p8 = por %p2610_p3, %p1646_p4  ;;  %p700_p0 = por %p2610_p3, %p1682_p6 }
  0x4d   : > { %v380_v35 = vsel %vm4211_vm4, %v372_v22, -inf  ;;  %vm4212_vm10 = vmmov %vm4211_vm4  ;;  %v4218_v58 = vsel %vm2028_vm8, 4294967295, %v4217_v58  ;;  %v331_v12 = vrot.slane %v330_v62, 2  ;;  %v2070_v16 = vstv %s1989_s24  ;;  %s2446_s24 = scalar_select %p596_p5, 1, 0 }
  0x4e   : > { %v383_v38 = vsel %vm4212_vm10, %v374_v30, -inf  ;;  %vm4213_vm3 = vmmov %vm4211_vm4  ;;  %vm4221_vm13 = vnez %v4160_v55  ;;  %v2086_v23 = vstv %s1999_s25  ;;  %vm4225_vm4 = vnez %v4168_v1  ;;  %s2579_s25 = scalar_select %p609_p9, 1, 0 }
  0x4f   : > { %v384_v41 = vmax.f32 %v378_v28, %v383_v38  ;;  %v385_v44 = vsel %vm4213_vm3, %v375_v34, -inf  ;;  %vm4214_vm9 = vmmov %vm4213_vm3  ;;  %vm4231_vm8 = vcmp.gt.s32.totalorder %v2086_v23, 0  ;;  %vm4232_vm7 = vcmp.le.s32.totalorder %v2070_v16, 0  ;;  %p713_p1 = por %p2610_p3, %p1694_p7  ;;  %p726_p5 = por %p2610_p3, %p1763_p10 }
  0x50   : > { %v386_v37 = vmax.f32 %v379_v31, %v385_v44  ;;  %v387_v49 = vsel %vm4214_vm9, %v376_v40, -inf  ;;  %vm4222_vm11 = vmmov %vm4213_vm3  ;;  %vm4228_vm9 = vnez %v4173_v19  ;;  %vm4237_vm12 = vcmp.le.s32.totalorder %v2070_v16, 1  ;;  %p739_p9 = por %p2610_p3, %p1814_p12  ;;  %p752_p11 = por %p2610_p3, %p1824_p13 }
  0x51   : > { %v388_v60 = vmax.f32 %v380_v35, %v387_v49  ;;  %v389_v42 = vmax.f32 %v382_v36, %v384_v41  ;;  %vm4223_vm14 = vmmov %vm4213_vm3  ;;  %v2119_v41 = vmax.f32 %v330_v62, %v331_v12  ;;  %vm4241_vm1 = vcmp.le.s32.totalorder %v2070_v16, 2  ;;  %s2716_s19 = scalar_select %p726_p5, 1, 0 }
  0x52   : > { %vm4224_vm5 = vmmov %vm4213_vm3  ;;  %vm4244_vm15 = vcmp.gt.s32.totalorder %v2086_v23, 3  ;;  %v546_v3 = vstv %s2350_s18 }
  0x53   : > { %v390_v48 = vmax.f32 %v386_v37, %v388_v60  ;;  %vm4226_vm10 = vmmov %vm4213_vm3  ;;  %vm4227_vm3 = vnez %v4171_v14 }
  0x54   : > { %vm2151_vm6 = vmand %vm4232_vm7, %vm4231_vm8  ;;  %vm4245_vm8 = vcmp.le.s32.totalorder %v2070_v16, 3  ;;  %vm4250_vm7 = vcmp.le.s32.totalorder %v2070_v16, 4 }
  0x55   : > { %v2063_v57 = vmax.f32 %v389_v42, %v390_v48 }
  0x57   : > { %v392_v18 = vsel %vm1676_vm0, %v2063_v57, -1e+30  ;;  %v406_v20 = vsel %vm1688_vm2, %v2063_v57, -1e+30  ;;  %v419_v22 = vsel %vm4221_vm13, %v2063_v57, -1e+30 }
  0x58   : > { %v393_v24 = vsel %vm4222_vm11, %v392_v18, -inf  ;;  %v407_v25 = vsel %vm4223_vm14, %v406_v20, -inf  ;;  %v420_v26 = vsel %vm4224_vm5, %v419_v22, -inf  ;;  %v432_v28 = vsel %vm4225_vm4, %v2063_v57, -1e+30  ;;  %vm4229_vm14 = vmmov %vm4224_vm5 }
  0x59   : > { %v394_v29 = vrot.slane %v393_v24, 4  ;;  %v408_v30 = vrot.slane %v407_v25, 4  ;;  %v421_v31 = vrot.slane %v420_v26, 4  ;;  %v433_v32 = vsel %vm4226_vm10, %v432_v28, -inf }
  0x5a   : > { %v434_v33 = vrot.slane %v433_v32, 4  ;;  %v445_v34 = vsel %vm4227_vm3, %v2063_v57, -1e+30  ;;  %v458_v35 = vsel %vm4228_vm9, %v2063_v57, -1e+30  ;;  %vm4236_vm10 = vcmp.gt.s32.totalorder %v2086_v23, 1 }
  0x5b   : > { %v395_v36 = vmax.f32 %v393_v24, %v394_v29  ;;  %v409_v38 = vmax.f32 %v407_v25, %v408_v30  ;;  %v446_v40 = vsel %vm4229_vm14, %v445_v34, -inf  ;;  %v422_v44 = vmax.f32 %v420_v26, %v421_v31  ;;  %vm4230_vm14 = vmmov %vm4224_vm5 }
  0x5c   : > { %v447_v37 = vrot.slane %v446_v40, 4  ;;  %v459_v49 = vsel %vm4230_vm14, %v458_v35, -inf  ;;  %v435_v60 = vmax.f32 %v433_v32, %v434_v33  ;;  %vm4235_vm14 = vnez %v4177_v61  ;;  %vm2163_vm5 = vmand %vm4237_vm12, %vm4236_vm10 }
  0x5d   : > { %v396_v62 = vrot.slane %v395_v36, 2  ;;  %v410_v48 = vrot.slane %v409_v38, 2  ;;  %v471_v12 = vsel %vm4235_vm14, %v2063_v57, -1e+30  ;;  %v416_v20 = vstv %s2115_s27  ;;  %vm2191_vm14 = vmand %vm4245_vm8, %vm4244_vm15  ;;  %s2639_s27 = sld [smem:[#allocation3 + %s1537_s30]] }
  0x5e   : > { %v460_v22 = vrot.slane %v459_v49, 4  ;;  %vm4240_vm11 = vcmp.gt.s32.totalorder %v2086_v23, 2  ;;  %v423_v24 = vrot.slane %v422_v44, 2  ;;  %v448_v25 = vmax.f32 %v446_v40, %v447_v37 }
  0x5f   : > { %vm2181_vm12 = vmand %vm4241_vm1, %vm4240_vm11  ;;  %v436_v28 = vrot.slane %v435_v60, 2  ;;  %vm4248_vm1 = vcmask 130048   ;;  %vm4249_vm10 = vcmp.gt.s32.totalorder %v2086_v23, 4  ;;  %v333_v31 = vrot.slane %v2119_v41, 1 }
  0x60   : > { %v472_v29 = vsel %vm4248_vm1, %v471_v12, -inf  ;;  %vm2202_vm3 = vmand %vm4250_vm7, %vm4249_vm10  ;;  %v397_v32 = vmax.f32 %v395_v36, %v396_v62  ;;  %v411_v33 = vmax.f32 %v409_v38, %v410_v48  ;;  %v429_v34 = vstv %s2133_s11  ;;  %s2650_s11 = sld [smem:[#allocation4 + %s1537_s30]] }
  0x61   : > { %vm4253_vm15 = vcmp.gt.s32.totalorder %v2086_v23, 5  ;;  %vm4254_vm8 = vcmp.le.s32.totalorder %v2070_v16, 5  ;;  %vm2218_vm7 = vcmp.eq.s32.totalorder %v338_v63, 1  ;;  %v4257_v40 = vmov 0  ;;  %s2682_s30 = scalar_select %p687_p8, 1, 0 }
  0x62   : > { %vm2212_vm1 = vmand %vm4254_vm8, %vm4253_vm15  ;;  %v4258_v40 = vsel %vm2218_vm7, 4294967295, %v4257_v40  ;;  %v442_v37 = vstv %s2142_s16  ;;  %v455_v36 = vstv %s2173_s3  ;;  %v461_v62 = vmax.f32 %v459_v49, %v460_v22  ;;  %s2698_s16 = scalar_select %p700_p0, 1, 0 }
  0x63   : > { %vm4259_vm10 = vcmp.gt.s32.totalorder %v2086_v23, 6  ;;  %vm4260_vm11 = vcmp.le.s32.totalorder %v2070_v16, 6  ;;  %v512_v48 = vsel %vm2151_vm6, %v1479_v2, -1e+30  ;;  %v424_v12 = vmax.f32 %v422_v44, %v423_v24  ;;  %s2706_s3 = scalar_select %p713_p1, 1, 0 }
  0x64   : > { %vm2228_vm9 = vmand %vm4260_vm11, %vm4259_vm10  ;;  %v449_v63 = vrot.slane %v448_v25, 2  ;;  %v473_v11 = vrot.slane %v472_v29, 4  ;;  %vm4263_vm15 = vcmp.gt.s32.totalorder %v2086_v23, 7  ;;  %vm4264_vm8 = vcmp.le.s32.totalorder %v2070_v16, 7  ;;  %p765_p8 = por %p2610_p3, %p1930_p2 }
  0x65   : > { %vm2243_vm4 = vmand %vm4264_vm8, %vm4263_vm15  ;;  %v513_v22 = vsel %vm2163_vm5, %v1492_v5, -1e+30  ;;  %vm2252_vm6 = vcmp.eq.s32.totalorder %v403_v13, 1  ;;  %v4267_v44 = vmov 0  ;;  %vm2256_vm11 = vcmp.eq.s32.totalorder %v416_v20, 1 }
  0x66   : > { %v4268_v44 = vsel %vm2252_vm6, 4294967295, %v4267_v44  ;;  %v4270_v23 = vmov 0  ;;  %v437_v16 = vmax.f32 %v435_v60, %v436_v28  ;;  %v514_v42 = vsel %vm2181_vm12, %v1498_v6, -1e+30  ;;  %p2755_p0 = scmp.le.s32.totalorder %s2650_s11, %s2639_s27 }
  0x67   : > { %4269 = vst [vmem:[#allocation8_spill] sm:$0xff] %v4268_v44  ;;  %v4271_v23 = vsel %vm2256_vm11, 4294967295, %v4270_v23  ;;  %v515_v13 = vsel %vm2191_vm14, %v1503_v7, -1e+30  ;;  %v516_v18 = vsel %vm2202_vm3, %v1520_v10, -1e+30  ;;  %v474_v35 = vmax.f32 %v472_v29, %v473_v11 }
  0x68   : > { %v398_v20 = vrot.slane %v397_v32, 1  ;;  %v412_v24 = vrot.slane %v411_v33, 1  ;;  %v517_v60 = vsel %vm2212_vm1, %v1557_v17, -1e+30  ;;  %v518_v57 = vsel %vm2228_vm9, %v1580_v21, -1e+30  ;;  %p830_p1 = por %p2755_p0, %p1646_p4  ;;  %p843_p3 = por %p2755_p0, %p1682_p6 }
  0x69   : > { %v462_v28 = vrot.slane %v461_v62, 2  ;;  %v519_v26 = vsel %vm2243_vm4, %v1612_v27, -1e+30  ;;  %vm4272_vm5 = vcmask 130048   ;;  %v2313_v11 = vmax.f32 %v2119_v41, %v333_v31  ;;  %s2797_s18 = scalar_select %p765_p8, 1, 0 }
  0x6a   : > { %v520_v30 = vsel %vm4272_vm5, %v512_v48, -inf  ;;  %vm4273_vm3 = vmmov %vm4272_vm5  ;;  %vm2328_vm15 = vcmp.eq.s32.totalorder %v429_v34, 1  ;;  %vm2332_vm8 = vcmp.eq.s32.totalorder %v442_v37, 1  ;;  %v4285_v31 = vmov 0  ;;  %p856_p5 = por %p2755_p0, %p1694_p7  ;;  %p895_p8 = por %p2755_p0, %p1824_p13 }
  0x6b   : > { %v521_v4 = vsel %vm4273_vm3, %v513_v22, -inf  ;;  %vm4275_vm9 = vmmov %vm4273_vm3  ;;  %v450_v22 = vmax.f32 %v448_v25, %v449_v63  ;;  %v2320_v25 = vmax.f32 %v397_v32, %v398_v20  ;;  %v425_v63 = vrot.slane %v424_v12, 1 }
  0x6c   : > { %v522_v38 = vsel %vm4275_vm9, %v514_v42, -inf  ;;  %vm4276_vm4 = vmmov %vm4273_vm3  ;;  %v463_v41 = vmax.f32 %v461_v62, %v462_v28  ;;  %v4286_v31 = vsel %vm2332_vm8, 4294967295, %v4285_v31  ;;  %vm2339_vm5 = vcmp.eq.s32.totalorder %v455_v36, 1 }
  0x6d   : > { %v523_v48 = vsel %vm4276_vm4, %v515_v13, -inf  ;;  %vm4277_vm14 = vmmov %vm4273_vm3  ;;  %4281 = vst [vmem:[#allocation9_spill] sm:$0xff] %v2320_v25  ;;  %v451_v32 = vrot.slane %v450_v22, 1  ;;  %v4288_v62 = vmov 0  ;;  %v2352_v37 = vmax.f32 %v424_v12, %v425_v63 }
  0x6e   : > { %v524_v49 = vsel %vm4277_vm14, %v516_v18, -inf  ;;  %vm4278_vm12 = vmmov %vm4273_vm3  ;;  %v438_v18 = vrot.slane %v437_v16, 1  ;;  %4287 = vst [vmem:[#allocation11_spill] sm:$0xff] %v4286_v31  ;;  %v4289_v62 = vsel %vm2339_vm5, 4294967295, %v4288_v62  ;;  %v2364_v36 = vstv %s2291_s6  ;;  %s2726_s6 = scalar_select %p739_p9, 1, 0 }
  0x6f   : > { %v525_v51 = vmax.f32 %v520_v30, %v524_v49  ;;  %v526_v0 = vsel %vm4278_vm12, %v517_v60, -inf  ;;  %vm4279_vm1 = vmmov %vm4273_vm3  ;;  %4290 = vst [vmem:[#allocation12_spill] sm:$0xff] %v4289_v62  ;;  %vm4296_vm14 = vnez %v4168_v1  ;;  %v559_v20 = vstv %s2377_s21  ;;  %p869_p9 = por %p2755_p0, %p1763_p10 }
  0x70   : > { %v528_v54 = vsel %vm4279_vm1, %v518_v57, -inf  ;;  %v527_v29 = vmax.f32 %v521_v4, %v526_v0  ;;  %vm4280_vm10 = vmmov %vm4279_vm1  ;;  %v2322_v57 = vmax.f32 %v411_v33, %v412_v24  ;;  %v4283_v4 = vmov 0 }
  0x71   : > { %v529_v42 = vmax.f32 %v522_v38, %v528_v54  ;;  %v530_v13 = vsel %vm4280_vm10, %v519_v26, -inf  ;;  %v475_v54 = vrot.slane %v474_v35, 2  ;;  %v4284_v4 = vsel %vm2328_vm15, 4294967295, %v4283_v4  ;;  %vm4293_vm3 = vmmov %vm4279_vm1 }
  0x72   : > { %v531_v60 = vmax.f32 %v523_v48, %v530_v13  ;;  %4282 = vst [vmem:[#allocation10_spill] sm:$0xff] %v2322_v57  ;;  %v532_v0 = vmax.f32 %v525_v51, %v527_v29  ;;  %v2354_v24 = vmax.f32 %v437_v16, %v438_v18  ;;  %v464_v16 = vrot.slane %v463_v41, 1  ;;  %vm4294_vm9 = vmmov %vm4279_vm1 }
  0x73   : > { %v476_v30 = vmax.f32 %v474_v35, %v475_v54  ;;  %v2379_v38 = vmax.f32 %v450_v22, %v451_v32  ;;  %vm4295_vm4 = vmmov %vm4279_vm1  ;;  %vm4299_vm10 = vnez %v4173_v19  ;;  %vm4307_vm11 = vcmp.le.s32.totalorder %v2364_v36, 1 }
  0x74   : > { %v533_v33 = vmax.f32 %v529_v42, %v531_v60  ;;  %4291 = vst [vmem:[#allocation13_spill] sm:$0xff] %v2354_v24  ;;  %vm4297_vm12 = vmmov %vm4279_vm1  ;;  %vm4298_vm1 = vnez %v4171_v14  ;;  %vm2494_vm6 = vcmp.eq.s32.totalorder %v546_v3, 1 }
  0x75   : > { %4292 = vst [vmem:[#allocation14_spill] sm:$0xff] %v2379_v38 }
  0x76   : > { %v534_v28 = vmax.f32 %v532_v0, %v533_v33  ;;  %v477_v0 = vrot.slane %v476_v30, 1 }
  0x78   : > { %v535_v48 = vsel %vm1676_vm0, %v534_v28, -1e+30  ;;  %v549_v49 = vsel %vm1688_vm2, %v534_v28, -1e+30  ;;  %v562_v29 = vsel %vm4221_vm13, %v534_v28, -1e+30 }
  0x79   : > { %v536_v42 = vsel %vm4293_vm3, %v535_v48, -inf  ;;  %v550_v35 = vsel %vm4294_vm9, %v549_v49, -inf  ;;  %v563_v13 = vsel %vm4295_vm4, %v562_v29, -inf  ;;  %v575_v22 = vsel %vm4296_vm14, %v534_v28, -1e+30  ;;  %vm4300_vm9 = vmmov %vm4293_vm3 }
  0x7a   : > { %v537_v63 = vrot.slane %v536_v42, 4  ;;  %v551_v18 = vrot.slane %v550_v35, 4  ;;  %v564_v60 = vrot.slane %v563_v13, 4  ;;  %v576_v54 = vsel %vm4297_vm12, %v575_v22, -inf  ;;  %vm4304_vm12 = vmmov %vm4293_vm3 }
  0x7b   : > { %v577_v32 = vrot.slane %v576_v54, 4  ;;  %v588_v33 = vsel %vm4298_vm1, %v534_v28, -1e+30  ;;  %v601_v48 = vsel %vm4299_vm10, %v534_v28, -1e+30  ;;  %vm4302_vm4 = vnez %v4177_v61 }
  0x7c   : > { %v538_v49 = vmax.f32 %v536_v42, %v537_v63  ;;  %v552_v29 = vmax.f32 %v550_v35, %v551_v18  ;;  %v565_v26 = vmax.f32 %v563_v13, %v564_v60  ;;  %v589_v12 = vsel %vm4293_vm3, %v588_v33, -inf }
  0x7d   : > { %v578_v51 = vmax.f32 %v576_v54, %v577_v32  ;;  %v590_v42 = vrot.slane %v589_v12, 4  ;;  %v602_v35 = vsel %vm4300_vm9, %v601_v48, -inf  ;;  %v2430_v18 = vmax.f32 %v463_v41, %v464_v16 }
  0x7e   : > { %v2433_v60 = vstv %s2361_s20  ;;  %v539_v54 = vrot.slane %v538_v49, 2  ;;  %v553_v32 = vrot.slane %v552_v29, 2  ;;  %v566_v33 = vrot.slane %v565_v26, 2  ;;  %s2850_s20 = scalar_select %p830_p1, 1, 0 }
  0x7f   : > { %4301 = vst [vmem:[#allocation15_spill] sm:$0xff] %v2430_v18  ;;  %v614_v22 = vsel %vm4302_vm4, %v534_v28, -1e+30  ;;  %v2437_v48 = vmax.f32 %v476_v30, %v477_v0  ;;  %v603_v41 = vrot.slane %v602_v35, 4  ;;  %v579_v63 = vrot.slane %v578_v51, 2  ;;  %p908_p1 = por %p2755_p0, %p1930_p2 }
  0x80   : > { %v591_v34 = vmax.f32 %v589_v12, %v590_v42  ;;  %v615_v38 = vsel %vm4304_vm12, %v614_v22, -inf  ;;  %vm630_vm3 = vcmp.le.s32.totalorder %v2364_v36, 0  ;;  %vm639_vm5 = vcmp.gt.s32.totalorder %v2433_v60, 0 }
  0x81   : > { %4303 = vst [vmem:[#allocation16_spill] sm:$0xff] %v2437_v48  ;;  %v540_v28 = vmax.f32 %v538_v49, %v539_v54  ;;  %v554_v30 = vmax.f32 %v552_v29, %v553_v32  ;;  %v567_v0 = vmax.f32 %v565_v26, %v566_v33  ;;  %vm640_vm8 = vcmp.gt.s32.totalorder %v2433_v60, 1  ;;  %vm2462_vm15 = vmand %vm630_vm3, %vm639_vm5 }
  0x82   : > { %v604_v16 = vmax.f32 %v602_v35, %v603_v41  ;;  %v580_v12 = vmax.f32 %v578_v51, %v579_v63  ;;  %v592_v22 = vrot.slane %v591_v34, 2  ;;  %vm641_vm9 = vcmp.gt.s32.totalorder %v2433_v60, 2  ;;  %vm2471_vm10 = vmand %vm4307_vm11, %vm640_vm8 }
  0x83   : > { %v616_v49 = vrot.slane %v615_v38, 4  ;;  %v4310_v29 = vstv %s2298_s7  ;;  %v4311_v42 = vmov 0  ;;  %v4314_v35 = vstv %s2308_s17  ;;  %s2772_s17 = scalar_select %p752_p11, 1, 0 }
  0x84   : > { %vm2477_vm12 = vcmp.eq.s32.totalorder %v4310_v29, 1  ;;  %vm2483_vm5 = vcmp.eq.s32.totalorder %v4314_v35, 1  ;;  %v4315_v63 = vmov 0  ;;  %v541_v54 = vrot.slane %v540_v28, 1  ;;  %p882_p11 = por %p2755_p0, %p1814_p12 }
  0x85   : > { %v4312_v42 = vsel %vm2477_vm12, 4294967295, %v4311_v42  ;;  %v4316_v63 = vsel %vm2483_vm5, 4294967295, %v4315_v63  ;;  %v555_v32 = vrot.slane %v554_v30, 1  ;;  %v568_v33 = vrot.slane %v567_v0, 1 }
  0x86   : > { %4313 = vst [vmem:[#allocation17_spill] sm:$0xff] %v4312_v42  ;;  %vm642_vm11 = vcmp.gt.s32.totalorder %v2433_v60, 3  ;;  %vm4318_vm8 = vcmp.le.s32.totalorder %v2364_v36, 2  ;;  %v4321_v29 = vmov 0  ;;  %vm2498_vm4 = vcmp.eq.s32.totalorder %v559_v20, 1 }
  0x87   : > { %4317 = vst [vmem:[#allocation18_spill] sm:$0xff] %v4316_v63  ;;  %vm2490_vm3 = vmand %vm4318_vm8, %vm641_vm9  ;;  %v4322_v29 = vsel %vm2494_vm6, 4294967295, %v4321_v29  ;;  %v4324_v35 = vmov 0  ;;  %v605_v62 = vrot.slane %v604_v16, 2  ;;  %vm643_vm7 = vcmp.gt.s32.totalorder %v2433_v60, 4 }
  0x88   : > { %4323 = vst [vmem:[#allocation19_spill] sm:$0xff] %v4322_v29  ;;  %v4325_v35 = vsel %vm2498_vm4, 4294967295, %v4324_v35  ;;  %vm644_vm1 = vcmp.gt.s32.totalorder %v2433_v60, 5  ;;  %vm645_vm9 = vcmp.gt.s32.totalorder %v2433_v60, 6  ;;  %vm4327_vm8 = vcmp.le.s32.totalorder %v2364_v36, 3 }
  0x89   : > { %4326 = vst [vmem:[#allocation20_spill] sm:$0xff] %v4325_v35  ;;  %vm2507_vm14 = vmand %vm4327_vm8, %vm642_vm11  ;;  %v581_v13 = vrot.slane %v580_v12, 1  ;;  %v593_v20 = vmax.f32 %v591_v34, %v592_v22  ;;  %vm646_vm13 = vcmp.gt.s32.totalorder %v2433_v60, 7  ;;  %vm4330_vm2 = vcmp.le.s32.totalorder %v2364_v36, 4 }
  0x8a   : > { %vm2514_vm0 = vmand %vm4330_vm2, %vm643_vm7  ;;  %v655_v31 = vsel %vm2462_vm15, %v1479_v2, -1e+30  ;;  %v617_v25 = vmax.f32 %v615_v38, %v616_v49  ;;  %vm4333_vm11 = vcmp.le.s32.totalorder %v2364_v36, 5  ;;  %v656_v22 = vsel %vm2471_vm10, %v1492_v5, -1e+30 }
  0x8b   : > { %vm2527_vm8 = vmand %vm4333_vm11, %vm644_vm1  ;;  %v657_v44 = vsel %vm2490_vm3, %v1498_v6, -1e+30  ;;  %vm4336_vm2 = vcmask 130048   ;;  %v2538_v26 = vmax.f32 %v540_v28, %v541_v54  ;;  %vm4338_vm7 = vcmp.le.s32.totalorder %v2364_v36, 6 }
  0x8c   : > { %v663_v2 = vsel %vm4336_vm2, %v655_v31, -inf  ;;  %vm2548_vm15 = vmand %vm4338_vm7, %vm645_vm9  ;;  %v658_v5 = vsel %vm2507_vm14, %v1503_v7, -1e+30  ;;  %v659_v6 = vsel %vm2514_vm0, %v1520_v10, -1e+30  ;;  %vm4341_vm1 = vcmp.le.s32.totalorder %v2364_v36, 7 }
  0x8d   : > { %4337 = vst [vmem:[#allocation21_spill] sm:$0xff] %v2538_v26  ;;  %v660_v31 = vsel %vm2527_vm8, %v1557_v17, -1e+30  ;;  %vm654_vm10 = vmand %vm4341_vm1, %vm646_vm13  ;;  %v661_v28 = vsel %vm2548_vm15, %v1580_v21, -1e+30  ;;  %v606_v49 = vmax.f32 %v604_v16, %v605_v62  ;;  %v2585_v16 = vmax.f32 %v567_v0, %v568_v33 }
  0x8e   : > { %vm4342_vm14 = vmmov %vm4336_vm2  ;;  %v662_v17 = vsel %vm654_vm10, %v1612_v27, -1e+30  ;;  %v2583_v27 = vmax.f32 %v554_v30, %v555_v32  ;;  %v2594_v3 = vmax.f32 %v580_v12, %v581_v13  ;;  %v594_v34 = vrot.slane %v593_v20, 1 }
  0x8f   : > { %v664_v7 = vsel %vm4342_vm14, %v656_v22, -inf  ;;  %vm4343_vm3 = vmmov %vm4336_vm2  ;;  %4350 = vst [vmem:[#allocation23_spill] sm:$0xff] %v2585_v16  ;;  %v618_v22 = vrot.slane %v617_v25, 2  ;;  %v4352_v32 = vstv %s2401_s26  ;;  %v4353_v0 = vmov 0  ;;  %s2962_s26 = sld [smem:[#allocation3 + %s1607_s22]] }
  0x90   : > { %v665_v24 = vsel %vm4343_vm3, %v657_v44, -inf  ;;  %vm4344_vm0 = vmmov %vm4336_vm2  ;;  %4349 = vst [vmem:[#allocation22_spill] sm:$0xff] %v2583_v27  ;;  %vm2598_vm2 = vcmp.eq.s32.totalorder %v4352_v32, 1  ;;  %v4356_v33 = vstv %s2421_s23  ;;  %v607_v38 = vrot.slane %v606_v49, 1  ;;  %s3404_s23 = sld [smem:[#allocation4 + %s1776_s14]] }
  0x91   : > { %v666_v10 = vsel %vm4344_vm0, %v658_v5, -inf  ;;  %vm4345_vm9 = vmmov %vm4344_vm0  ;;  %4351 = vst [vmem:[#allocation24_spill] sm:$0xff] %v2594_v3  ;;  %v4354_v0 = vsel %vm2598_vm2, 4294967295, %v4353_v0  ;;  %vm2604_vm7 = vcmp.eq.s32.totalorder %v4356_v33, 1  ;;  %vm4367_vm1 = vnez %v4154_v50 }
  0x92   : > { %v667_v60 = vsel %vm4345_vm9, %v659_v6, -inf  ;;  %vm4346_vm11 = vmmov %vm4344_vm0  ;;  %4355 = vst [vmem:[#allocation25_spill] sm:$0xff] %v4354_v0  ;;  %v4361_v6 = vstv %s2446_s24  ;;  %vm4368_vm10 = vnez %v4157_v52  ;;  %vm4369_vm14 = vnez %v4160_v55 }
  0x93   : > { %v669_v36 = vsel %vm4346_vm11, %v660_v31, -inf  ;;  %v668_v21 = vmax.f32 %v663_v2, %v667_v60  ;;  %vm4347_vm13 = vmmov %vm4344_vm0  ;;  %v4357_v2 = vmov 0  ;;  %vm2622_vm15 = vcmp.eq.s32.totalorder %v4361_v6, 1 }
  0x94   : > { %v670_v51 = vmax.f32 %v664_v7, %v669_v36  ;;  %v671_v44 = vsel %vm4347_vm13, %v661_v28, -inf  ;;  %vm4348_vm8 = vmmov %vm4344_vm0  ;;  %v4358_v2 = vsel %vm2604_vm7, 4294967295, %v4357_v2  ;;  %v4362_v31 = vmov 0 }
  0x95   : > { %v673_v62 = vsel %vm4348_vm8, %v662_v17, -inf  ;;  %v672_v54 = vmax.f32 %v665_v24, %v671_v44  ;;  %4359 = vst [vmem:[#allocation26_spill] sm:$0xff] %v4358_v2  ;;  %v4363_v31 = vsel %vm2622_vm15, 4294967295, %v4362_v31  ;;  %v2652_v44 = vmax.f32 %v606_v49, %v607_v38  ;;  %vm4370_vm3 = vmmov %vm4344_vm0 }
  0x96   : > { %v674_v41 = vmax.f32 %v666_v10, %v673_v62  ;;  %v675_v30 = vmax.f32 %v668_v21, %v670_v51  ;;  %4364 = vst [vmem:[#allocation27_spill] sm:$0xff] %v4363_v31  ;;  %v2647_v21 = vmax.f32 %v593_v20, %v594_v34  ;;  %v619_v51 = vmax.f32 %v617_v25, %v618_v22  ;;  %vm4371_vm9 = vmmov %vm4344_vm0 }
  0x97   : > { %4366 = vst [vmem:[#allocation29_spill] sm:$0xff] %v2652_v44  ;;  %vm4372_vm11 = vnez %v4168_v1  ;;  %vm4373_vm13 = vmmov %vm4344_vm0  ;;  %vm4374_vm8 = vnez %v4171_v14  ;;  %v689_v13 = vstv %s2682_s30  ;;  %v702_v60 = vstv %s2698_s16  ;;  %s2934_s16 = scalar_select %p843_p3, 1, 0 }
  0x98   : > { %v676_v5 = vmax.f32 %v672_v54, %v674_v41  ;;  %4365 = vst [vmem:[#allocation28_spill] sm:$0xff] %v2647_v21  ;;  %v620_v38 = vrot.slane %v619_v51, 1  ;;  %v715_v28 = vstv %s2706_s3  ;;  %vm2807_vm2 = vcmp.eq.s32.totalorder %v689_v13, 1  ;;  %v2897_v13 = vld [vmem:[%s4015_s4 + $0x18] sm:$0xff]  ;;  %s3121_s30 = scalar_select %p908_p1, 1, 0 }
  0x99   : > { %vm2811_vm7 = vcmp.eq.s32.totalorder %v702_v60, 1  ;;  %v4441_v3 = vmov 0  ;;  %v4474_v44 = vmov 0 }
  0x9a   : > { %v677_v17 = vmax.f32 %v675_v30, %v676_v5 }
  0x9c   : > { %v678_v62 = vsel %vm4367_vm1, %v677_v17, -1e+30  ;;  %v692_v54 = vsel %vm4368_vm10, %v677_v17, -1e+30  ;;  %v705_v20 = vsel %vm4369_vm14, %v677_v17, -1e+30 }
  0x9d   : > { %v679_v25 = vsel %vm4370_vm3, %v678_v62, -inf  ;;  %v693_v41 = vsel %vm4344_vm0, %v692_v54, -inf  ;;  %v706_v49 = vsel %vm4371_vm9, %v705_v20, -inf  ;;  %v718_v34 = vsel %vm4372_vm11, %v677_v17, -1e+30  ;;  %vm4376_vm9 = vmmov %vm4344_vm0 }
  0x9e   : > { %v680_v22 = vrot.slane %v679_v25, 4  ;;  %v694_v30 = vrot.slane %v693_v41, 4  ;;  %v707_v32 = vrot.slane %v706_v49, 4  ;;  %v719_v33 = vsel %vm4373_vm13, %v718_v34, -inf }
  0x9f   : > { %v720_v5 = vrot.slane %v719_v33, 4  ;;  %v731_v6 = vsel %vm4374_vm8, %v677_v17, -1e+30  ;;  %vm4375_vm3 = vnez %v4173_v19  ;;  %vm4377_vm13 = vnez %v4177_v61 }
  0xa0   : > { %v744_v62 = vsel %vm4375_vm3, %v677_v17, -1e+30  ;;  %v681_v54 = vmax.f32 %v679_v25, %v680_v22  ;;  %v695_v20 = vmax.f32 %v693_v41, %v694_v30  ;;  %v708_v34 = vmax.f32 %v706_v49, %v707_v32 }
  0xa1   : > { %v732_v24 = vsel %vm4344_vm0, %v731_v6, -inf  ;;  %v721_v7 = vmax.f32 %v719_v33, %v720_v5  ;;  %v745_v41 = vsel %vm4376_vm9, %v744_v62, -inf  ;;  %v757_v22 = vsel %vm4377_vm13, %v677_v17, -1e+30 }
  0xa2   : > { %v733_v25 = vrot.slane %v732_v24, 4  ;;  %v682_v30 = vrot.slane %v681_v54, 2  ;;  %v696_v12 = vrot.slane %v695_v20, 2  ;;  %v709_v49 = vrot.slane %v708_v34, 2 }
  0xa3   : > { %v746_v32 = vrot.slane %v745_v41, 4  ;;  %v722_v5 = vrot.slane %v721_v7, 2  ;;  %v758_v6 = vsel %vm4344_vm0, %v757_v22, -inf  ;;  %v2729_v62 = vmax.f32 %v619_v51, %v620_v38 }
  0xa4   : > { %v734_v17 = vmax.f32 %v732_v24, %v733_v25  ;;  %v2734_v33 = vstv %s2639_s27  ;;  %v683_v36 = vmax.f32 %v681_v54, %v682_v30  ;;  %v697_v24 = vmax.f32 %v695_v20, %v696_v12  ;;  %s3015_s27 = scalar_select %p869_p9, 1, 0 }
  0xa5   : > { %4378 = vst [vmem:[#allocation30_spill] sm:$0xff] %v2729_v62  ;;  %v710_v25 = vmax.f32 %v708_v34, %v709_v49  ;;  %v759_v10 = vrot.slane %v758_v6, 4  ;;  %v747_v35 = vmax.f32 %v745_v41, %v746_v32  ;;  %v2743_v51 = vstv %s2650_s11  ;;  %s3034_s11 = scalar_select %p882_p11, 1, 0 }
  0xa6   : > { %v2745_v38 = vmax.f32 %v721_v7, %v722_v5  ;;  %v735_v22 = vrot.slane %v734_v17, 2  ;;  %v684_v7 = vrot.slane %v683_v36, 1  ;;  %v698_v54 = vrot.slane %v697_v24, 1 }
  0xa7   : > { %v760_v12 = vmax.f32 %v758_v6, %v759_v10  ;;  %v711_v20 = vrot.slane %v710_v25, 1  ;;  %vm782_vm9 = vcmp.gt.s32.totalorder %v2743_v51, 0  ;;  %v748_v34 = vrot.slane %v747_v35, 2 }
  0xa8   : > { %v4380_v10 = vstv %s2579_s25  ;;  %v4381_v41 = vmov 0  ;;  %v4384_v30 = vstv %s2592_s8  ;;  %v4385_v49 = vmov 0  ;;  %s2987_s25 = sld [smem:[#allocation4 + %s1607_s22]] }
  0xa9   : > { %vm2779_vm5 = vcmp.eq.s32.totalorder %v4380_v10, 1  ;;  %vm2785_vm12 = vcmp.eq.s32.totalorder %v4384_v30, 1  ;;  %v724_v32 = vrot.slane %v2745_v38, 1  ;;  %v2790_v5 = vmax.f32 %v734_v17, %v735_v22  ;;  %s3004_s22 = scalar_select %p856_p5, 1, 0 }
  0xaa   : > { %v4382_v41 = vsel %vm2779_vm5, 4294967295, %v4381_v41  ;;  %v4386_v49 = vsel %vm2785_vm12, 4294967295, %v4385_v49  ;;  %vm783_vm0 = vcmp.gt.s32.totalorder %v2743_v51, 1  ;;  %vm4388_vm4 = vcmp.le.s32.totalorder %v2734_v33, 0 }
  0xab   : > { %4383 = vst [vmem:[#allocation31_spill] sm:$0xff] %v4382_v41  ;;  %vm2803_vm15 = vmand %vm4388_vm4, %vm782_vm9  ;;  %v4391_v17 = vmov 0  ;;  %v4394_v22 = vmov 0  ;;  %vm2815_vm13 = vcmp.eq.s32.totalorder %v715_v28, 1  ;;  %v4397_v10 = vmov 0 }
  0xac   : > { %4387 = vst [vmem:[#allocation32_spill] sm:$0xff] %v4386_v49  ;;  %v4392_v17 = vsel %vm2807_vm2, 4294967295, %v4391_v17  ;;  %v4395_v22 = vsel %vm2811_vm7, 4294967295, %v4394_v22  ;;  %v4398_v10 = vsel %vm2815_vm13, 4294967295, %v4397_v10  ;;  %v761_v30 = vrot.slane %v760_v12, 2 }
  0xad   : > { %4393 = vst [vmem:[#allocation33_spill] sm:$0xff] %v4392_v17  ;;  %vm784_vm6 = vcmp.gt.s32.totalorder %v2743_v51, 2  ;;  %vm785_vm4 = vcmp.gt.s32.totalorder %v2743_v51, 3  ;;  %vm4400_vm3 = vcmp.le.s32.totalorder %v2734_v33, 1  ;;  %v2832_v28 = vmax.f32 %v683_v36, %v684_v7 }
  0xae   : > { %4396 = vst [vmem:[#allocation34_spill] sm:$0xff] %v4395_v22  ;;  %vm2824_vm8 = vmand %vm4400_vm3, %vm783_vm0  ;;  %v2834_v60 = vmax.f32 %v697_v24, %v698_v54  ;;  %v2836_v26 = vmax.f32 %v710_v25, %v711_v20  ;;  %vm4406_vm14 = vcmp.le.s32.totalorder %v2734_v33, 2  ;;  %v2852_v36 = vmax.f32 %v747_v35, %v748_v34  ;;  %v2864_v25 = vld [vmem:[%s4015_s4] sm:$0xff]  ;;  %v2872_v35 = vld [vmem:[%s4015_s4 + $0x8] sm:$0xff]  ;;  %p3112_p3 = scmp.le.s32.totalorder %s2987_s25, %s2962_s26 }
  0xaf   : > { %4399 = vst [vmem:[#allocation35_spill] sm:$0xff] %v4398_v10  ;;  %vm2841_vm9 = vmand %vm4406_vm14, %vm784_vm6  ;;  %vm788_vm3 = vcmp.gt.s32.totalorder %v2743_v51, 6  ;;  %vm4409_vm0 = vcmp.le.s32.totalorder %v2734_v33, 3  ;;  %v798_v7 = vsel %vm2803_vm15, %v2864_v25, -1e+30  ;;  %vm789_vm6 = vcmp.gt.s32.totalorder %v2743_v51, 7 }
  0xb0   : > { %4403 = vst [vmem:[#allocation36_spill] sm:$0xff] %v2832_v28  ;;  %vm2857_vm11 = vmand %vm4409_vm0, %vm785_vm4  ;;  %v799_v54 = vsel %vm2824_vm8, %v2872_v35, -1e+30  ;;  %vm4412_vm14 = vcmp.gt.s32.totalorder %v2743_v51, 4  ;;  %vm4413_vm4 = vcmp.le.s32.totalorder %v2734_v33, 4  ;;  %v2889_v34 = vld [vmem:[%s4015_s4 + $0x10] sm:$0xff]  ;;  %v762_v63 = vmax.f32 %v760_v12, %v761_v30  ;;  %p973_p0 = por %p3112_p3, %p1646_p4  ;;  %p986_p5 = por %p3112_p3, %p1682_p6 }
  0xb1   : > { %4404 = vst [vmem:[#allocation37_spill] sm:$0xff] %v2834_v60  ;;  %vm2882_vm0 = vmand %vm4413_vm4, %vm4412_vm14  ;;  %v800_v6 = vsel %vm2841_vm9, %v2889_v34, -1e+30  ;;  %v801_v29 = vsel %vm2857_vm11, %v2897_v13, -1e+30  ;;  %vm4416_vm15 = vcmask 130048   ;;  %v2937_v12 = vmax.f32 %v2745_v38, %v724_v32  ;;  %p999_p9 = por %p3112_p3, %p1694_p7  ;;  %p1012_p11 = por %p3112_p3, %p1763_p10 }
  0xb2   : > { %4405 = vst [vmem:[#allocation38_spill] sm:$0xff] %v2836_v26  ;;  %v806_v48 = vsel %vm4416_vm15, %v798_v7, -inf  ;;  %v737_v27 = vrot.slane %v2790_v5, 1  ;;  %vm4417_vm8 = vcmp.gt.s32.totalorder %v2743_v51, 5  ;;  %vm4418_vm9 = vcmp.le.s32.totalorder %v2734_v33, 5  ;;  %v2923_v7 = vld [vmem:[%s4015_s4 + $0x20] sm:$0xff]  ;;  %vm4421_vm11 = vmmov %vm4416_vm15  ;;  %p1038_p1 = por %p3112_p3, %p1824_p13 }
  0xb3   : > { %vm2916_vm14 = vmand %vm4418_vm9, %vm4417_vm8  ;;  %v802_v18 = vsel %vm2882_vm0, %v2923_v7, -1e+30  ;;  %v807_v42 = vsel %vm4421_vm11, %v799_v54, -inf  ;;  %4422 = vst [vmem:[#allocation39_spill] sm:$0xff] %v2937_v12  ;;  %vm4423_vm4 = vcmp.le.s32.totalorder %v2734_v33, 6  ;;  %v2950_v54 = vld [vmem:[%s4015_s4 + $0x28] sm:$0xff]  ;;  %v3078_v26 = vstv %s2962_s26 }
  0xb4   : > { %vm2943_vm15 = vmand %vm4423_vm4, %vm788_vm3  ;;  %v803_v20 = vsel %vm2916_vm14, %v2950_v54, -1e+30  ;;  %vm4428_vm3 = vcmp.le.s32.totalorder %v2734_v33, 7  ;;  %v750_v31 = vrot.slane %v2852_v36, 1  ;;  %v2993_v30 = vld [vmem:[%s4015_s4 + $0x38] sm:$0xff]  ;;  %v763_v16 = vrot.slane %v762_v63, 1 }
  0xb5   : > { %vm4426_vm0 = vmmov %vm4421_vm11  ;;  %vm4459_vm2 = vcmp.le.s32.totalorder %v3078_v26, 0  ;;  %s3201_s7 = scalar_select %p973_p0, 1, 0  ;;  %v4490_v41 = vstv %s3015_s27  ;;  %v4491_v12 = vmov 0 }
  0xb6   : > { %v808_v38 = vsel %vm4426_vm0, %v800_v6, -inf  ;;  %vm4427_vm8 = vmmov %vm4426_vm0  ;;  %v2975_v6 = vld [vmem:[%s4015_s4 + $0x30] sm:$0xff]  ;;  %p1051_p0 = por %p3112_p3, %p1930_p2 }
  0xb7   : > { %v810_v32 = vsel %vm4427_vm8, %v802_v18, -inf  ;;  %vm2968_vm9 = vmand %vm4428_vm3, %vm789_vm6  ;;  %v804_v18 = vsel %vm2943_vm15, %v2975_v6, -1e+30  ;;  %vm4445_vm8 = vnez %v4160_v55  ;;  %s3373_s21 = scalar_select %p1038_p1, 1, 0 }
  0xb8   : > { %vm4431_vm14 = vmmov %vm4426_vm0  ;;  %v811_v51 = vmax.f32 %v806_v48, %v810_v32  ;;  %v805_v48 = vsel %vm2968_vm9, %v2993_v30, -1e+30  ;;  %v3007_v32 = vmax.f32 %v2790_v5, %v737_v27  ;;  %s3386_s26 = scalar_select %p1051_p0, 1, 0 }
  0xb9   : > { %v809_v24 = vsel %vm4431_vm14, %v801_v29, -inf  ;;  %vm4432_vm11 = vmmov %vm4426_vm0 }
  0xba   : > { %v812_v33 = vsel %vm4432_vm11, %v803_v20, -inf  ;;  %vm4433_vm6 = vmmov %vm4426_vm0  ;;  %4434 = vst [vmem:[#allocation40_spill] sm:$0xff] %v3007_v32  ;;  %vm4449_vm11 = vnez %v4168_v1 }
  0xbb   : > { %v813_v29 = vmax.f32 %v807_v42, %v812_v33  ;;  %v814_v20 = vsel %vm4433_vm6, %v804_v18, -inf  ;;  %vm4435_vm4 = vmmov %vm4426_vm0  ;;  %v4436_v42 = vstv %s2716_s19  ;;  %v4437_v18 = vmov 0  ;;  %s3049_s19 = scalar_select %p895_p8, 1, 0 }
  0xbc   : > { %v815_v0 = vmax.f32 %v808_v38, %v814_v20  ;;  %v816_v21 = vsel %vm4435_vm4, %v805_v48, -inf  ;;  %vm3019_vm15 = vcmp.eq.s32.totalorder %v4436_v42, 1  ;;  %v4440_v33 = vstv %s2726_s6  ;;  %vm4446_vm3 = vmmov %vm4435_vm4  ;;  %p1025_p8 = por %p3112_p3, %p1814_p12 }
  0xbd   : > { %v4438_v18 = vsel %vm3019_vm15, 4294967295, %v4437_v18  ;;  %vm3025_vm0 = vcmp.eq.s32.totalorder %v4440_v33, 1  ;;  %v817_v5 = vmax.f32 %v809_v24, %v816_v21  ;;  %v818_v27 = vmax.f32 %v811_v51, %v813_v29  ;;  %vm4447_vm9 = vmmov %vm4446_vm3 }
  0xbe   : > { %4439 = vst [vmem:[#allocation41_spill] sm:$0xff] %v4438_v18  ;;  %v4442_v3 = vsel %vm3025_vm0, 4294967295, %v4441_v3  ;;  %v3067_v51 = vmax.f32 %v2852_v36, %v750_v31  ;;  %v3069_v38 = vmax.f32 %v762_v63, %v763_v16  ;;  %v3087_v63 = vstv %s2987_s25  ;;  %vm4448_vm14 = vmmov %vm4446_vm3  ;;  %s3354_s3 = scalar_select %p1025_p8, 1, 0 }
  0xbf   : > { %4443 = vst [vmem:[#allocation42_spill] sm:$0xff] %v4442_v3  ;;  %v819_v42 = vmax.f32 %v815_v0, %v817_v5  ;;  %vm4450_vm6 = vmmov %vm4446_vm3  ;;  %vm4451_vm4 = vnez %v4171_v14 }
  0xc0   : > { %4444 = vst [vmem:[#allocation43_spill] sm:$0xff] %v3069_v38 }
  0xc1   : > { %v820_v29 = vmax.f32 %v818_v27, %v819_v42 }
  0xc3   : > { %v821_v33 = vsel %vm4367_vm1, %v820_v29, -1e+30  ;;  %v835_v48 = vsel %vm4368_vm10, %v820_v29, -1e+30  ;;  %v848_v31 = vsel %vm4445_vm8, %v820_v29, -1e+30 }
  0xc4   : > { %v822_v16 = vsel %vm4446_vm3, %v821_v33, -inf  ;;  %v836_v36 = vsel %vm4447_vm9, %v835_v48, -inf  ;;  %v849_v27 = vsel %vm4448_vm14, %v848_v31, -inf  ;;  %v861_v42 = vsel %vm4449_vm11, %v820_v29, -1e+30  ;;  %vm4453_vm9 = vmmov %vm4450_vm6 }
  0xc5   : > { %v823_v5 = vrot.slane %v822_v16, 4  ;;  %v837_v0 = vrot.slane %v836_v36, 4  ;;  %v850_v21 = vrot.slane %v849_v27, 4  ;;  %v862_v10 = vsel %vm4450_vm6, %v861_v42, -inf  ;;  %vm4454_vm14 = vmmov %vm4450_vm6 }
  0xc6   : > { %v863_v20 = vrot.slane %v862_v10, 4  ;;  %v874_v24 = vsel %vm4451_vm4, %v820_v29, -1e+30  ;;  %vm4452_vm3 = vnez %v4173_v19  ;;  %vm4455_vm6 = vnez %v4177_v61  ;;  %vm4456_vm13 = vmmov %vm4453_vm9 }
  0xc7   : > { %v887_v33 = vsel %vm4452_vm3, %v820_v29, -1e+30  ;;  %v824_v48 = vmax.f32 %v822_v16, %v823_v5  ;;  %v838_v60 = vmax.f32 %v836_v36, %v837_v0  ;;  %v851_v31 = vmax.f32 %v849_v27, %v850_v21 }
  0xc8   : > { %v875_v22 = vsel %vm4453_vm9, %v874_v24, -inf  ;;  %v864_v42 = vmax.f32 %v862_v10, %v863_v20  ;;  %v888_v17 = vsel %vm4454_vm14, %v887_v33, -inf  ;;  %v900_v62 = vsel %vm4455_vm6, %v820_v29, -1e+30 }
  0xc9   : > { %v876_v28 = vrot.slane %v875_v22, 4  ;;  %v825_v49 = vrot.slane %v824_v48, 2  ;;  %v839_v5 = vrot.slane %v838_v60, 2  ;;  %v852_v0 = vrot.slane %v851_v31, 2 }
  0xca   : > { %v889_v16 = vrot.slane %v888_v17, 4  ;;  %v865_v36 = vrot.slane %v864_v42, 2  ;;  %v901_v24 = vsel %vm4456_vm13, %v900_v62, -inf  ;;  %vm4458_vm9 = vcmp.gt.s32.totalorder %v3087_v63, 0 }
  0xcb   : > { %v877_v21 = vmax.f32 %v875_v22, %v876_v28  ;;  %v826_v10 = vmax.f32 %v824_v48, %v825_v49  ;;  %v840_v20 = vmax.f32 %v838_v60, %v839_v5  ;;  %v853_v27 = vmax.f32 %v851_v31, %v852_v0  ;;  %vm3142_vm12 = vmand %vm4459_vm2, %vm4458_vm9 }
  0xcc   : > { %v890_v29 = vmax.f32 %v888_v17, %v889_v16  ;;  %v866_v62 = vmax.f32 %v864_v42, %v865_v36  ;;  %v902_v28 = vrot.slane %v901_v24, 4  ;;  %v4462_v0 = vstv %s2772_s17  ;;  %s3231_s17 = scalar_select %p986_p5, 1, 0 }
  0xcd   : > { %v878_v22 = vrot.slane %v877_v21, 2  ;;  %v827_v33 = vrot.slane %v826_v10, 1  ;;  %v841_v17 = vrot.slane %v840_v20, 1  ;;  %v854_v31 = vrot.slane %v853_v27, 1 }
  0xce   : > { %v891_v49 = vrot.slane %v890_v29, 2  ;;  %v903_v48 = vmax.f32 %v901_v24, %v902_v28  ;;  %vm3152_vm7 = vcmp.eq.s32.totalorder %v4462_v0, 1  ;;  %v4463_v16 = vmov 0 }
  0xcf   : > { %v879_v60 = vmax.f32 %v877_v21, %v878_v22  ;;  %v4464_v16 = vsel %vm3152_vm7, 4294967295, %v4463_v16  ;;  %v4465_v36 = vstv %s2797_s18  ;;  %v4466_v21 = vmov 0  ;;  %s3249_s18 = scalar_select %p999_p9, 1, 0 }
  0xd0   : > { %vm3158_vm14 = vcmp.eq.s32.totalorder %v4465_v36, 1  ;;  %v867_v24 = vrot.slane %v866_v62, 1  ;;  %v892_v22 = vmax.f32 %v890_v29, %v891_v49  ;;  %v904_v28 = vrot.slane %v903_v48, 2 }
  0xd1   : > { %v4467_v21 = vsel %vm3158_vm14, 4294967295, %v4466_v21  ;;  %vm4468_vm9 = vcmp.gt.s32.totalorder %v3087_v63, 1  ;;  %vm4469_vm13 = vcmp.le.s32.totalorder %v3078_v26, 1  ;;  %v3171_v36 = vmax.f32 %v826_v10, %v827_v33 }
  0xd2   : > { %vm3167_vm5 = vmand %vm4469_vm13, %vm4468_vm9  ;;  %v4473_v42 = vstv %s2850_s20  ;;  %v4477_v29 = vstv %s2934_s16  ;;  %v4478_v49 = vmov 0  ;;  %vm4481_vm6 = vcmp.gt.s32.totalorder %v3087_v63, 2  ;;  %s3266_s20 = sld [smem:[#allocation3 + %s1776_s14]] }
  0xd3   : > { %4472 = vst [vmem:[#allocation44_spill] sm:$0xff] %v3171_v36  ;;  %vm3175_vm15 = vcmp.eq.s32.totalorder %v4473_v42, 1  ;;  %vm3181_vm0 = vcmp.eq.s32.totalorder %v4477_v29, 1  ;;  %vm4482_vm3 = vcmp.le.s32.totalorder %v3078_v26, 2  ;;  %v3203_v33 = vmax.f32 %v840_v20, %v841_v17  ;;  %s3333_s16 = scalar_select %p1012_p11, 1, 0 }
  0xd4   : > { %v4475_v44 = vsel %vm3175_vm15, 4294967295, %v4474_v44  ;;  %v4479_v49 = vsel %vm3181_vm0, 4294967295, %v4478_v49  ;;  %vm3192_vm4 = vmand %vm4482_vm3, %vm4481_vm6  ;;  %v4486_v42 = vstv %s3004_s22  ;;  %v4487_v29 = vmov 0 }
  0xd5   : > { %4476 = vst [vmem:[#allocation45_spill] sm:$0xff] %v4475_v44  ;;  %vm3207_vm13 = vcmp.eq.s32.totalorder %v4486_v42, 1  ;;  %vm3213_vm9 = vcmp.eq.s32.totalorder %v4490_v41, 1  ;;  %v880_v18 = vrot.slane %v879_v60, 1  ;;  %v905_v32 = vmax.f32 %v903_v48, %v904_v28 }
  0xd6   : > { %4480 = vst [vmem:[#allocation46_spill] sm:$0xff] %v4479_v49  ;;  %v4488_v29 = vsel %vm3207_vm13, 4294967295, %v4487_v29  ;;  %v4492_v12 = vsel %vm3213_vm9, 4294967295, %v4491_v12  ;;  %vm929_vm3 = vcmp.gt.s32.totalorder %v3087_v63, 4  ;;  %vm4494_vm6 = vcmp.gt.s32.totalorder %v3087_v63, 3 }
  0xd7   : > { %4485 = vst [vmem:[#allocation47_spill] sm:$0xff] %v3203_v33  ;;  %vm4495_vm2 = vcmp.le.s32.totalorder %v3078_v26, 3  ;;  %v3233_v41 = vmax.f32 %v853_v27, %v854_v31  ;;  %vm930_vm8 = vcmp.gt.s32.totalorder %v3087_v63, 5  ;;  %vm931_vm10 = vcmp.gt.s32.totalorder %v3087_v63, 6 }
  0xd8   : > { %4489 = vst [vmem:[#allocation48_spill] sm:$0xff] %v4488_v29  ;;  %vm3222_vm11 = vmand %vm4495_vm2, %vm4494_vm6  ;;  %vm932_vm1 = vcmp.gt.s32.totalorder %v3087_v63, 7  ;;  %vm4499_vm2 = vcmp.le.s32.totalorder %v3078_v26, 4  ;;  %v3251_v27 = vmax.f32 %v866_v62, %v867_v24  ;;  %v893_v48 = vrot.slane %v892_v22, 1  ;;  %p3435_p3 = scmp.le.s32.totalorder %s3404_s23, %s3266_s20 }
  0xd9   : > { %4493 = vst [vmem:[#allocation49_spill] sm:$0xff] %v4492_v12  ;;  %vm3240_vm6 = vmand %vm4499_vm2, %vm929_vm3  ;;  %vm4503_vm9 = vcmp.le.s32.totalorder %v3078_v26, 5  ;;  %v941_v28 = vsel %vm3142_vm12, %v2864_v25, -1e+30  ;;  %v942_v42 = vsel %vm3167_vm5, %v2872_v35, -1e+30  ;;  %v3285_v2 = vmax.f32 %v879_v60, %v880_v18 }
  0xda   : > { %4498 = vst [vmem:[#allocation50_spill] sm:$0xff] %v3233_v41  ;;  %vm3255_vm13 = vmand %vm4503_vm9, %vm930_vm8  ;;  %v906_v62 = vrot.slane %v905_v32, 1  ;;  %vm4506_vm3 = vcmp.le.s32.totalorder %v3078_v26, 6  ;;  %v943_v5 = vsel %vm3192_vm4, %v2889_v34, -1e+30  ;;  %vm4509_vm12 = vcmask 130048   ;;  %p1116_p5 = por %p3435_p3, %p1646_p4  ;;  %p1129_p9 = por %p3435_p3, %p1682_p6 }
  0xdb   : > { %4502 = vst [vmem:[#allocation51_spill] sm:$0xff] %v3251_v27  ;;  %vm3270_vm2 = vmand %vm4506_vm3, %vm931_vm10  ;;  %v944_v0 = vsel %vm3222_vm11, %v2897_v13, -1e+30  ;;  %v949_v3 = vsel %vm4509_vm12, %v941_v28, -inf  ;;  %vm4511_vm5 = vcmp.le.s32.totalorder %v3078_v26, 7  ;;  %v3318_v31 = vmax.f32 %v892_v22, %v893_v48  ;;  %p1142_p4 = por %p3435_p3, %p1694_p7  ;;  %p1155_p11 = por %p3435_p3, %p1763_p10 }
  0xdc   : > { %4510 = vst [vmem:[#allocation52_spill] sm:$0xff] %v3285_v2  ;;  %vm3291_vm10 = vmand %vm4511_vm5, %vm932_vm1  ;;  %v945_v20 = vsel %vm3240_vm6, %v2923_v7, -1e+30  ;;  %v946_v28 = vsel %vm3255_vm13, %v2950_v54, -1e+30  ;;  %v4522_v48 = vstv %s3034_s11  ;;  %vm4544_vm5 = vnez %v4171_v14  ;;  %p1168_p6 = por %p3435_p3, %p1814_p12  ;;  %p1181_p7 = por %p3435_p3, %p1824_p13 }
  0xdd   : > { %v947_v18 = vsel %vm3270_vm2, %v2975_v6, -1e+30  ;;  %v948_v26 = vsel %vm3291_vm10, %v2993_v30, -1e+30  ;;  %vm4514_vm1 = vmmov %vm4509_vm12  ;;  %4517 = vst [vmem:[#allocation53_spill] sm:$0xff] %v3318_v31  ;;  %vm3337_vm3 = vcmp.eq.s32.totalorder %v4522_v48, 1  ;;  %p1194_p10 = por %p3435_p3, %p1930_p2 }
  0xde   : > { %v950_v63 = vsel %vm4514_vm1, %v942_v42, -inf  ;;  %vm4515_vm8 = vmmov %vm4514_vm1  ;;  %s3464_s24 = scalar_select %p1116_p5, 1, 0 }
  0xdf   : > { %v951_v60 = vsel %vm4515_vm8, %v943_v5, -inf  ;;  %vm4516_vm11 = vmmov %vm4514_vm1  ;;  %vm4538_vm8 = vnez %v4157_v52  ;;  %s3539_s28 = scalar_select %p1129_p9, 1, 0 }
  0xe0   : > { %v952_v17 = vsel %vm4516_vm11, %v944_v0, -inf  ;;  %vm4518_vm4 = vmmov %vm4514_vm1  ;;  %vm4539_vm11 = vnez %v4160_v55  ;;  %s3572_s9 = scalar_select %p1142_p4, 1, 0 }
  0xe1   : > { %v953_v24 = vsel %vm4518_vm4, %v945_v20, -inf  ;;  %vm4519_vm13 = vmmov %vm4514_vm1  ;;  %v4523_v20 = vmov 0  ;;  %s3591_s10 = scalar_select %p1155_p11, 1, 0 }
  0xe2   : > { %v955_v10 = vsel %vm4519_vm13, %v946_v28, -inf  ;;  %vm4520_vm9 = vmmov %vm4514_vm1  ;;  %v954_v42 = vmax.f32 %v949_v3, %v953_v24  ;;  %v4524_v20 = vsel %vm3337_vm3, 4294967295, %v4523_v20  ;;  %v4526_v28 = vstv %s3049_s19  ;;  %s3655_s13 = scalar_select %p1168_p6, 1, 0 }
  0xe3   : > { %v957_v57 = vsel %vm4520_vm9, %v947_v18, -inf  ;;  %v956_v5 = vmax.f32 %v950_v63, %v955_v10  ;;  %vm4521_vm6 = vmmov %vm4514_vm1  ;;  %4525 = vst [vmem:[#allocation54_spill] sm:$0xff] %v4524_v20  ;;  %vm3343_vm2 = vcmp.eq.s32.totalorder %v4526_v28, 1  ;;  %v4527_v3 = vmov 0  ;;  %s3664_s25 = scalar_select %p1181_p7, 1, 0 }
  0xe4   : > { %v958_v0 = vmax.f32 %v951_v60, %v957_v57  ;;  %v959_v22 = vsel %vm4521_vm6, %v948_v26, -inf  ;;  %v4528_v3 = vsel %vm3343_vm2, 4294967295, %v4527_v3  ;;  %v3347_v57 = vmax.f32 %v905_v32, %v906_v62  ;;  %vm4540_vm13 = vmmov %vm4518_vm4  ;;  %s3677_s29 = scalar_select %p1194_p10, 1, 0 }
  0xe5   : > { %4529 = vst [vmem:[#allocation55_spill] sm:$0xff] %v4528_v3  ;;  %v960_v18 = vmax.f32 %v952_v17, %v959_v22  ;;  %v4531_v60 = vstv %s3121_s30  ;;  %v4532_v32 = vmov 0  ;;  %v961_v62 = vmax.f32 %v954_v42, %v956_v5  ;;  %vm4541_vm9 = vmmov %vm4518_vm4  ;;  %p119_p12 = scmp.lt.s32.totalorder %s1438_s2, 7 }
  0xe6   : > { %4530 = vst [vmem:[#allocation56_spill] sm:$0xff] %v3347_v57  ;;  %vm3364_vm12 = vcmp.eq.s32.totalorder %v4531_v60, 1  ;;  %v3389_v42 = vstv %s3266_s20  ;;  %v975_v60 = vstv %s3201_s7  ;;  %v988_v5 = vstv %s3231_s17  ;;  %vm4543_vm10 = vmmov %vm4518_vm4 }
  0xe7   : > { %v4533_v32 = vsel %vm3364_vm12, 4294967295, %v4532_v32  ;;  %v962_v10 = vmax.f32 %v958_v0, %v960_v18  ;;  %v1001_v24 = vstv %s3249_s18  ;;  %vm4537_vm1 = vnez %v4154_v50  ;;  %s4798_s2 = smov (!%p119_p12, %s1438_s2), 7 }
  0xe8   : > { %4534 = vst [vmem:[#allocation57_spill] sm:$0xff] %v4533_v32  ;;  %vm4542_vm6 = vnez %v4168_v1  ;;  %vm4545_vm12 = vnez %v4173_v19  ;;  %vm3480_vm15 = vcmp.eq.s32.totalorder %v1001_v24, 1  ;;  %vm4563_vm7 = vcmp.le.s32.totalorder %v3389_v42, 0  ;;  %s1307_s0 = smul.u32 56, %s4798_s2 }
  0xe9   : > { %v963_v18 = vmax.f32 %v961_v62, %v962_v10 }
  0xea   : > { %s3795_s8 = scalar_lea.vmem %s4016_s5, %s1307_s0 }
  0xeb   : > { %v964_v0 = vsel %vm4537_vm1, %v963_v18, -1e+30  ;;  %v978_v48 = vsel %vm4538_vm8, %v963_v18, -1e+30  ;;  %v991_v26 = vsel %vm4539_vm11, %v963_v18, -1e+30 }
  0xec   : > { %v965_v62 = vsel %vm4518_vm4, %v964_v0, -inf  ;;  %v979_v10 = vsel %vm4540_vm13, %v978_v48, -inf  ;;  %v992_v28 = vsel %vm4541_vm9, %v991_v26, -inf  ;;  %v1004_v63 = vsel %vm4542_vm6, %v963_v18, -1e+30  ;;  %vm4548_vm13 = vmmov %vm4518_vm4 }
  0xed   : > { %v966_v22 = vrot.slane %v965_v62, 4  ;;  %v980_v17 = vrot.slane %v979_v10, 4  ;;  %v993_v12 = vrot.slane %v992_v28, 4  ;;  %v1005_v41 = vsel %vm4543_vm10, %v1004_v63, -inf  ;;  %vm4547_vm10 = vmmov %vm4518_vm4 }
  0xee   : > { %v1006_v29 = vrot.slane %v1005_v41, 4  ;;  %v1017_v57 = vsel %vm4544_vm5, %v963_v18, -1e+30  ;;  %v1030_v27 = vsel %vm4545_vm12, %v963_v18, -1e+30  ;;  %vm4549_vm9 = vnez %v4177_v61 }
  0xef   : > { %v967_v26 = vmax.f32 %v965_v62, %v966_v22  ;;  %v981_v0 = vmax.f32 %v979_v10, %v980_v17  ;;  %v994_v48 = vmax.f32 %v992_v28, %v993_v12  ;;  %v1018_v63 = vsel %vm4547_vm10, %v1017_v57, -inf }
  0xf0   : > { %v1007_v32 = vmax.f32 %v1005_v41, %v1006_v29  ;;  %v1019_v33 = vrot.slane %v1018_v63, 4  ;;  %v1031_v49 = vsel %vm4548_vm13, %v1030_v27, -inf  ;;  %v1043_v36 = vsel %vm4549_vm9, %v963_v18, -1e+30 }
  0xf1   : > { %v968_v44 = vrot.slane %v967_v26, 2  ;;  %v982_v2 = vrot.slane %v981_v0, 2  ;;  %v995_v20 = vrot.slane %v994_v48, 2  ;;  %v1032_v31 = vrot.slane %v1031_v49, 4 }
  0xf2   : > { %v1008_v3 = vrot.slane %v1007_v32, 2  ;;  %v1020_v38 = vmax.f32 %v1018_v63, %v1019_v33  ;;  %v1044_v17 = vsel %vm4518_vm4, %v1043_v36, -inf  ;;  %v3445_v12 = vstv %s3404_s23 }
  0xf3   : > { %v969_v29 = vmax.f32 %v967_v26, %v968_v44  ;;  %v983_v41 = vmax.f32 %v981_v0, %v982_v2  ;;  %v996_v27 = vmax.f32 %v994_v48, %v995_v20  ;;  %v1033_v57 = vmax.f32 %v1031_v49, %v1032_v31  ;;  %v4774_v31 = vld [vmem:[#allocation51_spill] sm:$0xff] }
  0xf4   : > { %v1009_v22 = vmax.f32 %v1007_v32, %v1008_v3  ;;  %v1021_v28 = vrot.slane %v1020_v38, 2  ;;  %v1045_v18 = vrot.slane %v1044_v17, 4  ;;  %vm3466_vm4 = vcmp.eq.s32.totalorder %v975_v60, 1 }
  0xf5   : > { %v970_v33 = vrot.slane %v969_v29, 1  ;;  %v1034_v36 = vrot.slane %v1033_v57, 2  ;;  %v984_v2 = vrot.slane %v983_v41, 1  ;;  %vm3470_vm10 = vcmp.eq.s32.totalorder %v988_v5, 1 }
  0xf6   : > { %v1022_v44 = vmax.f32 %v1020_v38, %v1021_v28  ;;  %v1046_v49 = vmax.f32 %v1044_v17, %v1045_v18  ;;  %v997_v3 = vrot.slane %v996_v27, 1  ;;  %v1010_v5 = vrot.slane %v1009_v22, 1 }
  0xf7   : > { %v1035_v38 = vmax.f32 %v1033_v57, %v1034_v36  ;;  %v4556_v60 = vstv %s3333_s16  ;;  %v4557_v62 = vmov 0  ;;  %v4559_v10 = vstv %s3354_s3 }
  0xf8   : > { %vm3486_vm3 = vcmp.eq.s32.totalorder %v4556_v60, 1  ;;  %vm3492_vm2 = vcmp.eq.s32.totalorder %v4559_v10, 1  ;;  %v4560_v26 = vmov 0  ;;  %v1047_v0 = vrot.slane %v1046_v49, 2 }
  0xf9   : > { %v4558_v62 = vsel %vm3486_vm3, 4294967295, %v4557_v62  ;;  %v4561_v26 = vsel %vm3492_vm2, 4294967295, %v4560_v26  ;;  %vm4562_vm14 = vcmp.gt.s32.totalorder %v3445_v12, 0  ;;  %v3510_v48 = vmax.f32 %v969_v29, %v970_v33 }
  0xfa   : > { %vm3502_vm9 = vmand %vm4563_vm7, %vm4562_vm14  ;;  %v1023_v63 = vrot.slane %v1022_v44, 1  ;;  %v4566_v17 = vstv %s3373_s21  ;;  %v4567_v57 = vmov 0  ;;  %v4569_v28 = vstv %s3386_s26 }
  0xfb   : > { %vm3514_vm13 = vcmp.eq.s32.totalorder %v4566_v17, 1  ;;  %vm3520_vm0 = vcmp.eq.s32.totalorder %v4569_v28, 1  ;;  %v4570_v18 = vmov 0  ;;  %vm4572_vm12 = vcmp.gt.s32.totalorder %v3445_v12, 1 }
  0xfc   : > { %v4568_v57 = vsel %vm3514_vm13, 4294967295, %v4567_v57  ;;  %v4571_v18 = vsel %vm3520_vm0, 4294967295, %v4570_v18  ;;  %vm4573_vm5 = vcmp.le.s32.totalorder %v3389_v42, 1  ;;  %v3541_v33 = vmax.f32 %v983_v41, %v984_v2 }
  0xfd   : > { %vm3530_vm6 = vmand %vm4573_vm5, %vm4572_vm12  ;;  %v1036_v36 = vrot.slane %v1035_v38, 1  ;;  %v1048_v60 = vmax.f32 %v1046_v49, %v1047_v0  ;;  %vm1071_vm14 = vcmp.gt.s32.totalorder %v3445_v12, 3  ;;  %vm4576_vm7 = vcmp.gt.s32.totalorder %v3445_v12, 2 }
  0xfe   : > { %vm4577_vm12 = vcmp.le.s32.totalorder %v3389_v42, 2  ;;  %v3556_v17 = vmax.f32 %v996_v27, %v997_v3  ;;  %vm1072_vm11 = vcmp.gt.s32.totalorder %v3445_v12, 4  ;;  %vm1073_vm8 = vcmp.gt.s32.totalorder %v3445_v12, 5 }
  0xff   : > { %vm3548_vm5 = vmand %vm4577_vm12, %vm4576_vm7  ;;  %vm4580_vm0 = vcmp.le.s32.totalorder %v3389_v42, 3  ;;  %v3574_v27 = vmax.f32 %v1009_v22, %v1010_v5  ;;  %v1049_v2 = vrot.slane %v1048_v60, 1  ;;  %vm1075_vm7 = vcmp.gt.s32.totalorder %v3445_v12, 7 }
 0x100   : > { %vm3563_vm13 = vmand %vm4580_vm0, %vm1071_vm14  ;;  %vm4583_vm12 = vcmp.le.s32.totalorder %v3389_v42, 4  ;;  %v1084_v3 = vsel %vm3502_vm9, %v2864_v25, -1e+30  ;;  %v3593_v22 = vmax.f32 %v1022_v44, %v1023_v63  ;;  %vm4586_vm0 = vcmp.le.s32.totalorder %v3389_v42, 5 }
 0x101   : > { %vm3579_vm1 = vmand %vm4583_vm12, %vm1072_vm11  ;;  %v1085_v0 = vsel %vm3530_vm6, %v2872_v35, -1e+30  ;;  %v1086_v25 = vsel %vm3548_vm5, %v2889_v34, -1e+30  ;;  %vm4589_vm11 = vcmask 130048   ;;  %v3612_v44 = vmax.f32 %v1035_v38, %v1036_v36 }
 0x102   : > { %vm3597_vm14 = vmand %vm4586_vm0, %vm1073_vm8  ;;  %v1092_v24 = vsel %vm4589_vm11, %v1084_v3, -inf  ;;  %vm4590_vm8 = vcmp.gt.s32.totalorder %v3445_v12, 6  ;;  %vm4591_vm9 = vcmp.le.s32.totalorder %v3389_v42, 6  ;;  %v1087_v35 = vsel %vm3563_vm13, %v2897_v13, -1e+30 }
 0x103   : > { %vm3618_vm12 = vmand %vm4591_vm9, %vm4590_vm8  ;;  %v1088_v34 = vsel %vm3579_vm1, %v2923_v7, -1e+30  ;;  %v1089_v38 = vsel %vm3597_vm14, %v2950_v54, -1e+30  ;;  %vm4594_vm6 = vcmp.le.s32.totalorder %v3389_v42, 7  ;;  %v3645_v29 = vmax.f32 %v1048_v60, %v1049_v2 }
 0x104   : > { %vm1083_vm5 = vmand %vm4594_vm6, %vm1075_vm7  ;;  %v1090_v13 = vsel %vm3618_vm12, %v2975_v6, -1e+30  ;;  %vm4602_vm9 = vnez %v4568_v57  ;;  %vm4603_vm12 = vnez %v4571_v18  ;;  %vm4125_vm6 = vcmask 1040384  }
 0x105   : > { %vm4595_vm13 = vmmov %vm4589_vm11  ;;  %v1091_v36 = vsel %vm1083_vm5, %v2993_v30, -1e+30  ;;  %v977_v30 = vsel %vm3466_vm4, 0.0, %v3510_v48  ;;  %v1042_v63 = vsel %vm4602_vm9, 0.0, %v3612_v44  ;;  %vm4604_vm5 = vnez %v4186_v9 }
 0x106   : > { %v1093_v7 = vsel %vm4595_vm13, %v1085_v0, -inf  ;;  %vm4596_vm1 = vmmov %vm4589_vm11  ;;  %vm4606_vm13 = vnez %v4184_v8  ;;  %vm4651_vm2 = vcmask 1040384   ;;  %v4777_v18 = vsel %vm3470_vm10, 0.0, %v3541_v33 }
 0x107   : > { %v1094_v28 = vsel %vm4596_vm1, %v1086_v25, -inf  ;;  %vm4597_vm0 = vmmov %vm4596_vm1  ;;  %vm4128_vm1 = vcmask 1041408  }
 0x108   : > { %v1095_v54 = vsel %vm4597_vm0, %v1087_v35, -inf  ;;  %vm4598_vm14 = vmmov %vm4597_vm0  ;;  %v1055_v35 = vsel %vm4603_vm12, 0.0, %v3645_v29  ;;  %vm4779_vm12 = vcmask 1041408  }
 0x109   : > { %v1096_v12 = vsel %vm4598_vm14, %v1088_v34, -inf  ;;  %vm4599_vm11 = vmmov %vm4597_vm0 }
 0x10a   : > { %v1098_v42 = vsel %vm4599_vm11, %v1089_v38, -inf  ;;  %v1097_v6 = vmax.f32 %v1092_v24, %v1096_v12  ;;  %vm4600_vm7 = vmmov %vm4597_vm0  ;;  %v1118_v38 = vstv %s3464_s24  ;;  %v1183_v12 = vstv %s3664_s25 }
 0x10b   : > { %v1099_v10 = vmax.f32 %v1093_v7, %v1098_v42  ;;  %v1100_v41 = vsel %vm4600_vm7, %v1090_v13, -inf  ;;  %vm4601_vm8 = vmmov %vm4597_vm0  ;;  %v1131_v13 = vstv %s3539_s28  ;;  %v1144_v7 = vstv %s3572_s9 }
 0x10c   : > { %v1102_v60 = vsel %vm4601_vm8, %v1091_v36, -inf  ;;  %v1101_v49 = vmax.f32 %v1094_v28, %v1100_v41  ;;  %v1157_v28 = vstv %s3591_s10  ;;  %v1196_v42 = vstv %s3677_s29 }
 0x10d   : > { %v1103_v3 = vmax.f32 %v1095_v54, %v1102_v60  ;;  %v1104_v24 = vmax.f32 %v1097_v6, %v1099_v10  ;;  %v1170_v54 = vstv %s3655_s13  ;;  %v4605_v6 = vsel %vm4604_vm5, 0.0, %v2002_v45 }
 0x10e   : > { %v4607_v10 = vsel %vm4606_vm13, 0.0, %v1992_v39  ;;  %vm4126_vm0 = vcmask 1042432   ;;  %vm4608_vm11 = vnez %v4154_v50  ;;  %vm4609_vm7 = vnez %v4157_v52  ;;  %vm4613_vm13 = vmmov %vm4598_vm14 }
 0x10f   : > { %v1105_v34 = vmax.f32 %v1101_v49, %v1103_v3  ;;  %v1200_v41 = vsel %vm4125_vm6, %v4607_v10, %v4605_v6  ;;  %vm4610_vm8 = vnez %v4160_v55  ;;  %vm4611_vm5 = vnez %v4192_v15  ;;  %vm4614_vm6 = vmmov %vm4613_vm13 }
 0x110   : > { %v4612_v8 = vsel %vm4611_vm5, 0.0, %v2005_v46  ;;  %vm4615_vm14 = vmmov %vm4614_vm6  ;;  %vm4620_vm5 = vnez %v4171_v14 }
 0x111   : > { %v1106_v36 = vmax.f32 %v1104_v24, %v1105_v34  ;;  %v1202_v39 = vsel %vm4128_vm1, %v1200_v41, %v4612_v8  ;;  %vm4648_vm1 = vnez %v4271_v23 }
 0x113   : > { %v1107_v60 = vsel %vm4608_vm11, %v1106_v36, -1e+30  ;;  %v1121_v49 = vsel %vm4609_vm7, %v1106_v36, -1e+30  ;;  %v1134_v9 = vsel %vm4610_vm8, %v1106_v36, -1e+30  ;;  %vm4616_vm11 = vnez %v4168_v1  ;;  %vm4617_vm7 = vmmov %vm4614_vm6 }
 0x114   : > { %v1108_v45 = vsel %vm4613_vm13, %v1107_v60, -inf  ;;  %v1122_v3 = vsel %vm4614_vm6, %v1121_v49, -inf  ;;  %v1135_v24 = vsel %vm4615_vm14, %v1134_v9, -inf  ;;  %v1147_v50 = vsel %vm4616_vm11, %v1106_v36, -1e+30 }
 0x115   : > { %v1109_v52 = vrot.slane %v1108_v45, 4  ;;  %v1123_v34 = vrot.slane %v1122_v3, 4  ;;  %v1136_v6 = vrot.slane %v1135_v24, 4  ;;  %v1148_v55 = vsel %vm4617_vm7, %v1147_v50, -inf }
 0x116   : > { %vm3728_vm8 = vcmp.eq.s32.totalorder %v1118_v38, 1  ;;  %v1149_v46 = vrot.slane %v1148_v55, 4  ;;  %v1160_v10 = vsel %vm4620_vm5, %v1106_v36, -1e+30  ;;  %vm4621_vm6 = vnez %v4173_v19 }
 0x117   : > { %v1173_v41 = vsel %vm4621_vm6, %v1106_v36, -1e+30  ;;  %vm4622_vm14 = vnez %v4216_v43  ;;  %v1110_v49 = vmax.f32 %v1108_v45, %v1109_v52  ;;  %v1124_v38 = vmax.f32 %v1122_v3, %v1123_v34  ;;  %vm4630_vm6 = vmmov %vm4617_vm7 }
 0x118   : > { %v4623_v1 = vsel %vm4622_vm14, 0.0, %v2016_v53  ;;  %vm3741_vm13 = vcmp.eq.s32.totalorder %v1131_v13, 1  ;;  %v1137_v8 = vmax.f32 %v1135_v24, %v1136_v6  ;;  %vm3745_vm11 = vcmp.eq.s32.totalorder %v1144_v7, 1 }
 0x119   : > { %v1204_v60 = vsel %vm4126_vm0, %v1202_v39, %v4623_v1  ;;  %v1161_v19 = vsel %vm4617_vm7, %v1160_v10, -inf  ;;  %v1150_v43 = vmax.f32 %v1148_v55, %v1149_v46  ;;  %vm3750_vm5 = vcmp.eq.s32.totalorder %v1157_v28, 1  ;;  %vm4632_vm7 = vmmov %vm4630_vm6 }
 0x11a   : > { %v1162_v39 = vrot.slane %v1161_v19, 4  ;;  %v1174_v45 = vsel %vm4630_vm6, %v1173_v41, -inf  ;;  %vm4631_vm14 = vnez %v4177_v61  ;;  %v1111_v3 = vrot.slane %v1110_v49, 2 }
 0x11b   : > { %v1186_v13 = vsel %vm4631_vm14, %v1106_v36, -1e+30  ;;  %v1125_v50 = vrot.slane %v1124_v38, 2  ;;  %v1138_v24 = vrot.slane %v1137_v8, 2  ;;  %v1175_v7 = vrot.slane %v1174_v45, 4 }
 0x11c   : > { %v1151_v52 = vrot.slane %v1150_v43, 2  ;;  %v1163_v34 = vmax.f32 %v1161_v19, %v1162_v39  ;;  %v1187_v28 = vsel %vm4632_vm7, %v1186_v13, -inf  ;;  %vm4633_vm0 = vnez %v4218_v58 }
 0x11d   : > { %v4634_v6 = vsel %vm4633_vm0, 0.0, %v2018_v56  ;;  %vm4635_vm6 = vcmask 1043456   ;;  %v1112_v61 = vmax.f32 %v1110_v49, %v1111_v3  ;;  %v1126_v36 = vmax.f32 %v1124_v38, %v1125_v50 }
 0x11e   : > { %v1206_v55 = vsel %vm4635_vm6, %v1204_v60, %v4634_v6  ;;  %v1139_v46 = vmax.f32 %v1137_v8, %v1138_v24  ;;  %v1176_v10 = vmax.f32 %v1174_v45, %v1175_v7  ;;  %v1152_v41 = vmax.f32 %v1150_v43, %v1151_v52  ;;  %v4658_v6 = vld [vmem:[#allocation23_spill] sm:$0xff] }
 0x11f   : > { %v1164_v1 = vrot.slane %v1163_v34, 2  ;;  %v1188_v25 = vrot.slane %v1187_v28, 4  ;;  %vm4127_vm14 = vcmask 1044480   ;;  %v1113_v0 = vrot.slane %v1112_v61, 1 }
 0x120   : > { %v1127_v5 = vrot.slane %v1126_v36, 1  ;;  %v1140_v2 = vrot.slane %v1139_v46, 1  ;;  %v1177_v19 = vrot.slane %v1176_v10, 2  ;;  %v1153_v58 = vrot.slane %v1152_v41, 1 }
 0x121   : > { %v1165_v39 = vmax.f32 %v1163_v34, %v1164_v1  ;;  %v1189_v56 = vmax.f32 %v1187_v28, %v1188_v25  ;;  %vm4636_vm0 = vnez %v4220_v47  ;;  %v1114_v38 = vmax.f32 %v1112_v61, %v1113_v0  ;;  %v4656_v28 = vld [vmem:[#allocation25_spill] sm:$0xff] }
 0x122   : > { %v4637_v60 = vsel %vm4636_vm0, 0.0, %v2032_v59  ;;  %v1128_v8 = vmax.f32 %v1126_v36, %v1127_v5  ;;  %v3774_v43 = vmax.f32 %v1139_v46, %v1140_v2  ;;  %v1178_v45 = vmax.f32 %v1176_v10, %v1177_v19  ;;  %v4661_v36 = vld [vmem:[#allocation8_spill] sm:$0xff]  ;;  %v4665_v10 = vld [vmem:[#allocation11_spill] sm:$0xff] }
 0x123   : > { %v1208_v49 = vsel %vm4127_vm14, %v1206_v55, %v4637_v60  ;;  %v3776_v13 = vmax.f32 %v1152_v41, %v1153_v58  ;;  %v1166_v3 = vrot.slane %v1165_v39, 1  ;;  %v1190_v50 = vrot.slane %v1189_v56, 2  ;;  %v4667_v41 = vld [vmem:[#allocation13_spill] sm:$0xff]  ;;  %v4672_v60 = vld [vmem:[#allocation14_spill] sm:$0xff] }
 0x124   : > { %vm4132_vm7 = vcmask 1045504   ;;  %v1120_v25 = vsel %vm3728_vm8, 0.0, %v1114_v38  ;;  %vm3782_vm6 = vcmp.eq.s32.totalorder %v1170_v54, 1  ;;  %v1179_v59 = vrot.slane %v1178_v45, 1  ;;  %v4675_v38 = vld [vmem:[#allocation27_spill] sm:$0xff] }
 0x125   : > { %vm3788_vm0 = vcmp.eq.s32.totalorder %v1196_v42, 1  ;;  %v1133_v2 = vsel %vm3741_vm13, 0.0, %v1128_v8  ;;  %v1146_v0 = vsel %vm3745_vm11, 0.0, %v3774_v43  ;;  %vm3804_vm8 = vcmp.eq.s32.totalorder %v1183_v12, 1  ;;  %v4649_v12 = vld [vmem:[#allocation10_spill] sm:$0xff]  ;;  %v4677_v8 = vld [vmem:[#allocation28_spill] sm:$0xff] }
 0x126   : > { %v1191_v42 = vmax.f32 %v1189_v56, %v1190_v50  ;;  %vm4644_vm14 = vnez %v4258_v40  ;;  %v1159_v9 = vsel %vm3750_vm5, 0.0, %v3776_v13  ;;  %vm4131_vm13 = vcmask 1046528   ;;  %v4652_v40 = vld [vmem:[#allocation26_spill] sm:$0xff]  ;;  %vm4660_vm5 = vmmov %vm4651_vm2  ;;  %v4670_v56 = vld [vmem:[#allocation12_spill] sm:$0xff] }
 0x127   : > { %v4645_v15 = vsel %vm4644_vm14, 0.0, %v2313_v11  ;;  %vm4646_vm11 = vnez %v4284_v4  ;;  %v4650_v7 = vsel %vm4648_vm1, 0.0, %v4649_v12  ;;  %vm4653_vm3 = vnez %v4652_v40  ;;  %v4654_v11 = vld [vmem:[#allocation24_spill] sm:$0xff] }
 0x128   : > { %v1210_v24 = vsel %vm4132_vm7, %v1208_v49, %v4645_v15  ;;  %v4647_v14 = vsel %vm4646_vm11, 0.0, %v2352_v37  ;;  %v4655_v34 = vsel %vm4653_vm3, 0.0, %v4654_v11  ;;  %vm4657_vm14 = vnez %v4656_v28  ;;  %v4663_v37 = vld [vmem:[#allocation9_spill] sm:$0xff]  ;;  %v4682_v50 = vld [vmem:[#allocation40_spill] sm:$0xff] }
 0x129   : > { %v1213_v52 = vsel %vm4651_vm2, %v4650_v7, %v4647_v14  ;;  %v4659_v53 = vsel %vm4657_vm14, 0.0, %v4658_v6  ;;  %v1167_v61 = vmax.f32 %v1165_v39, %v1166_v3  ;;  %v1192_v4 = vrot.slane %v1191_v42, 1  ;;  %v4680_v3 = vld [vmem:[#allocation42_spill] sm:$0xff]  ;;  %v4686_v14 = vld [vmem:[#allocation39_spill] sm:$0xff]  ;;  %v4690_v7 = vld [vmem:[#allocation17_spill] sm:$0xff] }
 0x12a   : > { %v1220_v55 = vsel %vm4660_vm5, %v4659_v53, %v4655_v34  ;;  %vm4662_vm11 = vnez %v4661_v36  ;;  %vm4666_vm2 = vnez %v4665_v10  ;;  %vm4669_vm1 = vcmask 1041408   ;;  %v4695_v34 = vld [vmem:[#allocation31_spill] sm:$0xff]  ;;  %v4697_v28 = vld [vmem:[#allocation29_spill] sm:$0xff]  ;;  %v4710_v10 = vld [vmem:[#allocation30_spill] sm:$0xff] }
 0x12b   : > { %v4664_v23 = vsel %vm4662_vm11, 0.0, %v4663_v37  ;;  %v4668_v1 = vsel %vm4666_vm2, 0.0, %v4667_v41  ;;  %v1180_v58 = vmax.f32 %v1178_v45, %v1179_v59  ;;  %vm4671_vm3 = vnez %v4670_v56  ;;  %vm4679_vm11 = vmmov %vm4669_vm1  ;;  %v4703_v37 = vld [vmem:[#allocation18_spill] sm:$0xff]  ;;  %v4715_v56 = vld [vmem:[#allocation55_spill] sm:$0xff] }
 0x12c   : > { %v1212_v46 = vsel %vm4131_vm13, %v1210_v24, %v4664_v23  ;;  %v1214_v19 = vsel %vm4669_vm1, %v1213_v52, %v4668_v1  ;;  %v4673_v49 = vsel %vm4671_vm3, 0.0, %v4672_v60  ;;  %vm4674_vm14 = vcmask 1042432   ;;  %v4684_v24 = vld [vmem:[#allocation41_spill] sm:$0xff]  ;;  %v4692_v52 = vld [vmem:[#allocation15_spill] sm:$0xff] }
 0x12d   : > { %v1215_v39 = vsel %vm4674_vm14, %v1214_v19, %v4673_v49  ;;  %vm4676_vm5 = vnez %v4675_v38  ;;  %vm4681_vm13 = vnez %v4680_v3  ;;  %vm4685_vm2 = vnez %v4684_v24  ;;  %v4717_v60 = vld [vmem:[#allocation53_spill] sm:$0xff]  ;;  %v4721_v38 = vld [vmem:[#allocation52_spill] sm:$0xff]  ;;  %v4724_v3 = vld [vmem:[#allocation19_spill] sm:$0xff] }
 0x12e   : > { %v4678_v43 = vsel %vm4676_vm5, 0.0, %v4677_v8  ;;  %v4683_v15 = vsel %vm4681_vm13, 0.0, %v4682_v50  ;;  %v4687_v45 = vsel %vm4685_vm2, 0.0, %v4686_v14  ;;  %vm4688_vm1 = vcmask 1040384   ;;  %v4729_v24 = vld [vmem:[#allocation33_spill] sm:$0xff]  ;;  %v4731_v14 = vld [vmem:[#allocation36_spill] sm:$0xff] }
 0x12f   : > { %v1221_v13 = vsel %vm4679_vm11, %v1220_v55, %v4678_v43  ;;  %v1227_v59 = vsel %vm4688_vm1, %v4687_v45, %v4683_v15  ;;  %vm4689_vm7 = vcmask 130048   ;;  %v1193_v12 = vmax.f32 %v1191_v42, %v1192_v4  ;;  %v4705_v42 = vld [vmem:[#allocation16_spill] sm:$0xff] }
 0x130   : > { %1248 = vst.msk [vmem:[%s3795_s8] sm:$0xff] %vm4689_vm7, %v1212_v46  ;;  %vm4691_vm3 = vnez %v4690_v7  ;;  %vm4694_vm14 = vcmask 1043456   ;;  %vm4696_vm5 = vnez %v4695_v34  ;;  %vm4699_vm13 = vcmask 1042432   ;;  %v4708_v46 = vld [vmem:[#allocation32_spill] sm:$0xff]  ;;  %v4734_v7 = vld [vmem:[#allocation45_spill] sm:$0xff] }
 0x131   : > { %v4693_v40 = vsel %vm4691_vm3, 0.0, %v4692_v52  ;;  %v4698_v6 = vsel %vm4696_vm5, 0.0, %v4697_v28  ;;  %vm4700_vm11 = vnez %v4464_v16  ;;  %vm4702_vm2 = vcmask 1041408   ;;  %v4713_v16 = vld [vmem:[#allocation43_spill] sm:$0xff]  ;;  %v4736_v52 = vld [vmem:[#allocation44_spill] sm:$0xff] }
 0x132   : > { %v1216_v11 = vsel %vm4694_vm14, %v1215_v39, %v4693_v40  ;;  %v1222_v53 = vsel %vm4699_vm13, %v1221_v13, %v4698_v6  ;;  %v4701_v55 = vsel %vm4700_vm11, 0.0, %v3067_v51  ;;  %vm4704_vm7 = vnez %v4703_v37  ;;  %v4719_v39 = vld [vmem:[#allocation54_spill] sm:$0xff] }
 0x133   : > { %v1228_v36 = vsel %vm4702_vm2, %v1227_v59, %v4701_v55  ;;  %v4706_v4 = vsel %vm4704_vm7, 0.0, %v4705_v42  ;;  %vm4707_vm1 = vcmask 1044480   ;;  %vm4709_vm3 = vnez %v4708_v46  ;;  %v4744_v6 = vld [vmem:[#allocation34_spill] sm:$0xff]  ;;  %v4751_v42 = vld [vmem:[#allocation47_spill] sm:$0xff]  ;;  %v4754_v46 = vld [vmem:[#allocation57_spill] sm:$0xff] }
 0x134   : > { %v1217_v23 = vsel %vm4707_vm1, %v1216_v11, %v4706_v4  ;;  %v4711_v41 = vsel %vm4709_vm3, 0.0, %v4710_v10  ;;  %vm4712_vm5 = vnez %v4467_v21  ;;  %vm4716_vm11 = vnez %v4715_v56  ;;  %v4726_v21 = vld [vmem:[#allocation21_spill] sm:$0xff]  ;;  %v4741_v11 = vld [vmem:[#allocation22_spill] sm:$0xff]  ;;  %v4756_v10 = vld [vmem:[#allocation56_spill] sm:$0xff] }
 0x135   : > { %v1223_v1 = vsel %vm4694_vm14, %v1222_v53, %v4711_v41  ;;  %v4714_v19 = vsel %vm4712_vm5, 0.0, %v4713_v16  ;;  %v4718_v49 = vsel %vm4716_vm11, 0.0, %v4717_v60  ;;  %vm4720_vm2 = vnez %v4719_v39  ;;  %v4746_v53 = vld [vmem:[#allocation37_spill] sm:$0xff]  ;;  %v4749_v37 = vld [vmem:[#allocation46_spill] sm:$0xff]  ;;  %v4759_v16 = vld [vmem:[#allocation35_spill] sm:$0xff] }
 0x136   : > { %v1229_v51 = vsel %vm4699_vm13, %v1228_v36, %v4714_v19  ;;  %v4722_v8 = vsel %vm4720_vm2, 0.0, %v4721_v38  ;;  %vm4723_vm7 = vcmask 1040384   ;;  %v1198_v13 = vsel %vm3788_vm0, 0.0, %v1193_v12  ;;  %v4739_v12 = vld [vmem:[#allocation20_spill] sm:$0xff]  ;;  %v4761_v19 = vld [vmem:[#allocation38_spill] sm:$0xff] }
 0x137   : > { %v1234_v43 = vsel %vm4723_vm7, %v4722_v8, %v4718_v49  ;;  %vm4725_vm1 = vnez %v4724_v3  ;;  %vm4728_vm3 = vcmask 1045504   ;;  %vm4730_vm14 = vnez %v4729_v24  ;;  %v4764_v60 = vld [vmem:[#allocation48_spill] sm:$0xff]  ;;  %v4766_v49 = vld [vmem:[#allocation50_spill] sm:$0xff]  ;;  %v4772_v3 = vld [vmem:[#allocation49_spill] sm:$0xff] }
 0x138   : > { %v4727_v50 = vsel %vm4725_vm1, 0.0, %v4726_v21  ;;  %v4732_v45 = vsel %vm4730_vm14, 0.0, %v4731_v14  ;;  %vm4733_vm5 = vcmask 1044480   ;;  %vm4735_vm13 = vnez %v4734_v7  ;;  %vm4748_vm1 = vmmov %vm4728_vm3 }
 0x139   : > { %v1218_v15 = vsel %vm4728_vm3, %v1217_v23, %v4727_v50  ;;  %v1224_v59 = vsel %vm4733_vm5, %v1223_v1, %v4732_v45  ;;  %v4737_v40 = vsel %vm4735_vm13, 0.0, %v4736_v52  ;;  %vm4738_vm11 = vcmask 1043456   ;;  %vm4753_vm14 = vmmov %vm4733_vm5 }
 0x13a   : > { %v1230_v5 = vsel %vm4738_vm11, %v1229_v51, %v4737_v40  ;;  %vm4740_vm0 = vnez %v4739_v12  ;;  %vm4743_vm2 = vcmask 1046528   ;;  %vm4745_vm7 = vnez %v4744_v6 }
 0x13b   : > { %v4742_v34 = vsel %vm4740_vm0, 0.0, %v4741_v11  ;;  %v4747_v55 = vsel %vm4745_vm7, 0.0, %v4746_v53  ;;  %vm4750_vm3 = vnez %v4749_v37  ;;  %vm4755_vm5 = vnez %v4754_v46  ;;  %vm4763_vm0 = vmmov %vm4743_vm2 }
 0x13c   : > { %v1219_v28 = vsel %vm4743_vm2, %v1218_v15, %v4742_v34  ;;  %v1225_v36 = vsel %vm4748_vm1, %v1224_v59, %v4747_v55  ;;  %v4752_v4 = vsel %vm4750_vm3, 0.0, %v4751_v42  ;;  %v4757_v41 = vsel %vm4755_vm5, 0.0, %v4756_v10  ;;  %vm4768_vm7 = vmmov %vm4748_vm1 }
 0x13d   : > { %v1231_v23 = vsel %vm4753_vm14, %v1230_v5, %v4752_v4  ;;  %vm4758_vm13 = vcmask 1041408   ;;  %vm4760_vm11 = vnez %v4759_v16  ;;  %vm4765_vm2 = vnez %v4764_v60  ;;  %vm4776_vm4 = vmmov %vm4763_vm0 }
 0x13e   : > { %v1235_v1 = vsel %vm4758_vm13, %v1234_v43, %v4757_v41  ;;  %v4762_v51 = vsel %vm4760_vm11, 0.0, %v4761_v19  ;;  %v4767_v39 = vsel %vm4765_vm2, 0.0, %v4766_v49  ;;  %vm4769_vm1 = vcmask 1042432  }
 0x13f   : > { %v1226_v56 = vsel %vm4763_vm0, %v1225_v36, %v4762_v51  ;;  %v1232_v38 = vsel %vm4768_vm7, %v1231_v23, %v4767_v39  ;;  %v1236_v8 = vsel %vm4769_vm1, %v1235_v1, %v977_v30  ;;  %vm4770_vm3 = vcmask 1040384   ;;  %vm4783_vm2 = vmmov %vm4769_vm1 }
 0x140   : > { %v1241_v43 = vsel %vm4770_vm3, %v1042_v63, %v1055_v35  ;;  %vm4771_vm14 = vcmask 130048   ;;  %vm4773_vm5 = vnez %v4772_v3  ;;  %vm4778_vm13 = vcmask 1043456   ;;  %vm4791_vm3 = vmmov %vm4776_vm4 }
 0x141   : > { %1249 = vst.msk [vmem:[%s3795_s8 + $0x8] sm:$0xff] %vm4771_vm14, %v1219_v28  ;;  %v4775_v21 = vsel %vm4773_vm5, 0.0, %v4774_v31  ;;  %v1237_v29 = vsel %vm4778_vm13, %v1236_v8, %v4777_v18  ;;  %v1242_v57 = vsel %vm4779_vm12, %v1241_v43, %v1120_v25  ;;  %vm4780_vm9 = vmmov %vm4771_vm14  ;;  %vm1254_vm11 = vcmask 122880  }
 0x142   : > { %v1233_v48 = vsel %vm4776_vm4, %v1232_v38, %v4775_v21  ;;  %1250 = vst.msk [vmem:[%s3795_s8 + $0x10] sm:$0xff] %vm4780_vm9, %v1226_v56  ;;  %v1172_v44 = vsel %vm3782_vm6, 0.0, %v1167_v61  ;;  %v4781_v30 = vsel %vm3480_vm15, 0.0, %v3556_v17  ;;  %vm4782_vm0 = vcmask 1044480   ;;  %vm4784_vm10 = vmmov %vm4780_vm9 }
 0x143   : > { %v1238_v20 = vsel %vm4782_vm0, %v1237_v29, %v4781_v30  ;;  %v1243_v33 = vsel %vm4783_vm2, %v1242_v57, %v1133_v2  ;;  %1251 = vst.msk [vmem:[%s3795_s8 + $0x18] sm:$0xff] %vm4784_vm10, %v1233_v48  ;;  %v1185_v63 = vsel %vm3804_vm8, 0.0, %v1180_v58  ;;  %vm4785_vm7 = vnez %v4558_v62  ;;  %vm4788_vm6 = vmmov %vm4778_vm13 }
 0x144   : > { %v4786_v35 = vsel %vm4785_vm7, 0.0, %v3574_v27  ;;  %vm4787_vm1 = vcmask 1045504   ;;  %v1244_v47 = vsel %vm4788_vm6, %v1243_v33, %v1146_v0  ;;  %1255 = vst.msk [vmem:[%s3795_s8 + $0x30] sm:$0x1] %vm1254_vm11, %v1198_v13  ;;  %vm4789_vm15 = vnez %v4561_v26  ;;  %vm4792_vm14 = vmmov %vm4782_vm0 }
 0x145   : > { %v1239_v25 = vsel %vm4787_vm1, %v1238_v20, %v4786_v35  ;;  %v4790_v32 = vsel %vm4789_vm15, 0.0, %v3593_v22  ;;  %v1245_v2 = vsel %vm4792_vm14, %v1244_v47, %v1159_v9  ;;  %vm4793_vm5 = vmmov %vm4787_vm1 }
 0x146   : > { %v1240_v17 = vsel %vm4791_vm3, %v1239_v25, %v4790_v32  ;;  %v1246_v54 = vsel %vm4793_vm5, %v1245_v2, %v1172_v44  ;;  %vm4794_vm8 = vmmov %vm4780_vm9 }
 0x147   : > { %1252 = vst.msk [vmem:[%s3795_s8 + $0x20] sm:$0xff] %vm4794_vm8, %v1240_v17  ;;  %vm4795_vm4 = vmmov %vm4791_vm3 }
 0x148   : > { %v1247_v62 = vsel %vm4795_vm4, %v1246_v54, %v1185_v63  ;;  %vm4796_vm13 = vmmov %vm4794_vm8 }
 0x149   : > { %1253 = vst.msk [vmem:[%s3795_s8 + $0x28] sm:$0xff] %vm4796_vm13, %v1247_v62 }
 0x14a PF: > { %s38_s1 = sadd.s32 1, %s1384_s1  }
 0x14b   : > { %p35_p13 = scmp.ge.s32.totalorder %s38_s1, 10  }
 0x14d   :  { %37 = sbr.rel (!%p35_p13) target bundleno = 12 (0xc), region = 51 }

</bundles_post_ra>
